<compile_context>
chip_gen: v7x
topology: tpu7x:2x2x1
jax: 0.10.0
libtpu: 0.0.40
codegen_flags: <defaults>
</compile_context>

<pallas_src>
import functools

import jax
import jax.numpy as jnp
from jax.experimental import pallas as pl
from jax.experimental.pallas import tpu as pltpu


# ----------------------------------------------------------------------------
# Fused OSA kernel
# ----------------------------------------------------------------------------
def _make_osa_kernel(layer_per_block, H, W, in_ch, stage_ch, concat_ch,
                     identity, compute_dtype):
    """Builds the fused kernel for fixed (static) module hyper-parameters."""
    L = layer_per_block
    HW = H * W

    def kernel(*refs):
        # ---- unpack refs ---------------------------------------------------
        idx = 0
        x_ref = refs[idx]; idx += 1                       # (1, H, W, in_ch) f32
        layer_refs = []
        for _ in range(L):                                # (w, scale, bias)
            layer_refs.append((refs[idx], refs[idx + 1], refs[idx + 2]))
            idx += 3
        wc_refs = [refs[idx + j] for j in range(L + 1)]   # 1x1 weight segments
        idx += L + 1
        scat_ref = refs[idx]; bcat_ref = refs[idx + 1]; idx += 2
        o_ref = refs[idx]; idx += 1                       # (1, H, W, concat_ch)
        pad0_ref = refs[idx]                              # (H+2, W+2, in_ch) f32
        pad1_ref = refs[idx + 1]                          # (H+2, W+2, stage_ch) f32

        # ---- stage the input tile into the zeroed halo scratch --------------
        pad0_ref[...] = jnp.zeros_like(pad0_ref)
        pad1_ref[...] = jnp.zeros_like(pad1_ref)
        x_hw = x_ref[0]                                   # (H, W, in_ch) f32
        pad0_ref[1:H + 1, 1:W + 1, :] = x_hw

        # ---- 1x1 "concat" conv, segment 0 (the raw input), f32 accumulator --
        x_mm = x_hw.reshape(HW, in_ch).astype(compute_dtype)
        acc = jnp.dot(x_mm, wc_refs[0][...],
                      preferred_element_type=jnp.float32)  # (HW, concat_ch)

        # ---- the L fused 3x3 conv + BN + ReLU layers -------------------------
        cur_pad = pad0_ref
        cur_cin = in_ch
        for i in range(L):
            w_ref, s_ref, b_ref = layer_refs[i]
            conv = jnp.zeros((HW, stage_ch), jnp.float32)
            # 9 shifted-window matmuls over the halo-padded VMEM buffer
            # (all slices static; bf16 operands, f32 accumulation on the MXU).
            for ky in range(3):
                for kx in range(3):
                    patch = cur_pad[ky:ky + H, kx:kx + W, :]
                    patch = patch.reshape(HW, cur_cin).astype(compute_dtype)
                    conv = conv + jnp.dot(patch, w_ref[ky, kx],
                                          preferred_element_type=jnp.float32)
            # folded-BN scale/bias + ReLU epilogue in f32.
            y = jnp.maximum(conv * s_ref[...] + b_ref[...], 0.0)  # (HW, stage_ch)

            # Fold this layer's contribution into the 1x1 "concat" conv NOW so
            # the concat never materializes and pad1 can be reused next layer.
            acc = acc + jnp.dot(y.astype(compute_dtype), wc_refs[i + 1][...],
                                preferred_element_type=jnp.float32)

            if i + 1 < L:
                pad1_ref[1:H + 1, 1:W + 1, :] = y.reshape(H, W, stage_ch)
                cur_pad = pad1_ref
                cur_cin = stage_ch

        # ---- 1x1 conv epilogue: BN + ReLU (+ residual, AFTER the ReLU) -------
        out = jnp.maximum(acc * scat_ref[...] + bcat_ref[...], 0.0)
        if identity:
            out = out + x_hw.reshape(HW, in_ch)           # requires in_ch == concat_ch
        o_ref[0] = out.reshape(H, W, concat_ch).astype(o_ref.dtype)

    return kernel


# ----------------------------------------------------------------------------
# Wrapper around pallas_call
# ----------------------------------------------------------------------------
def osa_forward_nhwc(x_nhwc, params, identity, compute_dtype=jnp.bfloat16):
    """x_nhwc: (N,H,W,in_ch) f32. Returns (N,H,W,concat_ch)."""
    N, H, W, in_ch = x_nhwc.shape
    layers = params["layers"]
    L = len(layers)
    stage_ch = layers[0]["w"].shape[-1]
    wcat = params["concat"]["w"]
    cat_ch, concat_ch = wcat.shape
    assert cat_ch == in_ch + L * stage_ch
    if identity:
        assert concat_ch == in_ch, "identity add requires concat_ch == in_ch"

    inputs = [x_nhwc]
    in_specs = [pl.BlockSpec((1, H, W, in_ch), lambda n: (n, 0, 0, 0))]

    # 3x3 layer weights (bf16 MXU operands) + folded BN params (f32).
    cin = in_ch
    for lp in layers:
        inputs += [lp["w"].astype(compute_dtype),
                   lp["scale"].reshape(1, stage_ch),
                   lp["bias"].reshape(1, stage_ch)]
        in_specs += [
            pl.BlockSpec((3, 3, cin, stage_ch), lambda n: (0, 0, 0, 0)),
            pl.BlockSpec((1, stage_ch), lambda n: (0, 0)),
            pl.BlockSpec((1, stage_ch), lambda n: (0, 0)),
        ]
        cin = stage_ch

    # 1x1 "concat" weight, pre-split along its input-channel axis so the
    # channel concat never materializes: y = sum_k dot(out_k, W[seg_k, :]).
    wcat_c = wcat.astype(compute_dtype)
    seg_sizes = [in_ch] + [stage_ch] * L
    off = 0
    for sz in seg_sizes:
        inputs.append(wcat_c[off:off + sz, :])
        in_specs.append(pl.BlockSpec((sz, concat_ch), lambda n: (0, 0)))
        off += sz
    inputs += [params["concat"]["scale"].reshape(1, concat_ch),
               params["concat"]["bias"].reshape(1, concat_ch)]
    in_specs += [pl.BlockSpec((1, concat_ch), lambda n: (0, 0)),
                 pl.BlockSpec((1, concat_ch), lambda n: (0, 0))]

    kernel = _make_osa_kernel(L, H, W, in_ch, stage_ch, concat_ch,
                              identity, compute_dtype)

    return pl.pallas_call(
        kernel,
        out_shape=jax.ShapeDtypeStruct((N, H, W, concat_ch), x_nhwc.dtype),
        grid_spec=pltpu.PrefetchScalarGridSpec(
            num_scalar_prefetch=0,
            grid=(N,),
            in_specs=in_specs,
            out_specs=pl.BlockSpec((1, H, W, concat_ch),
                                   lambda n: (n, 0, 0, 0)),
            scratch_shapes=[
                pltpu.VMEM((H + 2, W + 2, in_ch), jnp.float32),
                pltpu.VMEM((H + 2, W + 2, stage_ch), jnp.float32),
            ],
        ),
        compiler_params=pltpu.CompilerParams(
            dimension_semantics=("parallel",)),
    )(*inputs)


# ----------------------------------------------------------------------------
# _OSA_module parameters + forward
# ----------------------------------------------------------------------------
def fold_bn(gamma, beta, mean, var, eps=1e-5):
    scale = gamma / jnp.sqrt(var + eps)
    bias = beta - mean * scale
    return scale, bias


def init_osa_params(key, in_ch, stage_ch, concat_ch, layer_per_block):
    """Deterministic synthetic parameters (no checkpoint load)."""
    params = {"layers": []}
    in_channel = in_ch
    for _ in range(layer_per_block):
        key, kw, kg, kb, km, kv = jax.random.split(key, 6)
        w = jax.random.normal(kw, (3, 3, in_channel, stage_ch), jnp.float32) * 0.1
        gamma = 1.0 + 0.1 * jax.random.normal(kg, (stage_ch,), jnp.float32)
        beta = 0.1 * jax.random.normal(kb, (stage_ch,), jnp.float32)
        mean = 0.1 * jax.random.normal(km, (stage_ch,), jnp.float32)
        var = jnp.abs(jax.random.normal(kv, (stage_ch,), jnp.float32)) + 0.5
        scale, bias = fold_bn(gamma, beta, mean, var)
        params["layers"].append({"w": w, "scale": scale, "bias": bias})
        in_channel = stage_ch

    cat_ch = in_ch + layer_per_block * stage_ch
    key, kw, kg, kb, km, kv = jax.random.split(key, 6)
    w = jax.random.normal(kw, (cat_ch, concat_ch), jnp.float32) * 0.1
    gamma = 1.0 + 0.1 * jax.random.normal(kg, (concat_ch,), jnp.float32)
    beta = 0.1 * jax.random.normal(kb, (concat_ch,), jnp.float32)
    mean = 0.1 * jax.random.normal(km, (concat_ch,), jnp.float32)
    var = jnp.abs(jax.random.normal(kv, (concat_ch,), jnp.float32)) + 0.5
    scale, bias = fold_bn(gamma, beta, mean, var)
    params["concat"] = {"w": w, "scale": scale, "bias": bias}
    return params


@functools.partial(jax.jit, static_argnames=("identity",))
def osa_module_forward(x_nchw, params, identity=False):
    """Forward pass of _OSA_module. Input is NCHW (PyTorch convention)."""
    x = jnp.transpose(x_nchw, (0, 2, 3, 1))               # -> NHWC
    y = osa_forward_nhwc(x, params, identity)
    return jnp.transpose(y, (0, 3, 1, 2))                 # -> NCHW


# ----------------------------------------------------------------------------
# Pure-JAX reference (eval-mode BN folded), for a loose numerical sanity check
# ----------------------------------------------------------------------------
def osa_reference(x_nchw, params, identity):
    x = jnp.transpose(x_nchw, (0, 2, 3, 1)).astype(jnp.float32)
    ident = x
    outs = [x]
    for lp in params["layers"]:
        x = jax.lax.conv_general_dilated(
            x, lp["w"], window_strides=(1, 1), padding="SAME",
            dimension_numbers=("NHWC", "HWIO", "NHWC"),
            precision=jax.lax.Precision.HIGHEST)
        x = jnp.maximum(x * lp["scale"] + lp["bias"], 0.0)
        outs.append(x)
    cat = jnp.concatenate(outs, axis=-1)
    cp = params["concat"]
    y = jnp.einsum("nhwc,cd->nhwd", cat, cp["w"],
                   precision=jax.lax.Precision.HIGHEST)
    y = jnp.maximum(y * cp["scale"] + cp["bias"], 0.0)
    if identity:
        y = y + ident
    return jnp.transpose(y, (0, 3, 1, 2))


if __name__ == "__main__":
    # Small, forward-consistent shapes.
    N, H, W = 2, 16, 16
    in_ch, stage_ch, concat_ch, layer_per_block = 16, 8, 16, 3
    identity = True  # valid because concat_ch == in_ch

    key = jax.random.PRNGKey(0)
    key, kx, kp = jax.random.split(key, 3)
    x = jax.random.normal(kx, (N, in_ch, H, W), jnp.float32)  # NCHW like PyTorch
    params = init_osa_params(kp, in_ch, stage_ch, concat_ch, layer_per_block)

    out = osa_module_forward(x, params, identity=identity)
    jax.block_until_ready(out)
    assert out.shape == (N, concat_ch, H, W), out.shape

    # Loose tolerance: kernel uses bf16 MXU operands with f32 accumulation.
    ref = osa_reference(x, params, identity)
    err = float(jnp.max(jnp.abs(out.astype(jnp.float32) - ref)
                        / (jnp.abs(ref) + 1.0)))
    assert err < 0.15, f"numerical mismatch vs reference: max norm err {err}"

    print("KERNEL_OK")
</pallas_src>

<mosaic_0001>
module attributes {stable_mosaic.version = 11 : i64} {
  func.func @kernel(%arg0: i32, %arg1: memref<1x16x16x16xf32, #tpu.memory_space<vmem>>, %arg2: memref<3x3x16x8xbf16, #tpu.memory_space<vmem>>, %arg3: memref<1x8xf32, #tpu.memory_space<vmem>>, %arg4: memref<1x8xf32, #tpu.memory_space<vmem>>, %arg5: memref<3x3x8x8xbf16, #tpu.memory_space<vmem>>, %arg6: memref<1x8xf32, #tpu.memory_space<vmem>>, %arg7: memref<1x8xf32, #tpu.memory_space<vmem>>, %arg8: memref<3x3x8x8xbf16, #tpu.memory_space<vmem>>, %arg9: memref<1x8xf32, #tpu.memory_space<vmem>>, %arg10: memref<1x8xf32, #tpu.memory_space<vmem>>, %arg11: memref<16x16xbf16, #tpu.memory_space<vmem>>, %arg12: memref<8x16xbf16, #tpu.memory_space<vmem>>, %arg13: memref<8x16xbf16, #tpu.memory_space<vmem>>, %arg14: memref<8x16xbf16, #tpu.memory_space<vmem>>, %arg15: memref<1x16xf32, #tpu.memory_space<vmem>>, %arg16: memref<1x16xf32, #tpu.memory_space<vmem>>, %arg17: memref<1x16x16x16xf32, #tpu.memory_space<vmem>>, %arg18: memref<18x18x16xf32, #tpu.memory_space<vmem>>, %arg19: memref<18x18x8xf32, #tpu.memory_space<vmem>>) attributes {dimension_semantics = [#tpu.dimension_semantics<parallel>], iteration_bounds = array<i64: 2>, scalar_prefetch = 0 : i64, scratch_operands = 2 : i64, tpu.core_type = #tpu.core_type<tc>, window_params = [{transform_indices = @transform_0, window_bounds = array<i64: 1, 16, 16, 16>}, {pipeline_mode = #tpu.pipeline_mode<synchronous>, transform_indices = @transform_1, window_bounds = array<i64: 3, 3, 16, 8>}, {pipeline_mode = #tpu.pipeline_mode<synchronous>, transform_indices = @transform_2, window_bounds = array<i64: 1, 8>}, {pipeline_mode = #tpu.pipeline_mode<synchronous>, transform_indices = @transform_3, window_bounds = array<i64: 1, 8>}, {pipeline_mode = #tpu.pipeline_mode<synchronous>, transform_indices = @transform_4, window_bounds = array<i64: 3, 3, 8, 8>}, {pipeline_mode = #tpu.pipeline_mode<synchronous>, transform_indices = @transform_5, window_bounds = array<i64: 1, 8>}, {pipeline_mode = #tpu.pipeline_mode<synchronous>, transform_indices = @transform_6, window_bounds = array<i64: 1, 8>}, {pipeline_mode = #tpu.pipeline_mode<synchronous>, transform_indices = @transform_7, window_bounds = array<i64: 3, 3, 8, 8>}, {pipeline_mode = #tpu.pipeline_mode<synchronous>, transform_indices = @transform_8, window_bounds = array<i64: 1, 8>}, {pipeline_mode = #tpu.pipeline_mode<synchronous>, transform_indices = @transform_9, window_bounds = array<i64: 1, 8>}, {pipeline_mode = #tpu.pipeline_mode<synchronous>, transform_indices = @transform_10, window_bounds = array<i64: 16, 16>}, {pipeline_mode = #tpu.pipeline_mode<synchronous>, transform_indices = @transform_11, window_bounds = array<i64: 8, 16>}, {pipeline_mode = #tpu.pipeline_mode<synchronous>, transform_indices = @transform_12, window_bounds = array<i64: 8, 16>}, {pipeline_mode = #tpu.pipeline_mode<synchronous>, transform_indices = @transform_13, window_bounds = array<i64: 8, 16>}, {pipeline_mode = #tpu.pipeline_mode<synchronous>, transform_indices = @transform_14, window_bounds = array<i64: 1, 16>}, {pipeline_mode = #tpu.pipeline_mode<synchronous>, transform_indices = @transform_15, window_bounds = array<i64: 1, 16>}, {transform_indices = @transform_16, window_bounds = array<i64: 1, 16, 16, 16>}]} {
    %cst = arith.constant 0.000000e+00 : f32
    %0 = vector.broadcast %cst : f32 to vector<18x18x16xf32>
    %c0 = arith.constant 0 : index
    %c0_0 = arith.constant 0 : index
    %c0_1 = arith.constant 0 : index
    %1 = vector.load %arg18[%c0, %c0_0, %c0_1] : memref<18x18x16xf32, #tpu.memory_space<vmem>>, vector<18x18x16xf32>
    tpu.vector_store %arg18[%c0, %c0_0, %c0_1], %0 {strides = array<i32>} : memref<18x18x16xf32, #tpu.memory_space<vmem>>, vector<18x18x16xf32>,
    %cst_2 = arith.constant 0.000000e+00 : f32
    %2 = vector.broadcast %cst_2 : f32 to vector<18x18x8xf32>
    %c0_3 = arith.constant 0 : index
    %c0_4 = arith.constant 0 : index
    %c0_5 = arith.constant 0 : index
    %3 = vector.load %arg19[%c0_3, %c0_4, %c0_5] : memref<18x18x8xf32, #tpu.memory_space<vmem>>, vector<18x18x8xf32>
    tpu.vector_store %arg19[%c0_3, %c0_4, %c0_5], %2 {strides = array<i32>} : memref<18x18x8xf32, #tpu.memory_space<vmem>>, vector<18x18x8xf32>,
    %c0_6 = arith.constant 0 : index
    %c0_7 = arith.constant 0 : index
    %c0_8 = arith.constant 0 : index
    %c0_9 = arith.constant 0 : index
    %4 = vector.load %arg1[%c0_6, %c0_7, %c0_8, %c0_9] : memref<1x16x16x16xf32, #tpu.memory_space<vmem>>, vector<1x16x16x16xf32>
    %5 = vector.shape_cast %4 : vector<1x16x16x16xf32> to vector<16x16x16xf32>
    %c1 = arith.constant 1 : index
    %c1_10 = arith.constant 1 : index
    %c0_11 = arith.constant 0 : index
    %6 = vector.load %arg18[%c1, %c1_10, %c0_11] : memref<18x18x16xf32, #tpu.memory_space<vmem>>, vector<16x16x16xf32>
    tpu.vector_store %arg18[%c1, %c1_10, %c0_11], %5 {strides = array<i32>} : memref<18x18x16xf32, #tpu.memory_space<vmem>>, vector<16x16x16xf32>,
    %7 = vector.shape_cast %5 : vector<16x16x16xf32> to vector<256x16xf32>
    %8 = arith.truncf %7 : vector<256x16xf32> to vector<256x16xbf16>
    %c0_12 = arith.constant 0 : index
    %c0_13 = arith.constant 0 : index
    %9 = vector.load %arg11[%c0_12, %c0_13] : memref<16x16xbf16, #tpu.memory_space<vmem>>, vector<16x16xbf16>
    %cst_14 = arith.constant dense<0.000000e+00> : vector<256x16xf32>
    %10 = tpu.matmul %8, %9, %cst_14 {dimension_numbers = #tpu.dot_dimension_numbers<[1], [0], [0], [1], [0, 0, 1, 1], [], []>} : vector<256x16xbf16>, vector<16x16xbf16>, vector<256x16xf32> -> vector<256x16xf32>
    %cst_15 = arith.constant 0.000000e+00 : f32
    %11 = vector.broadcast %cst_15 : f32 to vector<256x8xf32>
    %c0_16 = arith.constant 0 : index
    %c0_17 = arith.constant 0 : index
    %c0_18 = arith.constant 0 : index
    %12 = vector.load %arg18[%c0_16, %c0_17, %c0_18] : memref<18x18x16xf32, #tpu.memory_space<vmem>>, vector<16x16x16xf32>
    %13 = vector.shape_cast %12 : vector<16x16x16xf32> to vector<256x16xf32>
    %14 = arith.truncf %13 : vector<256x16xf32> to vector<256x16xbf16>
    %c0_19 = arith.constant 0 : index
    %c0_20 = arith.constant 0 : index
    %c0_21 = arith.constant 0 : index
    %c0_22 = arith.constant 0 : index
    %15 = vector.load %arg2[%c0_19, %c0_20, %c0_21, %c0_22] : memref<3x3x16x8xbf16, #tpu.memory_space<vmem>>, vector<1x1x16x8xbf16>
    %16 = vector.shape_cast %15 : vector<1x1x16x8xbf16> to vector<16x8xbf16>
    %cst_23 = arith.constant dense<0.000000e+00> : vector<256x8xf32>
    %17 = tpu.matmul %14, %16, %cst_23 {dimension_numbers = #tpu.dot_dimension_numbers<[1], [0], [0], [1], [0, 0, 1, 1], [], []>} : vector<256x16xbf16>, vector<16x8xbf16>, vector<256x8xf32> -> vector<256x8xf32>
    %18 = arith.addf %11, %17 : vector<256x8xf32>
    %c0_24 = arith.constant 0 : index
    %c1_25 = arith.constant 1 : index
    %c0_26 = arith.constant 0 : index
    %19 = vector.load %arg18[%c0_24, %c1_25, %c0_26] : memref<18x18x16xf32, #tpu.memory_space<vmem>>, vector<16x16x16xf32>
    %20 = vector.shape_cast %19 : vector<16x16x16xf32> to vector<256x16xf32>
    %21 = arith.truncf %20 : vector<256x16xf32> to vector<256x16xbf16>
    %c0_27 = arith.constant 0 : index
    %c1_28 = arith.constant 1 : index
    %c0_29 = arith.constant 0 : index
    %c0_30 = arith.constant 0 : index
    %22 = vector.load %arg2[%c0_27, %c1_28, %c0_29, %c0_30] : memref<3x3x16x8xbf16, #tpu.memory_space<vmem>>, vector<1x1x16x8xbf16>
    %23 = vector.shape_cast %22 : vector<1x1x16x8xbf16> to vector<16x8xbf16>
    %cst_31 = arith.constant dense<0.000000e+00> : vector<256x8xf32>
    %24 = tpu.matmul %21, %23, %cst_31 {dimension_numbers = #tpu.dot_dimension_numbers<[1], [0], [0], [1], [0, 0, 1, 1], [], []>} : vector<256x16xbf16>, vector<16x8xbf16>, vector<256x8xf32> -> vector<256x8xf32>
    %25 = arith.addf %18, %24 : vector<256x8xf32>
    %c0_32 = arith.constant 0 : index
    %c2 = arith.constant 2 : index
    %c0_33 = arith.constant 0 : index
    %26 = vector.load %arg18[%c0_32, %c2, %c0_33] : memref<18x18x16xf32, #tpu.memory_space<vmem>>, vector<16x16x16xf32>
    %27 = vector.shape_cast %26 : vector<16x16x16xf32> to vector<256x16xf32>
    %28 = arith.truncf %27 : vector<256x16xf32> to vector<256x16xbf16>
    %c0_34 = arith.constant 0 : index
    %c2_35 = arith.constant 2 : index
    %c0_36 = arith.constant 0 : index
    %c0_37 = arith.constant 0 : index
    %29 = vector.load %arg2[%c0_34, %c2_35, %c0_36, %c0_37] : memref<3x3x16x8xbf16, #tpu.memory_space<vmem>>, vector<1x1x16x8xbf16>
    %30 = vector.shape_cast %29 : vector<1x1x16x8xbf16> to vector<16x8xbf16>
    %cst_38 = arith.constant dense<0.000000e+00> : vector<256x8xf32>
    %31 = tpu.matmul %28, %30, %cst_38 {dimension_numbers = #tpu.dot_dimension_numbers<[1], [0], [0], [1], [0, 0, 1, 1], [], []>} : vector<256x16xbf16>, vector<16x8xbf16>, vector<256x8xf32> -> vector<256x8xf32>
    %32 = arith.addf %25, %31 : vector<256x8xf32>
    %c1_39 = arith.constant 1 : index
    %c0_40 = arith.constant 0 : index
    %c0_41 = arith.constant 0 : index
    %33 = vector.load %arg18[%c1_39, %c0_40, %c0_41] : memref<18x18x16xf32, #tpu.memory_space<vmem>>, vector<16x16x16xf32>
    %34 = vector.shape_cast %33 : vector<16x16x16xf32> to vector<256x16xf32>
    %35 = arith.truncf %34 : vector<256x16xf32> to vector<256x16xbf16>
    %c1_42 = arith.constant 1 : index
    %c0_43 = arith.constant 0 : index
    %c0_44 = arith.constant 0 : index
    %c0_45 = arith.constant 0 : index
    %36 = vector.load %arg2[%c1_42, %c0_43, %c0_44, %c0_45] : memref<3x3x16x8xbf16, #tpu.memory_space<vmem>>, vector<1x1x16x8xbf16>
    %37 = vector.shape_cast %36 : vector<1x1x16x8xbf16> to vector<16x8xbf16>
    %cst_46 = arith.constant dense<0.000000e+00> : vector<256x8xf32>
    %38 = tpu.matmul %35, %37, %cst_46 {dimension_numbers = #tpu.dot_dimension_numbers<[1], [0], [0], [1], [0, 0, 1, 1], [], []>} : vector<256x16xbf16>, vector<16x8xbf16>, vector<256x8xf32> -> vector<256x8xf32>
    %39 = arith.addf %32, %38 : vector<256x8xf32>
    %c1_47 = arith.constant 1 : index
    %c1_48 = arith.constant 1 : index
    %c0_49 = arith.constant 0 : index
    %40 = vector.load %arg18[%c1_47, %c1_48, %c0_49] : memref<18x18x16xf32, #tpu.memory_space<vmem>>, vector<16x16x16xf32>
    %41 = vector.shape_cast %40 : vector<16x16x16xf32> to vector<256x16xf32>
    %42 = arith.truncf %41 : vector<256x16xf32> to vector<256x16xbf16>
    %c1_50 = arith.constant 1 : index
    %c1_51 = arith.constant 1 : index
    %c0_52 = arith.constant 0 : index
    %c0_53 = arith.constant 0 : index
    %43 = vector.load %arg2[%c1_50, %c1_51, %c0_52, %c0_53] : memref<3x3x16x8xbf16, #tpu.memory_space<vmem>>, vector<1x1x16x8xbf16>
    %44 = vector.shape_cast %43 : vector<1x1x16x8xbf16> to vector<16x8xbf16>
    %cst_54 = arith.constant dense<0.000000e+00> : vector<256x8xf32>
    %45 = tpu.matmul %42, %44, %cst_54 {dimension_numbers = #tpu.dot_dimension_numbers<[1], [0], [0], [1], [0, 0, 1, 1], [], []>} : vector<256x16xbf16>, vector<16x8xbf16>, vector<256x8xf32> -> vector<256x8xf32>
    %46 = arith.addf %39, %45 : vector<256x8xf32>
    %c1_55 = arith.constant 1 : index
    %c2_56 = arith.constant 2 : index
    %c0_57 = arith.constant 0 : index
    %47 = vector.load %arg18[%c1_55, %c2_56, %c0_57] : memref<18x18x16xf32, #tpu.memory_space<vmem>>, vector<16x16x16xf32>
    %48 = vector.shape_cast %47 : vector<16x16x16xf32> to vector<256x16xf32>
    %49 = arith.truncf %48 : vector<256x16xf32> to vector<256x16xbf16>
    %c1_58 = arith.constant 1 : index
    %c2_59 = arith.constant 2 : index
    %c0_60 = arith.constant 0 : index
    %c0_61 = arith.constant 0 : index
    %50 = vector.load %arg2[%c1_58, %c2_59, %c0_60, %c0_61] : memref<3x3x16x8xbf16, #tpu.memory_space<vmem>>, vector<1x1x16x8xbf16>
    %51 = vector.shape_cast %50 : vector<1x1x16x8xbf16> to vector<16x8xbf16>
    %cst_62 = arith.constant dense<0.000000e+00> : vector<256x8xf32>
    %52 = tpu.matmul %49, %51, %cst_62 {dimension_numbers = #tpu.dot_dimension_numbers<[1], [0], [0], [1], [0, 0, 1, 1], [], []>} : vector<256x16xbf16>, vector<16x8xbf16>, vector<256x8xf32> -> vector<256x8xf32>
    %53 = arith.addf %46, %52 : vector<256x8xf32>
    %c2_63 = arith.constant 2 : index
    %c0_64 = arith.constant 0 : index
    %c0_65 = arith.constant 0 : index
    %54 = vector.load %arg18[%c2_63, %c0_64, %c0_65] : memref<18x18x16xf32, #tpu.memory_space<vmem>>, vector<16x16x16xf32>
    %55 = vector.shape_cast %54 : vector<16x16x16xf32> to vector<256x16xf32>
    %56 = arith.truncf %55 : vector<256x16xf32> to vector<256x16xbf16>
    %c2_66 = arith.constant 2 : index
    %c0_67 = arith.constant 0 : index
    %c0_68 = arith.constant 0 : index
    %c0_69 = arith.constant 0 : index
    %57 = vector.load %arg2[%c2_66, %c0_67, %c0_68, %c0_69] : memref<3x3x16x8xbf16, #tpu.memory_space<vmem>>, vector<1x1x16x8xbf16>
    %58 = vector.shape_cast %57 : vector<1x1x16x8xbf16> to vector<16x8xbf16>
    %cst_70 = arith.constant dense<0.000000e+00> : vector<256x8xf32>
    %59 = tpu.matmul %56, %58, %cst_70 {dimension_numbers = #tpu.dot_dimension_numbers<[1], [0], [0], [1], [0, 0, 1, 1], [], []>} : vector<256x16xbf16>, vector<16x8xbf16>, vector<256x8xf32> -> vector<256x8xf32>
    %60 = arith.addf %53, %59 : vector<256x8xf32>
    %c2_71 = arith.constant 2 : index
    %c1_72 = arith.constant 1 : index
    %c0_73 = arith.constant 0 : index
    %61 = vector.load %arg18[%c2_71, %c1_72, %c0_73] : memref<18x18x16xf32, #tpu.memory_space<vmem>>, vector<16x16x16xf32>
    %62 = vector.shape_cast %61 : vector<16x16x16xf32> to vector<256x16xf32>
    %63 = arith.truncf %62 : vector<256x16xf32> to vector<256x16xbf16>
    %c2_74 = arith.constant 2 : index
    %c1_75 = arith.constant 1 : index
    %c0_76 = arith.constant 0 : index
    %c0_77 = arith.constant 0 : index
    %64 = vector.load %arg2[%c2_74, %c1_75, %c0_76, %c0_77] : memref<3x3x16x8xbf16, #tpu.memory_space<vmem>>, vector<1x1x16x8xbf16>
    %65 = vector.shape_cast %64 : vector<1x1x16x8xbf16> to vector<16x8xbf16>
    %cst_78 = arith.constant dense<0.000000e+00> : vector<256x8xf32>
    %66 = tpu.matmul %63, %65, %cst_78 {dimension_numbers = #tpu.dot_dimension_numbers<[1], [0], [0], [1], [0, 0, 1, 1], [], []>} : vector<256x16xbf16>, vector<16x8xbf16>, vector<256x8xf32> -> vector<256x8xf32>
    %67 = arith.addf %60, %66 : vector<256x8xf32>
    %c2_79 = arith.constant 2 : index
    %c2_80 = arith.constant 2 : index
    %c0_81 = arith.constant 0 : index
    %68 = vector.load %arg18[%c2_79, %c2_80, %c0_81] : memref<18x18x16xf32, #tpu.memory_space<vmem>>, vector<16x16x16xf32>
    %69 = vector.shape_cast %68 : vector<16x16x16xf32> to vector<256x16xf32>
    %70 = arith.truncf %69 : vector<256x16xf32> to vector<256x16xbf16>
    %c2_82 = arith.constant 2 : index
    %c2_83 = arith.constant 2 : index
    %c0_84 = arith.constant 0 : index
    %c0_85 = arith.constant 0 : index
    %71 = vector.load %arg2[%c2_82, %c2_83, %c0_84, %c0_85] : memref<3x3x16x8xbf16, #tpu.memory_space<vmem>>, vector<1x1x16x8xbf16>
    %72 = vector.shape_cast %71 : vector<1x1x16x8xbf16> to vector<16x8xbf16>
    %cst_86 = arith.constant dense<0.000000e+00> : vector<256x8xf32>
    %73 = tpu.matmul %70, %72, %cst_86 {dimension_numbers = #tpu.dot_dimension_numbers<[1], [0], [0], [1], [0, 0, 1, 1], [], []>} : vector<256x16xbf16>, vector<16x8xbf16>, vector<256x8xf32> -> vector<256x8xf32>
    %74 = arith.addf %67, %73 : vector<256x8xf32>
    %c0_87 = arith.constant 0 : index
    %c0_88 = arith.constant 0 : index
    %75 = vector.load %arg3[%c0_87, %c0_88] : memref<1x8xf32, #tpu.memory_space<vmem>>, vector<1x8xf32>
    %76 = vector.broadcast %75 : vector<1x8xf32> to vector<256x8xf32>
    %77 = arith.mulf %74, %76 : vector<256x8xf32>
    %c0_89 = arith.constant 0 : index
    %c0_90 = arith.constant 0 : index
    %78 = vector.load %arg4[%c0_89, %c0_90] : memref<1x8xf32, #tpu.memory_space<vmem>>, vector<1x8xf32>
    %79 = vector.broadcast %78 : vector<1x8xf32> to vector<256x8xf32>
    %80 = arith.addf %77, %79 : vector<256x8xf32>
    %cst_91 = arith.constant 0.000000e+00 : f32
    %81 = vector.broadcast %cst_91 : f32 to vector<256x8xf32>
    %82 = arith.maximumf %80, %81 : vector<256x8xf32>
    %83 = arith.truncf %82 : vector<256x8xf32> to vector<256x8xbf16>
    %c0_92 = arith.constant 0 : index
    %c0_93 = arith.constant 0 : index
    %84 = vector.load %arg12[%c0_92, %c0_93] : memref<8x16xbf16, #tpu.memory_space<vmem>>, vector<8x16xbf16>
    %cst_94 = arith.constant dense<0.000000e+00> : vector<256x16xf32>
    %85 = tpu.matmul %83, %84, %cst_94 {dimension_numbers = #tpu.dot_dimension_numbers<[1], [0], [0], [1], [0, 0, 1, 1], [], []>} : vector<256x8xbf16>, vector<8x16xbf16>, vector<256x16xf32> -> vector<256x16xf32>
    %86 = arith.addf %10, %85 : vector<256x16xf32>
    %87 = vector.shape_cast %82 : vector<256x8xf32> to vector<16x16x8xf32>
    %c1_95 = arith.constant 1 : index
    %c1_96 = arith.constant 1 : index
    %c0_97 = arith.constant 0 : index
    %88 = vector.load %arg19[%c1_95, %c1_96, %c0_97] : memref<18x18x8xf32, #tpu.memory_space<vmem>>, vector<16x16x8xf32>
    tpu.vector_store %arg19[%c1_95, %c1_96, %c0_97], %87 {strides = array<i32>} : memref<18x18x8xf32, #tpu.memory_space<vmem>>, vector<16x16x8xf32>,
    %cst_98 = arith.constant 0.000000e+00 : f32
    %89 = vector.broadcast %cst_98 : f32 to vector<256x8xf32>
    %c0_99 = arith.constant 0 : index
    %c0_100 = arith.constant 0 : index
    %c0_101 = arith.constant 0 : index
    %90 = vector.load %arg19[%c0_99, %c0_100, %c0_101] : memref<18x18x8xf32, #tpu.memory_space<vmem>>, vector<16x16x8xf32>
    %91 = vector.shape_cast %90 : vector<16x16x8xf32> to vector<256x8xf32>
    %92 = arith.truncf %91 : vector<256x8xf32> to vector<256x8xbf16>
    %c0_102 = arith.constant 0 : index
    %c0_103 = arith.constant 0 : index
    %c0_104 = arith.constant 0 : index
    %c0_105 = arith.constant 0 : index
    %93 = vector.load %arg5[%c0_102, %c0_103, %c0_104, %c0_105] : memref<3x3x8x8xbf16, #tpu.memory_space<vmem>>, vector<1x1x8x8xbf16>
    %94 = vector.shape_cast %93 : vector<1x1x8x8xbf16> to vector<8x8xbf16>
    %cst_106 = arith.constant dense<0.000000e+00> : vector<256x8xf32>
    %95 = tpu.matmul %92, %94, %cst_106 {dimension_numbers = #tpu.dot_dimension_numbers<[1], [0], [0], [1], [0, 0, 1, 1], [], []>} : vector<256x8xbf16>, vector<8x8xbf16>, vector<256x8xf32> -> vector<256x8xf32>
    %96 = arith.addf %89, %95 : vector<256x8xf32>
    %c0_107 = arith.constant 0 : index
    %c1_108 = arith.constant 1 : index
    %c0_109 = arith.constant 0 : index
    %97 = vector.load %arg19[%c0_107, %c1_108, %c0_109] : memref<18x18x8xf32, #tpu.memory_space<vmem>>, vector<16x16x8xf32>
    %98 = vector.shape_cast %97 : vector<16x16x8xf32> to vector<256x8xf32>
    %99 = arith.truncf %98 : vector<256x8xf32> to vector<256x8xbf16>
    %c0_110 = arith.constant 0 : index
    %c1_111 = arith.constant 1 : index
    %c0_112 = arith.constant 0 : index
    %c0_113 = arith.constant 0 : index
    %100 = vector.load %arg5[%c0_110, %c1_111, %c0_112, %c0_113] : memref<3x3x8x8xbf16, #tpu.memory_space<vmem>>, vector<1x1x8x8xbf16>
    %101 = vector.shape_cast %100 : vector<1x1x8x8xbf16> to vector<8x8xbf16>
    %cst_114 = arith.constant dense<0.000000e+00> : vector<256x8xf32>
    %102 = tpu.matmul %99, %101, %cst_114 {dimension_numbers = #tpu.dot_dimension_numbers<[1], [0], [0], [1], [0, 0, 1, 1], [], []>} : vector<256x8xbf16>, vector<8x8xbf16>, vector<256x8xf32> -> vector<256x8xf32>
    %103 = arith.addf %96, %102 : vector<256x8xf32>
    %c0_115 = arith.constant 0 : index
    %c2_116 = arith.constant 2 : index
    %c0_117 = arith.constant 0 : index
    %104 = vector.load %arg19[%c0_115, %c2_116, %c0_117] : memref<18x18x8xf32, #tpu.memory_space<vmem>>, vector<16x16x8xf32>
    %105 = vector.shape_cast %104 : vector<16x16x8xf32> to vector<256x8xf32>
    %106 = arith.truncf %105 : vector<256x8xf32> to vector<256x8xbf16>
    %c0_118 = arith.constant 0 : index
    %c2_119 = arith.constant 2 : index
    %c0_120 = arith.constant 0 : index
    %c0_121 = arith.constant 0 : index
    %107 = vector.load %arg5[%c0_118, %c2_119, %c0_120, %c0_121] : memref<3x3x8x8xbf16, #tpu.memory_space<vmem>>, vector<1x1x8x8xbf16>
    %108 = vector.shape_cast %107 : vector<1x1x8x8xbf16> to vector<8x8xbf16>
    %cst_122 = arith.constant dense<0.000000e+00> : vector<256x8xf32>
    %109 = tpu.matmul %106, %108, %cst_122 {dimension_numbers = #tpu.dot_dimension_numbers<[1], [0], [0], [1], [0, 0, 1, 1], [], []>} : vector<256x8xbf16>, vector<8x8xbf16>, vector<256x8xf32> -> vector<256x8xf32>
    %110 = arith.addf %103, %109 : vector<256x8xf32>
    %c1_123 = arith.constant 1 : index
    %c0_124 = arith.constant 0 : index
    %c0_125 = arith.constant 0 : index
    %111 = vector.load %arg19[%c1_123, %c0_124, %c0_125] : memref<18x18x8xf32, #tpu.memory_space<vmem>>, vector<16x16x8xf32>
    %112 = vector.shape_cast %111 : vector<16x16x8xf32> to vector<256x8xf32>
    %113 = arith.truncf %112 : vector<256x8xf32> to vector<256x8xbf16>
    %c1_126 = arith.constant 1 : index
    %c0_127 = arith.constant 0 : index
    %c0_128 = arith.constant 0 : index
    %c0_129 = arith.constant 0 : index
    %114 = vector.load %arg5[%c1_126, %c0_127, %c0_128, %c0_129] : memref<3x3x8x8xbf16, #tpu.memory_space<vmem>>, vector<1x1x8x8xbf16>
    %115 = vector.shape_cast %114 : vector<1x1x8x8xbf16> to vector<8x8xbf16>
    %cst_130 = arith.constant dense<0.000000e+00> : vector<256x8xf32>
    %116 = tpu.matmul %113, %115, %cst_130 {dimension_numbers = #tpu.dot_dimension_numbers<[1], [0], [0], [1], [0, 0, 1, 1], [], []>} : vector<256x8xbf16>, vector<8x8xbf16>, vector<256x8xf32> -> vector<256x8xf32>
    %117 = arith.addf %110, %116 : vector<256x8xf32>
    %c1_131 = arith.constant 1 : index
    %c1_132 = arith.constant 1 : index
    %c0_133 = arith.constant 0 : index
    %118 = vector.load %arg19[%c1_131, %c1_132, %c0_133] : memref<18x18x8xf32, #tpu.memory_space<vmem>>, vector<16x16x8xf32>
    %119 = vector.shape_cast %118 : vector<16x16x8xf32> to vector<256x8xf32>
    %120 = arith.truncf %119 : vector<256x8xf32> to vector<256x8xbf16>
    %c1_134 = arith.constant 1 : index
    %c1_135 = arith.constant 1 : index
    %c0_136 = arith.constant 0 : index
    %c0_137 = arith.constant 0 : index
    %121 = vector.load %arg5[%c1_134, %c1_135, %c0_136, %c0_137] : memref<3x3x8x8xbf16, #tpu.memory_space<vmem>>, vector<1x1x8x8xbf16>
    %122 = vector.shape_cast %121 : vector<1x1x8x8xbf16> to vector<8x8xbf16>
    %cst_138 = arith.constant dense<0.000000e+00> : vector<256x8xf32>
    %123 = tpu.matmul %120, %122, %cst_138 {dimension_numbers = #tpu.dot_dimension_numbers<[1], [0], [0], [1], [0, 0, 1, 1], [], []>} : vector<256x8xbf16>, vector<8x8xbf16>, vector<256x8xf32> -> vector<256x8xf32>
    %124 = arith.addf %117, %123 : vector<256x8xf32>
    %c1_139 = arith.constant 1 : index
    %c2_140 = arith.constant 2 : index
    %c0_141 = arith.constant 0 : index
    %125 = vector.load %arg19[%c1_139, %c2_140, %c0_141] : memref<18x18x8xf32, #tpu.memory_space<vmem>>, vector<16x16x8xf32>
    %126 = vector.shape_cast %125 : vector<16x16x8xf32> to vector<256x8xf32>
    %127 = arith.truncf %126 : vector<256x8xf32> to vector<256x8xbf16>
    %c1_142 = arith.constant 1 : index
    %c2_143 = arith.constant 2 : index
    %c0_144 = arith.constant 0 : index
    %c0_145 = arith.constant 0 : index
    %128 = vector.load %arg5[%c1_142, %c2_143, %c0_144, %c0_145] : memref<3x3x8x8xbf16, #tpu.memory_space<vmem>>, vector<1x1x8x8xbf16>
    %129 = vector.shape_cast %128 : vector<1x1x8x8xbf16> to vector<8x8xbf16>
    %cst_146 = arith.constant dense<0.000000e+00> : vector<256x8xf32>
    %130 = tpu.matmul %127, %129, %cst_146 {dimension_numbers = #tpu.dot_dimension_numbers<[1], [0], [0], [1], [0, 0, 1, 1], [], []>} : vector<256x8xbf16>, vector<8x8xbf16>, vector<256x8xf32> -> vector<256x8xf32>
    %131 = arith.addf %124, %130 : vector<256x8xf32>
    %c2_147 = arith.constant 2 : index
    %c0_148 = arith.constant 0 : index
    %c0_149 = arith.constant 0 : index
    %132 = vector.load %arg19[%c2_147, %c0_148, %c0_149] : memref<18x18x8xf32, #tpu.memory_space<vmem>>, vector<16x16x8xf32>
    %133 = vector.shape_cast %132 : vector<16x16x8xf32> to vector<256x8xf32>
    %134 = arith.truncf %133 : vector<256x8xf32> to vector<256x8xbf16>
    %c2_150 = arith.constant 2 : index
    %c0_151 = arith.constant 0 : index
    %c0_152 = arith.constant 0 : index
    %c0_153 = arith.constant 0 : index
    %135 = vector.load %arg5[%c2_150, %c0_151, %c0_152, %c0_153] : memref<3x3x8x8xbf16, #tpu.memory_space<vmem>>, vector<1x1x8x8xbf16>
    %136 = vector.shape_cast %135 : vector<1x1x8x8xbf16> to vector<8x8xbf16>
    %cst_154 = arith.constant dense<0.000000e+00> : vector<256x8xf32>
    %137 = tpu.matmul %134, %136, %cst_154 {dimension_numbers = #tpu.dot_dimension_numbers<[1], [0], [0], [1], [0, 0, 1, 1], [], []>} : vector<256x8xbf16>, vector<8x8xbf16>, vector<256x8xf32> -> vector<256x8xf32>
    %138 = arith.addf %131, %137 : vector<256x8xf32>
    %c2_155 = arith.constant 2 : index
    %c1_156 = arith.constant 1 : index
    %c0_157 = arith.constant 0 : index
    %139 = vector.load %arg19[%c2_155, %c1_156, %c0_157] : memref<18x18x8xf32, #tpu.memory_space<vmem>>, vector<16x16x8xf32>
    %140 = vector.shape_cast %139 : vector<16x16x8xf32> to vector<256x8xf32>
    %141 = arith.truncf %140 : vector<256x8xf32> to vector<256x8xbf16>
    %c2_158 = arith.constant 2 : index
    %c1_159 = arith.constant 1 : index
    %c0_160 = arith.constant 0 : index
    %c0_161 = arith.constant 0 : index
    %142 = vector.load %arg5[%c2_158, %c1_159, %c0_160, %c0_161] : memref<3x3x8x8xbf16, #tpu.memory_space<vmem>>, vector<1x1x8x8xbf16>
    %143 = vector.shape_cast %142 : vector<1x1x8x8xbf16> to vector<8x8xbf16>
    %cst_162 = arith.constant dense<0.000000e+00> : vector<256x8xf32>
    %144 = tpu.matmul %141, %143, %cst_162 {dimension_numbers = #tpu.dot_dimension_numbers<[1], [0], [0], [1], [0, 0, 1, 1], [], []>} : vector<256x8xbf16>, vector<8x8xbf16>, vector<256x8xf32> -> vector<256x8xf32>
    %145 = arith.addf %138, %144 : vector<256x8xf32>
    %c2_163 = arith.constant 2 : index
    %c2_164 = arith.constant 2 : index
    %c0_165 = arith.constant 0 : index
    %146 = vector.load %arg19[%c2_163, %c2_164, %c0_165] : memref<18x18x8xf32, #tpu.memory_space<vmem>>, vector<16x16x8xf32>
    %147 = vector.shape_cast %146 : vector<16x16x8xf32> to vector<256x8xf32>
    %148 = arith.truncf %147 : vector<256x8xf32> to vector<256x8xbf16>
    %c2_166 = arith.constant 2 : index
    %c2_167 = arith.constant 2 : index
    %c0_168 = arith.constant 0 : index
    %c0_169 = arith.constant 0 : index
    %149 = vector.load %arg5[%c2_166, %c2_167, %c0_168, %c0_169] : memref<3x3x8x8xbf16, #tpu.memory_space<vmem>>, vector<1x1x8x8xbf16>
    %150 = vector.shape_cast %149 : vector<1x1x8x8xbf16> to vector<8x8xbf16>
    %cst_170 = arith.constant dense<0.000000e+00> : vector<256x8xf32>
    %151 = tpu.matmul %148, %150, %cst_170 {dimension_numbers = #tpu.dot_dimension_numbers<[1], [0], [0], [1], [0, 0, 1, 1], [], []>} : vector<256x8xbf16>, vector<8x8xbf16>, vector<256x8xf32> -> vector<256x8xf32>
    %152 = arith.addf %145, %151 : vector<256x8xf32>
    %c0_171 = arith.constant 0 : index
    %c0_172 = arith.constant 0 : index
    %153 = vector.load %arg6[%c0_171, %c0_172] : memref<1x8xf32, #tpu.memory_space<vmem>>, vector<1x8xf32>
    %154 = vector.broadcast %153 : vector<1x8xf32> to vector<256x8xf32>
    %155 = arith.mulf %152, %154 : vector<256x8xf32>
    %c0_173 = arith.constant 0 : index
    %c0_174 = arith.constant 0 : index
    %156 = vector.load %arg7[%c0_173, %c0_174] : memref<1x8xf32, #tpu.memory_space<vmem>>, vector<1x8xf32>
    %157 = vector.broadcast %156 : vector<1x8xf32> to vector<256x8xf32>
    %158 = arith.addf %155, %157 : vector<256x8xf32>
    %cst_175 = arith.constant 0.000000e+00 : f32
    %159 = vector.broadcast %cst_175 : f32 to vector<256x8xf32>
    %160 = arith.maximumf %158, %159 : vector<256x8xf32>
    %161 = arith.truncf %160 : vector<256x8xf32> to vector<256x8xbf16>
    %c0_176 = arith.constant 0 : index
    %c0_177 = arith.constant 0 : index
    %162 = vector.load %arg13[%c0_176, %c0_177] : memref<8x16xbf16, #tpu.memory_space<vmem>>, vector<8x16xbf16>
    %cst_178 = arith.constant dense<0.000000e+00> : vector<256x16xf32>
    %163 = tpu.matmul %161, %162, %cst_178 {dimension_numbers = #tpu.dot_dimension_numbers<[1], [0], [0], [1], [0, 0, 1, 1], [], []>} : vector<256x8xbf16>, vector<8x16xbf16>, vector<256x16xf32> -> vector<256x16xf32>
    %164 = arith.addf %86, %163 : vector<256x16xf32>
    %165 = vector.shape_cast %160 : vector<256x8xf32> to vector<16x16x8xf32>
    %c1_179 = arith.constant 1 : index
    %c1_180 = arith.constant 1 : index
    %c0_181 = arith.constant 0 : index
    %166 = vector.load %arg19[%c1_179, %c1_180, %c0_181] : memref<18x18x8xf32, #tpu.memory_space<vmem>>, vector<16x16x8xf32>
    tpu.vector_store %arg19[%c1_179, %c1_180, %c0_181], %165 {strides = array<i32>} : memref<18x18x8xf32, #tpu.memory_space<vmem>>, vector<16x16x8xf32>,
    %cst_182 = arith.constant 0.000000e+00 : f32
    %167 = vector.broadcast %cst_182 : f32 to vector<256x8xf32>
    %c0_183 = arith.constant 0 : index
    %c0_184 = arith.constant 0 : index
    %c0_185 = arith.constant 0 : index
    %168 = vector.load %arg19[%c0_183, %c0_184, %c0_185] : memref<18x18x8xf32, #tpu.memory_space<vmem>>, vector<16x16x8xf32>
    %169 = vector.shape_cast %168 : vector<16x16x8xf32> to vector<256x8xf32>
    %170 = arith.truncf %169 : vector<256x8xf32> to vector<256x8xbf16>
    %c0_186 = arith.constant 0 : index
    %c0_187 = arith.constant 0 : index
    %c0_188 = arith.constant 0 : index
    %c0_189 = arith.constant 0 : index
    %171 = vector.load %arg8[%c0_186, %c0_187, %c0_188, %c0_189] : memref<3x3x8x8xbf16, #tpu.memory_space<vmem>>, vector<1x1x8x8xbf16>
    %172 = vector.shape_cast %171 : vector<1x1x8x8xbf16> to vector<8x8xbf16>
    %cst_190 = arith.constant dense<0.000000e+00> : vector<256x8xf32>
    %173 = tpu.matmul %170, %172, %cst_190 {dimension_numbers = #tpu.dot_dimension_numbers<[1], [0], [0], [1], [0, 0, 1, 1], [], []>} : vector<256x8xbf16>, vector<8x8xbf16>, vector<256x8xf32> -> vector<256x8xf32>
    %174 = arith.addf %167, %173 : vector<256x8xf32>
    %c0_191 = arith.constant 0 : index
    %c1_192 = arith.constant 1 : index
    %c0_193 = arith.constant 0 : index
    %175 = vector.load %arg19[%c0_191, %c1_192, %c0_193] : memref<18x18x8xf32, #tpu.memory_space<vmem>>, vector<16x16x8xf32>
    %176 = vector.shape_cast %175 : vector<16x16x8xf32> to vector<256x8xf32>
    %177 = arith.truncf %176 : vector<256x8xf32> to vector<256x8xbf16>
    %c0_194 = arith.constant 0 : index
    %c1_195 = arith.constant 1 : index
    %c0_196 = arith.constant 0 : index
    %c0_197 = arith.constant 0 : index
    %178 = vector.load %arg8[%c0_194, %c1_195, %c0_196, %c0_197] : memref<3x3x8x8xbf16, #tpu.memory_space<vmem>>, vector<1x1x8x8xbf16>
    %179 = vector.shape_cast %178 : vector<1x1x8x8xbf16> to vector<8x8xbf16>
    %cst_198 = arith.constant dense<0.000000e+00> : vector<256x8xf32>
    %180 = tpu.matmul %177, %179, %cst_198 {dimension_numbers = #tpu.dot_dimension_numbers<[1], [0], [0], [1], [0, 0, 1, 1], [], []>} : vector<256x8xbf16>, vector<8x8xbf16>, vector<256x8xf32> -> vector<256x8xf32>
    %181 = arith.addf %174, %180 : vector<256x8xf32>
    %c0_199 = arith.constant 0 : index
    %c2_200 = arith.constant 2 : index
    %c0_201 = arith.constant 0 : index
    %182 = vector.load %arg19[%c0_199, %c2_200, %c0_201] : memref<18x18x8xf32, #tpu.memory_space<vmem>>, vector<16x16x8xf32>
    %183 = vector.shape_cast %182 : vector<16x16x8xf32> to vector<256x8xf32>
    %184 = arith.truncf %183 : vector<256x8xf32> to vector<256x8xbf16>
    %c0_202 = arith.constant 0 : index
    %c2_203 = arith.constant 2 : index
    %c0_204 = arith.constant 0 : index
    %c0_205 = arith.constant 0 : index
    %185 = vector.load %arg8[%c0_202, %c2_203, %c0_204, %c0_205] : memref<3x3x8x8xbf16, #tpu.memory_space<vmem>>, vector<1x1x8x8xbf16>
    %186 = vector.shape_cast %185 : vector<1x1x8x8xbf16> to vector<8x8xbf16>
    %cst_206 = arith.constant dense<0.000000e+00> : vector<256x8xf32>
    %187 = tpu.matmul %184, %186, %cst_206 {dimension_numbers = #tpu.dot_dimension_numbers<[1], [0], [0], [1], [0, 0, 1, 1], [], []>} : vector<256x8xbf16>, vector<8x8xbf16>, vector<256x8xf32> -> vector<256x8xf32>
    %188 = arith.addf %181, %187 : vector<256x8xf32>
    %c1_207 = arith.constant 1 : index
    %c0_208 = arith.constant 0 : index
    %c0_209 = arith.constant 0 : index
    %189 = vector.load %arg19[%c1_207, %c0_208, %c0_209] : memref<18x18x8xf32, #tpu.memory_space<vmem>>, vector<16x16x8xf32>
    %190 = vector.shape_cast %189 : vector<16x16x8xf32> to vector<256x8xf32>
    %191 = arith.truncf %190 : vector<256x8xf32> to vector<256x8xbf16>
    %c1_210 = arith.constant 1 : index
    %c0_211 = arith.constant 0 : index
    %c0_212 = arith.constant 0 : index
    %c0_213 = arith.constant 0 : index
    %192 = vector.load %arg8[%c1_210, %c0_211, %c0_212, %c0_213] : memref<3x3x8x8xbf16, #tpu.memory_space<vmem>>, vector<1x1x8x8xbf16>
    %193 = vector.shape_cast %192 : vector<1x1x8x8xbf16> to vector<8x8xbf16>
    %cst_214 = arith.constant dense<0.000000e+00> : vector<256x8xf32>
    %194 = tpu.matmul %191, %193, %cst_214 {dimension_numbers = #tpu.dot_dimension_numbers<[1], [0], [0], [1], [0, 0, 1, 1], [], []>} : vector<256x8xbf16>, vector<8x8xbf16>, vector<256x8xf32> -> vector<256x8xf32>
    %195 = arith.addf %188, %194 : vector<256x8xf32>
    %c1_215 = arith.constant 1 : index
    %c1_216 = arith.constant 1 : index
    %c0_217 = arith.constant 0 : index
    %196 = vector.load %arg19[%c1_215, %c1_216, %c0_217] : memref<18x18x8xf32, #tpu.memory_space<vmem>>, vector<16x16x8xf32>
    %197 = vector.shape_cast %196 : vector<16x16x8xf32> to vector<256x8xf32>
    %198 = arith.truncf %197 : vector<256x8xf32> to vector<256x8xbf16>
    %c1_218 = arith.constant 1 : index
    %c1_219 = arith.constant 1 : index
    %c0_220 = arith.constant 0 : index
    %c0_221 = arith.constant 0 : index
    %199 = vector.load %arg8[%c1_218, %c1_219, %c0_220, %c0_221] : memref<3x3x8x8xbf16, #tpu.memory_space<vmem>>, vector<1x1x8x8xbf16>
    %200 = vector.shape_cast %199 : vector<1x1x8x8xbf16> to vector<8x8xbf16>
    %cst_222 = arith.constant dense<0.000000e+00> : vector<256x8xf32>
    %201 = tpu.matmul %198, %200, %cst_222 {dimension_numbers = #tpu.dot_dimension_numbers<[1], [0], [0], [1], [0, 0, 1, 1], [], []>} : vector<256x8xbf16>, vector<8x8xbf16>, vector<256x8xf32> -> vector<256x8xf32>
    %202 = arith.addf %195, %201 : vector<256x8xf32>
    %c1_223 = arith.constant 1 : index
    %c2_224 = arith.constant 2 : index
    %c0_225 = arith.constant 0 : index
    %203 = vector.load %arg19[%c1_223, %c2_224, %c0_225] : memref<18x18x8xf32, #tpu.memory_space<vmem>>, vector<16x16x8xf32>
    %204 = vector.shape_cast %203 : vector<16x16x8xf32> to vector<256x8xf32>
    %205 = arith.truncf %204 : vector<256x8xf32> to vector<256x8xbf16>
    %c1_226 = arith.constant 1 : index
    %c2_227 = arith.constant 2 : index
    %c0_228 = arith.constant 0 : index
    %c0_229 = arith.constant 0 : index
    %206 = vector.load %arg8[%c1_226, %c2_227, %c0_228, %c0_229] : memref<3x3x8x8xbf16, #tpu.memory_space<vmem>>, vector<1x1x8x8xbf16>
    %207 = vector.shape_cast %206 : vector<1x1x8x8xbf16> to vector<8x8xbf16>
    %cst_230 = arith.constant dense<0.000000e+00> : vector<256x8xf32>
    %208 = tpu.matmul %205, %207, %cst_230 {dimension_numbers = #tpu.dot_dimension_numbers<[1], [0], [0], [1], [0, 0, 1, 1], [], []>} : vector<256x8xbf16>, vector<8x8xbf16>, vector<256x8xf32> -> vector<256x8xf32>
    %209 = arith.addf %202, %208 : vector<256x8xf32>
    %c2_231 = arith.constant 2 : index
    %c0_232 = arith.constant 0 : index
    %c0_233 = arith.constant 0 : index
    %210 = vector.load %arg19[%c2_231, %c0_232, %c0_233] : memref<18x18x8xf32, #tpu.memory_space<vmem>>, vector<16x16x8xf32>
    %211 = vector.shape_cast %210 : vector<16x16x8xf32> to vector<256x8xf32>
    %212 = arith.truncf %211 : vector<256x8xf32> to vector<256x8xbf16>
    %c2_234 = arith.constant 2 : index
    %c0_235 = arith.constant 0 : index
    %c0_236 = arith.constant 0 : index
    %c0_237 = arith.constant 0 : index
    %213 = vector.load %arg8[%c2_234, %c0_235, %c0_236, %c0_237] : memref<3x3x8x8xbf16, #tpu.memory_space<vmem>>, vector<1x1x8x8xbf16>
    %214 = vector.shape_cast %213 : vector<1x1x8x8xbf16> to vector<8x8xbf16>
    %cst_238 = arith.constant dense<0.000000e+00> : vector<256x8xf32>
    %215 = tpu.matmul %212, %214, %cst_238 {dimension_numbers = #tpu.dot_dimension_numbers<[1], [0], [0], [1], [0, 0, 1, 1], [], []>} : vector<256x8xbf16>, vector<8x8xbf16>, vector<256x8xf32> -> vector<256x8xf32>
    %216 = arith.addf %209, %215 : vector<256x8xf32>
    %c2_239 = arith.constant 2 : index
    %c1_240 = arith.constant 1 : index
    %c0_241 = arith.constant 0 : index
    %217 = vector.load %arg19[%c2_239, %c1_240, %c0_241] : memref<18x18x8xf32, #tpu.memory_space<vmem>>, vector<16x16x8xf32>
    %218 = vector.shape_cast %217 : vector<16x16x8xf32> to vector<256x8xf32>
    %219 = arith.truncf %218 : vector<256x8xf32> to vector<256x8xbf16>
    %c2_242 = arith.constant 2 : index
    %c1_243 = arith.constant 1 : index
    %c0_244 = arith.constant 0 : index
    %c0_245 = arith.constant 0 : index
    %220 = vector.load %arg8[%c2_242, %c1_243, %c0_244, %c0_245] : memref<3x3x8x8xbf16, #tpu.memory_space<vmem>>, vector<1x1x8x8xbf16>
    %221 = vector.shape_cast %220 : vector<1x1x8x8xbf16> to vector<8x8xbf16>
    %cst_246 = arith.constant dense<0.000000e+00> : vector<256x8xf32>
    %222 = tpu.matmul %219, %221, %cst_246 {dimension_numbers = #tpu.dot_dimension_numbers<[1], [0], [0], [1], [0, 0, 1, 1], [], []>} : vector<256x8xbf16>, vector<8x8xbf16>, vector<256x8xf32> -> vector<256x8xf32>
    %223 = arith.addf %216, %222 : vector<256x8xf32>
    %c2_247 = arith.constant 2 : index
    %c2_248 = arith.constant 2 : index
    %c0_249 = arith.constant 0 : index
    %224 = vector.load %arg19[%c2_247, %c2_248, %c0_249] : memref<18x18x8xf32, #tpu.memory_space<vmem>>, vector<16x16x8xf32>
    %225 = vector.shape_cast %224 : vector<16x16x8xf32> to vector<256x8xf32>
    %226 = arith.truncf %225 : vector<256x8xf32> to vector<256x8xbf16>
    %c2_250 = arith.constant 2 : index
    %c2_251 = arith.constant 2 : index
    %c0_252 = arith.constant 0 : index
    %c0_253 = arith.constant 0 : index
    %227 = vector.load %arg8[%c2_250, %c2_251, %c0_252, %c0_253] : memref<3x3x8x8xbf16, #tpu.memory_space<vmem>>, vector<1x1x8x8xbf16>
    %228 = vector.shape_cast %227 : vector<1x1x8x8xbf16> to vector<8x8xbf16>
    %cst_254 = arith.constant dense<0.000000e+00> : vector<256x8xf32>
    %229 = tpu.matmul %226, %228, %cst_254 {dimension_numbers = #tpu.dot_dimension_numbers<[1], [0], [0], [1], [0, 0, 1, 1], [], []>} : vector<256x8xbf16>, vector<8x8xbf16>, vector<256x8xf32> -> vector<256x8xf32>
    %230 = arith.addf %223, %229 : vector<256x8xf32>
    %c0_255 = arith.constant 0 : index
    %c0_256 = arith.constant 0 : index
    %231 = vector.load %arg9[%c0_255, %c0_256] : memref<1x8xf32, #tpu.memory_space<vmem>>, vector<1x8xf32>
    %232 = vector.broadcast %231 : vector<1x8xf32> to vector<256x8xf32>
    %233 = arith.mulf %230, %232 : vector<256x8xf32>
    %c0_257 = arith.constant 0 : index
    %c0_258 = arith.constant 0 : index
    %234 = vector.load %arg10[%c0_257, %c0_258] : memref<1x8xf32, #tpu.memory_space<vmem>>, vector<1x8xf32>
    %235 = vector.broadcast %234 : vector<1x8xf32> to vector<256x8xf32>
    %236 = arith.addf %233, %235 : vector<256x8xf32>
    %cst_259 = arith.constant 0.000000e+00 : f32
    %237 = vector.broadcast %cst_259 : f32 to vector<256x8xf32>
    %238 = arith.maximumf %236, %237 : vector<256x8xf32>
    %239 = arith.truncf %238 : vector<256x8xf32> to vector<256x8xbf16>
    %c0_260 = arith.constant 0 : index
    %c0_261 = arith.constant 0 : index
    %240 = vector.load %arg14[%c0_260, %c0_261] : memref<8x16xbf16, #tpu.memory_space<vmem>>, vector<8x16xbf16>
    %cst_262 = arith.constant dense<0.000000e+00> : vector<256x16xf32>
    %241 = tpu.matmul %239, %240, %cst_262 {dimension_numbers = #tpu.dot_dimension_numbers<[1], [0], [0], [1], [0, 0, 1, 1], [], []>} : vector<256x8xbf16>, vector<8x16xbf16>, vector<256x16xf32> -> vector<256x16xf32>
    %242 = arith.addf %164, %241 : vector<256x16xf32>
    %c0_263 = arith.constant 0 : index
    %c0_264 = arith.constant 0 : index
    %243 = vector.load %arg15[%c0_263, %c0_264] : memref<1x16xf32, #tpu.memory_space<vmem>>, vector<1x16xf32>
    %244 = vector.broadcast %243 : vector<1x16xf32> to vector<256x16xf32>
    %245 = arith.mulf %242, %244 : vector<256x16xf32>
    %c0_265 = arith.constant 0 : index
    %c0_266 = arith.constant 0 : index
    %246 = vector.load %arg16[%c0_265, %c0_266] : memref<1x16xf32, #tpu.memory_space<vmem>>, vector<1x16xf32>
    %247 = vector.broadcast %246 : vector<1x16xf32> to vector<256x16xf32>
    %248 = arith.addf %245, %247 : vector<256x16xf32>
    %cst_267 = arith.constant 0.000000e+00 : f32
    %249 = vector.broadcast %cst_267 : f32 to vector<256x16xf32>
    %250 = arith.maximumf %248, %249 : vector<256x16xf32>
    %251 = vector.shape_cast %5 : vector<16x16x16xf32> to vector<256x16xf32>
    %252 = arith.addf %250, %251 : vector<256x16xf32>
    %253 = vector.shape_cast %252 : vector<256x16xf32> to vector<16x16x16xf32>
    %c0_268 = arith.constant 0 : index
    %c0_269 = arith.constant 0 : index
    %c0_270 = arith.constant 0 : index
    %c0_271 = arith.constant 0 : index
    %254 = vector.load %arg17[%c0_268, %c0_269, %c0_270, %c0_271] : memref<1x16x16x16xf32, #tpu.memory_space<vmem>>, vector<1x16x16x16xf32>
    %255 = vector.shape_cast %254 : vector<1x16x16x16xf32> to vector<16x16x16xf32>
    %256 = vector.shape_cast %253 : vector<16x16x16xf32> to vector<1x16x16x16xf32>
    tpu.vector_store %arg17[%c0_268, %c0_269, %c0_270, %c0_271], %256 {strides = array<i32>} : memref<1x16x16x16xf32, #tpu.memory_space<vmem>>, vector<1x16x16x16xf32>,
    return
  }
  func.func @transform_0(%arg0: i32) -> (i32, i32, i32, i32) {
    %c0_i32 = arith.constant 0 : i32
    %c0_i32_0 = arith.constant 0 : i32
    %c0_i32_1 = arith.constant 0 : i32
    %c0_i32_2 = arith.constant 0 : i32
    return %arg0, %c0_i32, %c0_i32_0, %c0_i32_1 : i32, i32, i32, i32
  }
  func.func @transform_1(%arg0: i32) -> (i32, i32, i32, i32) {
    %c0_i32 = arith.constant 0 : i32
    %c0_i32_0 = arith.constant 0 : i32
    %c0_i32_1 = arith.constant 0 : i32
    %c0_i32_2 = arith.constant 0 : i32
    %c0_i32_3 = arith.constant 0 : i32
    return %c0_i32, %c0_i32_0, %c0_i32_1, %c0_i32_2 : i32, i32, i32, i32
  }
  func.func @transform_2(%arg0: i32) -> (i32, i32) {
    %c0_i32 = arith.constant 0 : i32
    %c0_i32_0 = arith.constant 0 : i32
    %c0_i32_1 = arith.constant 0 : i32
    return %c0_i32, %c0_i32_0 : i32, i32
  }
  func.func @transform_3(%arg0: i32) -> (i32, i32) {
    %c0_i32 = arith.constant 0 : i32
    %c0_i32_0 = arith.constant 0 : i32
    %c0_i32_1 = arith.constant 0 : i32
    return %c0_i32, %c0_i32_0 : i32, i32
  }
  func.func @transform_4(%arg0: i32) -> (i32, i32, i32, i32) {
    %c0_i32 = arith.constant 0 : i32
    %c0_i32_0 = arith.constant 0 : i32
    %c0_i32_1 = arith.constant 0 : i32
    %c0_i32_2 = arith.constant 0 : i32
    %c0_i32_3 = arith.constant 0 : i32
    return %c0_i32, %c0_i32_0, %c0_i32_1, %c0_i32_2 : i32, i32, i32, i32
  }
  func.func @transform_5(%arg0: i32) -> (i32, i32) {
    %c0_i32 = arith.constant 0 : i32
    %c0_i32_0 = arith.constant 0 : i32
    %c0_i32_1 = arith.constant 0 : i32
    return %c0_i32, %c0_i32_0 : i32, i32
  }
  func.func @transform_6(%arg0: i32) -> (i32, i32) {
    %c0_i32 = arith.constant 0 : i32
    %c0_i32_0 = arith.constant 0 : i32
    %c0_i32_1 = arith.constant 0 : i32
    return %c0_i32, %c0_i32_0 : i32, i32
  }
  func.func @transform_7(%arg0: i32) -> (i32, i32, i32, i32) {
    %c0_i32 = arith.constant 0 : i32
    %c0_i32_0 = arith.constant 0 : i32
    %c0_i32_1 = arith.constant 0 : i32
    %c0_i32_2 = arith.constant 0 : i32
    %c0_i32_3 = arith.constant 0 : i32
    return %c0_i32, %c0_i32_0, %c0_i32_1, %c0_i32_2 : i32, i32, i32, i32
  }
  func.func @transform_8(%arg0: i32) -> (i32, i32) {
    %c0_i32 = arith.constant 0 : i32
    %c0_i32_0 = arith.constant 0 : i32
    %c0_i32_1 = arith.constant 0 : i32
    return %c0_i32, %c0_i32_0 : i32, i32
  }
  func.func @transform_9(%arg0: i32) -> (i32, i32) {
    %c0_i32 = arith.constant 0 : i32
    %c0_i32_0 = arith.constant 0 : i32
    %c0_i32_1 = arith.constant 0 : i32
    return %c0_i32, %c0_i32_0 : i32, i32
  }
  func.func @transform_10(%arg0: i32) -> (i32, i32) {
    %c0_i32 = arith.constant 0 : i32
    %c0_i32_0 = arith.constant 0 : i32
    %c0_i32_1 = arith.constant 0 : i32
    return %c0_i32, %c0_i32_0 : i32, i32
  }
  func.func @transform_11(%arg0: i32) -> (i32, i32) {
    %c0_i32 = arith.constant 0 : i32
    %c0_i32_0 = arith.constant 0 : i32
    %c0_i32_1 = arith.constant 0 : i32
    return %c0_i32, %c0_i32_0 : i32, i32
  }
  func.func @transform_12(%arg0: i32) -> (i32, i32) {
    %c0_i32 = arith.constant 0 : i32
    %c0_i32_0 = arith.constant 0 : i32
    %c0_i32_1 = arith.constant 0 : i32
    return %c0_i32, %c0_i32_0 : i32, i32
  }
  func.func @transform_13(%arg0: i32) -> (i32, i32) {
    %c0_i32 = arith.constant 0 : i32
    %c0_i32_0 = arith.constant 0 : i32
    %c0_i32_1 = arith.constant 0 : i32
    return %c0_i32, %c0_i32_0 : i32, i32
  }
  func.func @transform_14(%arg0: i32) -> (i32, i32) {
    %c0_i32 = arith.constant 0 : i32
    %c0_i32_0 = arith.constant 0 : i32
    %c0_i32_1 = arith.constant 0 : i32
    return %c0_i32, %c0_i32_0 : i32, i32
  }
  func.func @transform_15(%arg0: i32) -> (i32, i32) {
    %c0_i32 = arith.constant 0 : i32
    %c0_i32_0 = arith.constant 0 : i32
    %c0_i32_1 = arith.constant 0 : i32
    return %c0_i32, %c0_i32_0 : i32, i32
  }
  func.func @transform_16(%arg0: i32) -> (i32, i32, i32, i32) {
    %c0_i32 = arith.constant 0 : i32
    %c0_i32_0 = arith.constant 0 : i32
    %c0_i32_1 = arith.constant 0 : i32
    %c0_i32_2 = arith.constant 0 : i32
    return %arg0, %c0_i32, %c0_i32_0, %c0_i32_1 : i32, i32, i32, i32
  }
}

</mosaic_0001>

<bundles_post_ra>
// kernel: osa_module_forward.1
= control target key start
LH: loop header
LB: loop body
LE: loop exit
PB: predicated region body
PF: predicated region fallthrough
CT: control target
= control target key end

     0   :  { %s13230_s21 = smov 0   ;;  %s15584_s0 = inlined_call_operand.vmem [shape: f32[2,16,16,16], index: 0, kind: input, shape index: {}]   ;;  %s15585_s1 = inlined_call_operand.vmem [shape: bf16[3,3,16,8], index: 1, kind: input, shape index: {}]   ;;  %s15586_s2 = inlined_call_operand.vmem [shape: f32[1,8], index: 2, kind: input, shape index: {}]   ;;  %s15587_s3 = inlined_call_operand.vmem [shape: f32[1,8], index: 3, kind: input, shape index: {}]   ;;  %s15588_s4 = inlined_call_operand.vmem [shape: bf16[3,3,8,8], index: 4, kind: input, shape index: {}]   ;;  %s15589_s5 = inlined_call_operand.vmem [shape: f32[1,8], index: 5, kind: input, shape index: {}]   ;;  %s15590_s6 = inlined_call_operand.vmem [shape: f32[1,8], index: 6, kind: input, shape index: {}]   ;;  %s15591_s7 = inlined_call_operand.vmem [shape: bf16[3,3,8,8], index: 7, kind: input, shape index: {}]   ;;  %s15592_s8 = inlined_call_operand.vmem [shape: f32[1,8], index: 8, kind: input, shape index: {}]   ;;  %s15593_s9 = inlined_call_operand.vmem [shape: f32[1,8], index: 9, kind: input, shape index: {}]   ;;  %s15594_s10 = inlined_call_operand.vmem [shape: bf16[16,16], index: 10, kind: input, shape index: {}]   ;;  %s15595_s11 = inlined_call_operand.vmem [shape: bf16[8,16], index: 11, kind: input, shape index: {}]   ;;  %s15596_s12 = inlined_call_operand.vmem [shape: bf16[8,16], index: 12, kind: input, shape index: {}]   ;;  %s15597_s13 = inlined_call_operand.vmem [shape: bf16[8,16], index: 13, kind: input, shape index: {}]   ;;  %s15598_s14 = inlined_call_operand.vmem [shape: f32[1,16], index: 14, kind: input, shape index: {}]   ;;  %s15599_s15 = inlined_call_operand.vmem [shape: f32[1,16], index: 15, kind: input, shape index: {}]   ;;  %s15600_s16 = inlined_call_operand.vmem [shape: f32[2,16,16,16], index: 16, kind: output, shape index: {}]  }
   0x1   :  { %15640 = sst [smem:[#allocation25_spill]] %s15584_s0 }
   0x2 LB: > { %s10090_s22 = sadd.s32 4294967295, %s13142_s21   ;;  %p10094_p0 = scmp.ge.s32.totalorder %s13142_s21, 1  ;;  %s13142_s21 = sphi %s13230_s21, %s26_s21  }
   0x3   : > { %p462_p1 = scmp.lt.s32.totalorder %s13142_s21, 3 }
   0x5   : > { %p463_p2 = pnand %p10094_p0, %p462_p1 }
   0x7   : > { %466 = sbr.rel (%p463_p2) target bundleno = 2517 (0x9d5), region = 84 }
   0xe   : > { %v13241_v0 = vld [vmem:[%s15585_s1 + $0x10] sm:$0xff]   ;;  %vm523_vm0 = vcmask 130048   ;;  %vm526_vm1 = vcmask 123904   ;;  %v15601_v1 = vmov 0.0   ;;  %v13355_v2 = vld [vmem:[%s15585_s1 + $0x18] sm:$0xff]   ;;  %p512_p3 = scmp.lt.s32.totalorder %s10090_s22, 1 }
   0xf   : > { %11244 = vmatprep.subr.bf16.mxu0 %v13241_v0  ;;  %524 = vst.msk [vmem:[#allocation2] sm:$0xff] %vm523_vm0, %v15601_v1  ;;  %525 = vst.msk [vmem:[#allocation2 + $0x8] sm:$0xff] %vm523_vm0, %v15601_v1  ;;  %s15641_s30 = sld [smem:[#allocation25_spill]]  ;;  %v13489_v33 = vld [vmem:[%s15585_s1 + $0x20] sm:$0xff]   ;;  %vm3511_vm2 = vcmask 1043456   ;;  %vm579_vm3 = vcmask 64512  }
  0x10   : > { %527 = vst.msk [vmem:[#allocation2 + $0x10] sm:$0x3] %vm526_vm1, %v15601_v1  ;;  %530 = vst.msk [vmem:[#allocation2 + $0x28] sm:$0x3] %vm526_vm1, %v15601_v1  ;;  %11245 = vmatpush3.bf16.msra.mxu0 %v13241_v0  ;;  %s15702_s22 = smov (!%p512_p3, %s10090_s22), 1  ;;  %vm582_vm4 = vcmask 58368  }
  0x11   : > { %528 = vst.msk [vmem:[#allocation2 + $0x18] sm:$0xff] %vm523_vm0, %v15601_v1  ;;  %529 = vst.msk [vmem:[#allocation2 + $0x20] sm:$0xff] %vm523_vm0, %v15601_v1  ;;  %11278 = vmatprep.subr.bf16.mxu0 %v13355_v2  ;;  %s10647_s27 = sshll.u32 %s15702_s22, 8 }
  0x12   : > { %531 = vst.msk [vmem:[#allocation2 + $0x30] sm:$0xff] %vm523_vm0, %v15601_v1  ;;  %532 = vst.msk [vmem:[#allocation2 + $0x38] sm:$0xff] %vm523_vm0, %v15601_v1  ;;  %s15426_s23 = scalar_lea.vmem %s15600_s16, %s10647_s27 }
  0x13   : > { %533 = vst.msk [vmem:[#allocation2 + $0x40] sm:$0x3] %vm526_vm1, %v15601_v1  ;;  %536 = vst.msk [vmem:[#allocation2 + $0x58] sm:$0x3] %vm526_vm1, %v15601_v1 }
  0x14   : > { %534 = vst.msk [vmem:[#allocation2 + $0x48] sm:$0xff] %vm523_vm0, %v15601_v1  ;;  %535 = vst.msk [vmem:[#allocation2 + $0x50] sm:$0xff] %vm523_vm0, %v15601_v1 }
  0x15   : > { %537 = vst.msk [vmem:[#allocation2 + $0x60] sm:$0xff] %vm523_vm0, %v15601_v1  ;;  %538 = vst.msk [vmem:[#allocation2 + $0x68] sm:$0xff] %vm523_vm0, %v15601_v1  ;;  %s13371_s0 = scalar_lea.vmem %s15641_s30, %s10647_s27 }
  0x16   : > { %539 = vst.msk [vmem:[#allocation2 + $0x70] sm:$0x3] %vm526_vm1, %v15601_v1  ;;  %542 = vst.msk [vmem:[#allocation2 + $0x88] sm:$0x3] %vm526_vm1, %v15601_v1  ;;  %v13374_v3 = vld [vmem:[%s13371_s0] sm:$0xff]  ;;  %v13377_v4 = vld [vmem:[%s13371_s0 + $0x8] sm:$0xff] }
  0x17   : > { %540 = vst.msk [vmem:[#allocation2 + $0x78] sm:$0xff] %vm523_vm0, %v15601_v1  ;;  %541 = vst.msk [vmem:[#allocation2 + $0x80] sm:$0xff] %vm523_vm0, %v15601_v1  ;;  %v13380_v5 = vld [vmem:[%s13371_s0 + $0x10] sm:$0xff]  ;;  %v1249_v6 = vld [vmem:[#allocation2 + $0x2] sm:$0xff] }
  0x18   : > { %543 = vst.msk [vmem:[#allocation2 + $0x90] sm:$0xff] %vm523_vm0, %v15601_v1  ;;  %544 = vst.msk [vmem:[#allocation2 + $0x98] sm:$0xff] %vm523_vm0, %v15601_v1  ;;  %v1250_v7 = vld [vmem:[#allocation2 + $0xa] sm:$0xff]  ;;  %v13387_v8 = vld [vmem:[%s13371_s0 + $0x18] sm:$0xff] }
  0x19   : > { %545 = vst.msk [vmem:[#allocation2 + $0xa0] sm:$0x3] %vm526_vm1, %v15601_v1  ;;  %548 = vst.msk [vmem:[#allocation2 + $0xb8] sm:$0x3] %vm526_vm1, %v15601_v1  ;;  %v1281_v9 = vpack.c.bf16 %v1250_v7, %v1249_v6  ;;  %v13394_v10 = vld [vmem:[%s13371_s0 + $0x20] sm:$0xff]  ;;  %v13397_v11 = vld [vmem:[%s13371_s0 + $0x28] sm:$0xff] }
  0x1a   : > { %546 = vst.msk [vmem:[#allocation2 + $0xa8] sm:$0xff] %vm523_vm0, %v15601_v1  ;;  %547 = vst.msk [vmem:[#allocation2 + $0xb0] sm:$0xff] %vm523_vm0, %v15601_v1  ;;  %v13400_v12 = vld [vmem:[%s13371_s0 + $0x30] sm:$0xff]  ;;  %v13407_v13 = vld [vmem:[%s13371_s0 + $0x38] sm:$0xff] }
  0x1b   : > { %549 = vst.msk [vmem:[#allocation2 + $0xc0] sm:$0xff] %vm523_vm0, %v15601_v1  ;;  %550 = vst.msk [vmem:[#allocation2 + $0xc8] sm:$0xff] %vm523_vm0, %v15601_v1  ;;  %v13412_v14 = vld [vmem:[%s13371_s0 + $0x40] sm:$0xff]  ;;  %v13415_v15 = vld [vmem:[%s13371_s0 + $0x48] sm:$0xff]  ;;  %11246 = vmatprep.mubr.msk.bf16.mxu0 %vm523_vm0, %v1281_v9 }
  0x1c   : > { %551 = vst.msk [vmem:[#allocation2 + $0xd0] sm:$0x3] %vm526_vm1, %v15601_v1  ;;  %554 = vst.msk [vmem:[#allocation2 + $0xe8] sm:$0x3] %vm526_vm1, %v15601_v1  ;;  %v13425_v16 = vld [vmem:[%s13371_s0 + $0x50] sm:$0xff]  ;;  %v13428_v17 = vld [vmem:[%s13371_s0 + $0x58] sm:$0xff] }
  0x1d   : > { %552 = vst.msk [vmem:[#allocation2 + $0xd8] sm:$0xff] %vm523_vm0, %v15601_v1  ;;  %553 = vst.msk [vmem:[#allocation2 + $0xe0] sm:$0xff] %vm523_vm0, %v15601_v1  ;;  %v13431_v18 = vld [vmem:[%s13371_s0 + $0x60] sm:$0xff]  ;;  %v13438_v19 = vld [vmem:[%s13371_s0 + $0x68] sm:$0xff] }
  0x1e   : > { %555 = vst.msk [vmem:[#allocation2 + $0xf0] sm:$0xff] %vm523_vm0, %v15601_v1  ;;  %556 = vst.msk [vmem:[#allocation2 + $0xf8] sm:$0xff] %vm523_vm0, %v15601_v1  ;;  %v13443_v20 = vld [vmem:[%s13371_s0 + $0x70] sm:$0xff]  ;;  %v13446_v21 = vld [vmem:[%s13371_s0 + $0x78] sm:$0xff] }
  0x1f   : > { %557 = vst.msk [vmem:[#allocation2 + $0x100] sm:$0x3] %vm526_vm1, %v15601_v1  ;;  %560 = vst.msk [vmem:[#allocation2 + $0x118] sm:$0x3] %vm526_vm1, %v15601_v1  ;;  %v13455_v22 = vld [vmem:[%s13371_s0 + $0x80] sm:$0xff]  ;;  %v13458_v23 = vld [vmem:[%s13371_s0 + $0x88] sm:$0xff] }
  0x20   : > { %558 = vst.msk [vmem:[#allocation2 + $0x108] sm:$0xff] %vm523_vm0, %v15601_v1  ;;  %559 = vst.msk [vmem:[#allocation2 + $0x110] sm:$0xff] %vm523_vm0, %v15601_v1  ;;  %v13461_v24 = vld [vmem:[%s13371_s0 + $0x90] sm:$0xff]  ;;  %v13468_v25 = vld [vmem:[%s13371_s0 + $0x98] sm:$0xff] }
  0x21   : > { %561 = vst.msk [vmem:[#allocation2 + $0x120] sm:$0xff] %vm523_vm0, %v15601_v1  ;;  %562 = vst.msk [vmem:[#allocation2 + $0x128] sm:$0xff] %vm523_vm0, %v15601_v1  ;;  %v13473_v26 = vld [vmem:[%s13371_s0 + $0xa0] sm:$0xff]  ;;  %v13476_v27 = vld [vmem:[%s13371_s0 + $0xa8] sm:$0xff] }
  0x22   : > { %563 = vst.msk [vmem:[#allocation2 + $0x130] sm:$0x3] %vm526_vm1, %v15601_v1  ;;  %566 = vst.msk [vmem:[#allocation2 + $0x148] sm:$0x3] %vm526_vm1, %v15601_v1  ;;  %v13508_v45 = vld [vmem:[%s13371_s0 + $0xb0] sm:$0xff]  ;;  %v13511_v46 = vld [vmem:[%s13371_s0 + $0xb8] sm:$0xff] }
  0x23   : > { %564 = vst.msk [vmem:[#allocation2 + $0x138] sm:$0xff] %vm523_vm0, %v15601_v1  ;;  %565 = vst.msk [vmem:[#allocation2 + $0x140] sm:$0xff] %vm523_vm0, %v15601_v1  ;;  %v13514_v47 = vld [vmem:[%s13371_s0 + $0xc0] sm:$0xff]  ;;  %v13521_v48 = vld [vmem:[%s13371_s0 + $0xc8] sm:$0xff] }
  0x24   : > { %567 = vst.msk [vmem:[#allocation2 + $0x150] sm:$0xff] %vm523_vm0, %v15601_v1  ;;  %568 = vst.msk [vmem:[#allocation2 + $0x158] sm:$0xff] %vm523_vm0, %v15601_v1  ;;  %v13526_v49 = vld [vmem:[%s13371_s0 + $0xd0] sm:$0xff]  ;;  %v13529_v50 = vld [vmem:[%s13371_s0 + $0xd8] sm:$0xff] }
  0x25   : > { %569 = vst.msk [vmem:[#allocation2 + $0x160] sm:$0x3] %vm526_vm1, %v15601_v1  ;;  %572 = vst.msk [vmem:[#allocation2 + $0x178] sm:$0x3] %vm526_vm1, %v15601_v1  ;;  %v13538_v51 = vld [vmem:[%s13371_s0 + $0xe0] sm:$0xff]  ;;  %v13541_v52 = vld [vmem:[%s13371_s0 + $0xe8] sm:$0xff] }
  0x26   : > { %570 = vst.msk [vmem:[#allocation2 + $0x168] sm:$0xff] %vm523_vm0, %v15601_v1  ;;  %571 = vst.msk [vmem:[#allocation2 + $0x170] sm:$0xff] %vm523_vm0, %v15601_v1  ;;  %v13544_v53 = vld [vmem:[%s13371_s0 + $0xf0] sm:$0xff]  ;;  %v13553_v55 = vld [vmem:[%s13371_s0 + $0xf8] sm:$0xff] }
  0x27   : > { %573 = vst.msk [vmem:[#allocation2 + $0x180] sm:$0xff] %vm523_vm0, %v15601_v1  ;;  %574 = vst.msk [vmem:[#allocation2 + $0x188] sm:$0xff] %vm523_vm0, %v15601_v1 }
  0x28   : > { %575 = vst.msk [vmem:[#allocation2 + $0x190] sm:$0x3] %vm526_vm1, %v15601_v1  ;;  %578 = vst.msk [vmem:[#allocation2 + $0x1a8] sm:$0x3] %vm526_vm1, %v15601_v1 }
  0x29   : > { %576 = vst.msk [vmem:[#allocation2 + $0x198] sm:$0xff] %vm523_vm0, %v15601_v1  ;;  %577 = vst.msk [vmem:[#allocation2 + $0x1a0] sm:$0xff] %vm523_vm0, %v15601_v1 }
  0x2a   : > { %668 = vst.msk [vmem:[#allocation2 + $0x19] sm:$0xff] %vm523_vm0, %v13374_v3  ;;  %669 = vst.msk [vmem:[#allocation2 + $0x21] sm:$0xff] %vm523_vm0, %v13377_v4 }
  0x2b   : > { %670 = vst.msk [vmem:[#allocation2 + $0x31] sm:$0xff] %vm523_vm0, %v13380_v5  ;;  %671 = vst.msk [vmem:[#allocation2 + $0x39] sm:$0xff] %vm523_vm0, %v13387_v8 }
  0x2c   : > { %672 = vst.msk [vmem:[#allocation2 + $0x49] sm:$0xff] %vm523_vm0, %v13394_v10  ;;  %673 = vst.msk [vmem:[#allocation2 + $0x51] sm:$0xff] %vm523_vm0, %v13397_v11 }
  0x2d   : > { %674 = vst.msk [vmem:[#allocation2 + $0x61] sm:$0xff] %vm523_vm0, %v13400_v12  ;;  %15642 = vst [vmem:[#allocation4_spill] sm:$0xff] %v13415_v15 }
  0x2e   : > { %675 = vst.msk [vmem:[#allocation2 + $0x69] sm:$0xff] %vm523_vm0, %v13407_v13  ;;  %676 = vst.msk [vmem:[#allocation2 + $0x79] sm:$0xff] %vm523_vm0, %v13412_v14 }
  0x2f   : > { %677 = vst.msk [vmem:[#allocation2 + $0x81] sm:$0xff] %vm523_vm0, %v13415_v15  ;;  %15643 = vst [vmem:[#allocation5_spill] sm:$0xff] %v13431_v18 }
  0x30   : > { %678 = vst.msk [vmem:[#allocation2 + $0x91] sm:$0xff] %vm523_vm0, %v13425_v16  ;;  %679 = vst.msk [vmem:[#allocation2 + $0x99] sm:$0xff] %vm523_vm0, %v13428_v17 }
  0x31   : > { %15644 = vst [vmem:[#allocation6_spill] sm:$0xff] %v13438_v19  ;;  %680 = vst.msk [vmem:[#allocation2 + $0xa9] sm:$0xff] %vm523_vm0, %v13431_v18  ;;  %v1251_v28 = vld [vmem:[#allocation2 + $0x1a] sm:$0xff]  ;;  %v1252_v29 = vld [vmem:[#allocation2 + $0x22] sm:$0xff] }
  0x32   : > { %15645 = vst [vmem:[#allocation7_spill] sm:$0xff] %v13443_v20  ;;  %15646 = vst [vmem:[#allocation8_spill] sm:$0xff] %v13446_v21  ;;  %v13484_v30 = vpack.c.bf16 %v1252_v29, %v1251_v28  ;;  %v1253_v31 = vld [vmem:[#allocation2 + $0x32] sm:$0xff]  ;;  %v1254_v32 = vld [vmem:[#allocation2 + $0x3a] sm:$0xff] }
  0x33   : > { %681 = vst.msk [vmem:[#allocation2 + $0xb1] sm:$0xff] %vm523_vm0, %v13438_v19  ;;  %682 = vst.msk [vmem:[#allocation2 + $0xc1] sm:$0xff] %vm523_vm0, %v13443_v20  ;;  %v13491_v34 = vpack.c.bf16 %v1254_v32, %v1253_v31  ;;  %v1255_v35 = vld [vmem:[#allocation2 + $0x4a] sm:$0xff]  ;;  %v1256_v36 = vld [vmem:[#allocation2 + $0x52] sm:$0xff] }
  0x34   : > { %683 = vst.msk [vmem:[#allocation2 + $0xc9] sm:$0xff] %vm523_vm0, %v13446_v21  ;;  %15647 = vst [vmem:[#allocation9_spill] sm:$0xff] %v13455_v22  ;;  %11247 = vmatmul.mubr.msk.bf16.vlgmr.msra.gmra.mrb[0].mxu0 %vm523_vm0, %v13484_v30  ;;  %v13499_v39 = vpack.c.bf16 %v1256_v36, %v1255_v35  ;;  %v1547_v59 = vld [vmem:[#allocation2 + $0x18] sm:$0xff]  ;;  %v1548_v60 = vld [vmem:[#allocation2 + $0x20] sm:$0xff] }
  0x35   : > { %15648 = vst [vmem:[#allocation10_spill] sm:$0xff] %v13458_v23  ;;  %15649 = vst [vmem:[#allocation11_spill] sm:$0xff] %v13461_v24  ;;  %11279 = vmatpush3.bf16.msra.mxu0 %v13355_v2  ;;  %11250 = vmatprep.mubr.msk.bf16.mxu0 %vm523_vm0, %v13491_v34  ;;  %v1257_v37 = vld [vmem:[#allocation2 + $0x62] sm:$0xff]  ;;  %v1258_v38 = vld [vmem:[#allocation2 + $0x6a] sm:$0xff]  ;;  %v13567_v62 = vpack.c.bf16 %v1548_v60, %v1547_v59 }
  0x36   : > { %684 = vst.msk [vmem:[#allocation2 + $0xd9] sm:$0xff] %vm523_vm0, %v13455_v22  ;;  %685 = vst.msk [vmem:[#allocation2 + $0xe1] sm:$0xff] %vm523_vm0, %v13458_v23  ;;  %11312 = vmatprep.subr.bf16.mxu0 %v13489_v33  ;;  %v13501_v40 = vpack.c.bf16 %v1258_v38, %v1257_v37  ;;  %v1259_v41 = vld [vmem:[#allocation2 + $0x7a] sm:$0xff]  ;;  %v1260_v42 = vld [vmem:[#allocation2 + $0x82] sm:$0xff] }
  0x37   : > { %15650 = vst [vmem:[#allocation12_spill] sm:$0xff] %v13468_v25  ;;  %686 = vst.msk [vmem:[#allocation2 + $0xf1] sm:$0xff] %vm523_vm0, %v13461_v24  ;;  %v1261_v43 = vld [vmem:[#allocation2 + $0x92] sm:$0xff]  ;;  %v1262_v44 = vld [vmem:[#allocation2 + $0x9a] sm:$0xff]  ;;  %v13546_v54 = vpack.c.bf16 %v1260_v42, %v1259_v41 }
  0x38   : > { %15651 = vst [vmem:[#allocation13_spill] sm:$0xff] %v13473_v26  ;;  %15652 = vst [vmem:[#allocation14_spill] sm:$0xff] %v13476_v27  ;;  %v13557_v56 = vpack.c.bf16 %v1262_v44, %v1261_v43  ;;  %v1549_v63 = vld [vmem:[#allocation2 + $0x30] sm:$0xff]  ;;  %v1550_v2 = vld [vmem:[#allocation2 + $0x38] sm:$0xff] }
  0x39   : > { %687 = vst.msk [vmem:[#allocation2 + $0xf9] sm:$0xff] %vm523_vm0, %v13468_v25  ;;  %688 = vst.msk [vmem:[#allocation2 + $0x109] sm:$0xff] %vm523_vm0, %v13473_v26  ;;  %v1551_v6 = vld [vmem:[#allocation2 + $0x48] sm:$0xff]  ;;  %v1552_v7 = vld [vmem:[#allocation2 + $0x50] sm:$0xff]  ;;  %v13576_v35 = vpack.c.bf16 %v1550_v2, %v1549_v63 }
  0x3a   : > { %689 = vst.msk [vmem:[#allocation2 + $0x111] sm:$0xff] %vm523_vm0, %v13476_v27  ;;  %15653 = vst [vmem:[#allocation15_spill] sm:$0xff] %v13508_v45  ;;  %v1263_v57 = vld [vmem:[#allocation2 + $0xaa] sm:$0xff]  ;;  %v1264_v58 = vld [vmem:[#allocation2 + $0xb2] sm:$0xff]  ;;  %v13578_v37 = vpack.c.bf16 %v1552_v7, %v1551_v6 }
  0x3b   : > { %15654 = vst [vmem:[#allocation16_spill] sm:$0xff] %v13511_v46  ;;  %15655 = vst [vmem:[#allocation17_spill] sm:$0xff] %v13514_v47  ;;  %v13565_v61 = vpack.c.bf16 %v1264_v58, %v1263_v57  ;;  %v1845_v9 = vld [vmem:[#allocation2 + $0x19] sm:$0xff]  ;;  %v13130_v28 = vld [vmem:[%s15585_s1 + $0x8] sm:$0xff]  }
  0x3c   : > { %11251 = vmatmul.mubr.msk.bf16.gmra.mrb[4].mxu0 %vm523_vm0, %v13499_v39  ;;  %690 = vst.msk [vmem:[#allocation2 + $0x121] sm:$0xff] %vm523_vm0, %v13508_v45  ;;  %691 = vst.msk [vmem:[#allocation2 + $0x129] sm:$0xff] %vm523_vm0, %v13511_v46  ;;  %v768_v29 = vld [vmem:[#allocation2 + $0x1] sm:$0xff]  ;;  %v769_v32 = vld [vmem:[#allocation2 + $0x9] sm:$0xff]  ;;  %11176 = vmatprep.subr.bf16.mxu1 %v13130_v28 }
  0x3d   : > { %11254 = vmatprep.mubr.msk.bf16.mxu0 %vm523_vm0, %v13501_v40  ;;  %15656 = vst [vmem:[#allocation18_spill] sm:$0xff] %v13521_v48  ;;  %692 = vst.msk [vmem:[#allocation2 + $0x139] sm:$0xff] %vm523_vm0, %v13514_v47  ;;  %v1846_v31 = vld [vmem:[#allocation2 + $0x21] sm:$0xff]  ;;  %v800_v36 = vpack.c.bf16 %v769_v32, %v768_v29  ;;  %v1847_v38 = vld [vmem:[#allocation2 + $0x31] sm:$0xff]  ;;  %11177 = vmatpush3.bf16.msra.mxu1 %v13130_v28 }
  0x3e   : > { %15657 = vst [vmem:[#allocation19_spill] sm:$0xff] %v13526_v49  ;;  %15658 = vst [vmem:[#allocation20_spill] sm:$0xff] %v13529_v50  ;;  %v1848_v41 = vld [vmem:[#allocation2 + $0x39] sm:$0xff]  ;;  %v13580_v42 = vpack.c.bf16 %v1846_v31, %v1845_v9  ;;  %v13585_v43 = vld [vmem:[%s15585_s1 + $0x28] sm:$0xff]  }
  0x3f   : > { %693 = vst.msk [vmem:[#allocation2 + $0x141] sm:$0xff] %vm523_vm0, %v13521_v48  ;;  %694 = vst.msk [vmem:[#allocation2 + $0x151] sm:$0xff] %vm523_vm0, %v13526_v49  ;;  %11178 = vmatprep.mubr.msk.bf16.mxu1 %vm523_vm0, %v800_v36  ;;  %v13590_v44 = vpack.c.bf16 %v1848_v41, %v1847_v38  ;;  %v1553_v57 = vld [vmem:[#allocation2 + $0x60] sm:$0xff]  ;;  %v1554_v58 = vld [vmem:[#allocation2 + $0x68] sm:$0xff] }
  0x40   : > { %695 = vst.msk [vmem:[#allocation2 + $0x159] sm:$0xff] %vm523_vm0, %v13529_v50  ;;  %15659 = vst [vmem:[#allocation21_spill] sm:$0xff] %v13538_v51  ;;  %11179 = vmatmul.mubr.msk.bf16.vlgmr.msra.gmra.mrb[0].mxu1 %vm523_vm0, %v13580_v42  ;;  %v1555_v59 = vld [vmem:[#allocation2 + $0x78] sm:$0xff]  ;;  %v1556_v60 = vld [vmem:[#allocation2 + $0x80] sm:$0xff]  ;;  %v13600_v6 = vpack.c.bf16 %v1554_v58, %v1553_v57 }
  0x41   : > { %15660 = vst [vmem:[#allocation22_spill] sm:$0xff] %v13541_v52  ;;  %15661 = vst [vmem:[#allocation23_spill] sm:$0xff] %v13544_v53  ;;  %11182 = vmatprep.mubr.msk.bf16.mxu1 %vm523_vm0, %v13590_v44  ;;  %v1849_v63 = vld [vmem:[#allocation2 + $0x49] sm:$0xff]  ;;  %v1850_v2 = vld [vmem:[#allocation2 + $0x51] sm:$0xff]  ;;  %v13602_v28 = vpack.c.bf16 %v1556_v60, %v1555_v59 }
  0x42   : > { %696 = vst.msk [vmem:[#allocation2 + $0x169] sm:$0xff] %vm523_vm0, %v13538_v51  ;;  %697 = vst.msk [vmem:[#allocation2 + $0x171] sm:$0xff] %vm523_vm0, %v13541_v52  ;;  %v1851_v7 = vld [vmem:[#allocation2 + $0x61] sm:$0xff]  ;;  %v1852_v9 = vld [vmem:[#allocation2 + $0x69] sm:$0xff] }
  0x43   : > { %15662 = vst [vmem:[#allocation24_spill] sm:$0xff] %v13553_v55  ;;  %698 = vst.msk [vmem:[#allocation2 + $0x181] sm:$0xff] %vm523_vm0, %v13544_v53  ;;  %v13606_v29 = vpack.c.bf16 %v1852_v9, %v1851_v7  ;;  %v1557_v31 = vld [vmem:[#allocation2 + $0x90] sm:$0xff]  ;;  %v1558_v32 = vld [vmem:[#allocation2 + $0x98] sm:$0xff] }
  0x44   : > { %699 = vst.msk [vmem:[#allocation2 + $0x189] sm:$0xff] %vm523_vm0, %v13553_v55  ;;  %11255 = vmatmul.mubr.msk.bf16.gmra.mrb[8].mxu0 %vm523_vm0, %v13546_v54  ;;  %v1559_v36 = vld [vmem:[#allocation2 + $0xa8] sm:$0xff]  ;;  %v1560_v38 = vld [vmem:[#allocation2 + $0xb0] sm:$0xff]  ;;  %v1853_v41 = vld [vmem:[#allocation2 + $0x79] sm:$0xff]  ;;  %v13616_v58 = vpack.c.bf16 %v1558_v32, %v1557_v31 }
  0x45   : > { %11258 = vmatprep.mubr.msk.bf16.mxu0 %vm523_vm0, %v13557_v56  ;;  %v1854_v57 = vld [vmem:[#allocation2 + $0x81] sm:$0xff]  ;;  %v1855_v59 = vld [vmem:[#allocation2 + $0x91] sm:$0xff]  ;;  %v1856_v60 = vld [vmem:[#allocation2 + $0x99] sm:$0xff] }
  0x46   : > { %v13622_v7 = vpack.c.bf16 %v1856_v60, %v1855_v59  ;;  %v1561_v9 = vld [vmem:[#allocation2 + $0xc0] sm:$0xff]  ;;  %v1562_v31 = vld [vmem:[#allocation2 + $0xc8] sm:$0xff]  ;;  %v1563_v32 = vld [vmem:[#allocation2 + $0xd8] sm:$0xff] }
  0x47   : > { %v1859_v59 = vld [vmem:[#allocation2 + $0xc1] sm:$0xff]  ;;  %v1860_v60 = vld [vmem:[#allocation2 + $0xc9] sm:$0xff] }
  0x48   : > { %v13638_v53 = vpack.c.bf16 %v1860_v60, %v1859_v59  ;;  %v1565_v52 = vld [vmem:[#allocation2 + $0xf0] sm:$0xff]  ;;  %v1864_v60 = vld [vmem:[#allocation2 + $0xf9] sm:$0xff] }
  0x49   : > { %v1863_v59 = vld [vmem:[#allocation2 + $0xf1] sm:$0xff]  ;;  %v1569_v48 = vld [vmem:[#allocation2 + $0x120] sm:$0xff] }
  0x4a   : > { %v13654_v49 = vpack.c.bf16 %v1864_v60, %v1863_v59  ;;  %v1867_v59 = vld [vmem:[#allocation2 + $0x121] sm:$0xff]  ;;  %v1868_v60 = vld [vmem:[#allocation2 + $0x129] sm:$0xff] }
  0x4b   : > { %v13670_v45 = vpack.c.bf16 %v1868_v60, %v1867_v59  ;;  %v1573_v27 = vld [vmem:[#allocation2 + $0x150] sm:$0xff]  ;;  %v1872_v60 = vld [vmem:[#allocation2 + $0x159] sm:$0xff] }
  0x4c   : > { %11259 = vmatmul.mubr.msk.bf16.gmra.mrb[12].mxu0 %vm523_vm0, %v13565_v61  ;;  %v1871_v59 = vld [vmem:[#allocation2 + $0x151] sm:$0xff]  ;;  %v1577_v23 = vld [vmem:[#allocation2 + $0x180] sm:$0xff] }
  0x4d   : > { %11280 = vmatprep.mubr.msk.bf16.mxu0 %vm523_vm0, %v13567_v62  ;;  %v13686_v24 = vpack.c.bf16 %v1872_v60, %v1871_v59  ;;  %v718_v59 = vld [vmem:[#allocation2] sm:$0xff]  ;;  %v719_v60 = vld [vmem:[#allocation2 + $0x8] sm:$0xff] }
  0x54   : > { %11281 = vmatmul.mubr.msk.bf16.vlgmr.msra.gmra.mrb[0].mxu0 %vm523_vm0, %v13576_v35 }
  0x55   : > { %11313 = vmatpush3.bf16.msra.mxu0 %v13489_v33  ;;  %11284 = vmatprep.mubr.msk.bf16.mxu0 %vm523_vm0, %v13578_v37  ;;  %v13604_v33 = vpack.c.bf16 %v1850_v2, %v1849_v63  ;;  %v13618_v63 = vpack.c.bf16 %v1560_v38, %v1559_v36  ;;  %v13620_v2 = vpack.c.bf16 %v1854_v57, %v1853_v41  ;;  %v1564_v36 = vld [vmem:[#allocation2 + $0xe0] sm:$0xff]  ;;  %v1857_v38 = vld [vmem:[#allocation2 + $0xa9] sm:$0xff]  ;;  %v1858_v41 = vld [vmem:[#allocation2 + $0xb1] sm:$0xff] }
  0x56   : > { %11346 = vmatprep.subr.bf16.mxu0 %v13585_v43  ;;  %v13632_v57 = vpack.c.bf16 %v1562_v31, %v1561_v9  ;;  %v13634_v1 = vpack.c.bf16 %v1564_v36, %v1563_v32  ;;  %v13636_v55 = vpack.c.bf16 %v1858_v41, %v1857_v38  ;;  %v1566_v9 = vld [vmem:[#allocation2 + $0xf8] sm:$0xff]  ;;  %v1567_v31 = vld [vmem:[#allocation2 + $0x108] sm:$0xff]  ;;  %v1568_v32 = vld [vmem:[#allocation2 + $0x110] sm:$0xff] }
  0x57   : > { %11183 = vmatmul.mubr.msk.bf16.gmra.mrb[4].mxu1 %vm523_vm0, %v13604_v33  ;;  %v1861_v36 = vld [vmem:[#allocation2 + $0xd9] sm:$0xff]  ;;  %v1862_v38 = vld [vmem:[#allocation2 + $0xe1] sm:$0xff]  ;;  %v13648_v41 = vpack.c.bf16 %v1566_v9, %v1565_v52  ;;  %v13650_v51 = vpack.c.bf16 %v1568_v32, %v1567_v31  ;;  %v1865_v32 = vld [vmem:[#allocation2 + $0x109] sm:$0xff] }
  0x58   : > { %11186 = vmatprep.mubr.msk.bf16.mxu1 %vm523_vm0, %v13606_v29  ;;  %v13652_v50 = vpack.c.bf16 %v1862_v38, %v1861_v36  ;;  %v1570_v52 = vld [vmem:[#allocation2 + $0x128] sm:$0xff]  ;;  %v1571_v9 = vld [vmem:[#allocation2 + $0x138] sm:$0xff]  ;;  %v1572_v31 = vld [vmem:[#allocation2 + $0x140] sm:$0xff] }
  0x59   : > { %v1866_v36 = vld [vmem:[#allocation2 + $0x111] sm:$0xff]  ;;  %v13664_v38 = vpack.c.bf16 %v1570_v52, %v1569_v48  ;;  %v13666_v47 = vpack.c.bf16 %v1572_v31, %v1571_v9  ;;  %v1575_v52 = vld [vmem:[#allocation2 + $0x168] sm:$0xff]  ;;  %v1869_v31 = vld [vmem:[#allocation2 + $0x139] sm:$0xff] }
  0x5a   : > { %v13668_v46 = vpack.c.bf16 %v1866_v36, %v1865_v32  ;;  %v1574_v48 = vld [vmem:[#allocation2 + $0x158] sm:$0xff]  ;;  %v1576_v9 = vld [vmem:[#allocation2 + $0x170] sm:$0xff]  ;;  %v1870_v32 = vld [vmem:[#allocation2 + $0x141] sm:$0xff] }
  0x5b   : > { %v13680_v36 = vpack.c.bf16 %v1574_v48, %v1573_v27  ;;  %v13682_v26 = vpack.c.bf16 %v1576_v9, %v1575_v52  ;;  %v13684_v25 = vpack.c.bf16 %v1870_v32, %v1869_v31  ;;  %v1578_v27 = vld [vmem:[#allocation2 + $0x188] sm:$0xff]  ;;  %v1874_v52 = vld [vmem:[#allocation2 + $0x171] sm:$0xff]  ;;  %v13132_v32 = vld [vmem:[%s15585_s1] sm:$0xff]  }
  0x5c   : > { %11285 = vmatmul.mubr.msk.bf16.gmra.mrb[4].mxu0 %vm523_vm0, %v13600_v6  ;;  %v1873_v48 = vld [vmem:[#allocation2 + $0x169] sm:$0xff]  ;;  %v13696_v9 = vpack.c.bf16 %v1578_v27, %v1577_v23  ;;  %11210 = vmatprep.subr.bf16.mxu1 %v13132_v32  ;;  %v750_v23 = vpack.c.bf16 %v719_v60, %v718_v59  ;;  %v2161_v60 = vld [vmem:[#allocation2 + $0xf2] sm:$0xff] }
  0x5d   : > { %11288 = vmatprep.mubr.msk.bf16.mxu0 %vm523_vm0, %v13602_v28  ;;  %v13698_v31 = vpack.c.bf16 %v1874_v52, %v1873_v48  ;;  %11211 = vmatpush3.bf16.msra.mxu1 %v13132_v32  ;;  %v13131_v27 = vld [vmem:[%s15585_s1 + $0x30] sm:$0xff]   ;;  %v2159_v32 = vld [vmem:[#allocation2 + $0xda] sm:$0xff]  ;;  %v2160_v59 = vld [vmem:[#allocation2 + $0xe2] sm:$0xff] }
  0x5e   : > { %12230 = vmatprep.subr.bf16.mxu1 %v13241_v0  ;;  %v2158_v48 = vld [vmem:[#allocation2 + $0xca] sm:$0xff] }
  0x5f   : > { %11187 = vmatmul.mubr.msk.bf16.gmra.mrb[8].mxu1 %vm523_vm0, %v13620_v2 }
  0x60   : > { %11190 = vmatprep.mubr.msk.bf16.mxu1 %vm523_vm0, %v13622_v7 }
  0x64   : > { %11289 = vmatmul.mubr.msk.bf16.gmra.mrb[8].mxu0 %vm523_vm0, %v13616_v58 }
  0x65   : > { %11292 = vmatprep.mubr.msk.bf16.mxu0 %vm523_vm0, %v13618_v63 }
  0x67   : > { %11191 = vmatmul.mubr.msk.bf16.gmra.mrb[12].mxu1 %vm523_vm0, %v13636_v55 }
  0x68   : > { %11194 = vmatprep.mubr.msk.bf16.mxu1 %vm523_vm0, %v13638_v53 }
  0x6c   : > { %11293 = vmatmul.mubr.msk.bf16.gmra.mrb[12].mxu0 %vm523_vm0, %v13632_v57 }
  0x6d   : > { %11296 = vmatprep.mubr.msk.bf16.mxu0 %vm523_vm0, %v13634_v1 }
  0x6f   : > { %11195 = vmatmul.mubr.msk.bf16.gmra.mrb[16].mxu1 %vm523_vm0, %v13652_v50 }
  0x70   : > { %11198 = vmatprep.mubr.msk.bf16.mxu1 %vm523_vm0, %v13654_v49 }
  0x74   : > { %11297 = vmatmul.mubr.msk.bf16.gmra.mrb[16].mxu0 %vm523_vm0, %v13648_v41 }
  0x75   : > { %11300 = vmatprep.mubr.msk.bf16.mxu0 %vm523_vm0, %v13650_v51 }
  0x77   : > { %11199 = vmatmul.mubr.msk.bf16.gmra.mrb[20].mxu1 %vm523_vm0, %v13668_v46 }
  0x78   : > { %11202 = vmatprep.mubr.msk.bf16.mxu1 %vm523_vm0, %v13670_v45 }
  0x7c   : > { %11301 = vmatmul.mubr.msk.bf16.gmra.mrb[20].mxu0 %vm523_vm0, %v13664_v38 }
  0x7d   : > { %11304 = vmatprep.mubr.msk.bf16.mxu0 %vm523_vm0, %v13666_v47 }
  0x7f   : > { %11203 = vmatmul.mubr.msk.bf16.gmra.mrb[24].mxu1 %vm523_vm0, %v13684_v25 }
  0x80   : > { %11206 = vmatprep.mubr.msk.bf16.mxu1 %vm523_vm0, %v13686_v24 }
  0x84   : > { %11305 = vmatmul.mubr.msk.bf16.gmra.mrb[24].mxu0 %vm523_vm0, %v13680_v36 }
  0x85   : > { %11308 = vmatprep.mubr.msk.bf16.mxu0 %vm523_vm0, %v13682_v26 }
  0x87   : > { %11207 = vmatmul.mubr.msk.bf16.gmra.mrb[28].mxu1 %vm523_vm0, %v13698_v31 }
  0x88   : > { %11212 = vmatprep.mubr.msk.bf16.mxu1 %vm523_vm0, %v750_v23  ;;  %v2162_v23 = vld [vmem:[#allocation2 + $0xfa] sm:$0xff] }
  0x8c   : > { %11309 = vmatmul.mubr.msk.bf16.gmra.mrb[28].mxu0 %vm523_vm0, %v13696_v9 }
  0x8d   : > { %11314 = vmatprep.mubr.msk.bf16.mxu0 %vm523_vm0, %v13580_v42 }
  0x8f   : > { %11213 = vmatmul.mubr.msk.bf16.vlgmr.msra.gmra.mrb[0].mxu1 %vm523_vm0, %v13567_v62  ;;  %v1876_v62 = vld [vmem:[#allocation2 + $0x189] sm:$0xff] }
  0x90   : > { %11216 = vmatprep.mubr.msk.bf16.mxu1 %vm523_vm0, %v13576_v35  ;;  %12231 = vmatpush3.bf16.msra.mxu1 %v13241_v0  ;;  %v1875_v0 = vld [vmem:[#allocation2 + $0x181] sm:$0xff] }
  0x91   : > { %v13772_v42 = vpack.c.bf16 %v1876_v62, %v1875_v0  ;;  %v13784_v0 = vpack.c.bf16 %v2160_v59, %v2159_v32  ;;  %v13133_v62 = vld [vmem:[%s15585_s1 + $0x38] sm:$0xff]   ;;  %v2165_v32 = vld [vmem:[#allocation2 + $0x122] sm:$0xff]  ;;  %v2166_v59 = vld [vmem:[#allocation2 + $0x12a] sm:$0xff] }
  0x94   : > { %11315 = vmatmul.mubr.msk.bf16.vlgmr.msra.gmra.mrb[0].mxu0 %vm523_vm0, %v13590_v44 }
  0x95   : > { %11347 = vmatpush3.bf16.msra.mxu0 %v13585_v43  ;;  %11318 = vmatprep.mubr.msk.bf16.mxu0 %vm523_vm0, %v13604_v33  ;;  %v2157_v43 = vld [vmem:[#allocation2 + $0xc2] sm:$0xff] }
  0x96   : > { %11380 = vmatprep.subr.bf16.mxu0 %v13131_v27  ;;  %v13774_v52 = vpack.c.bf16 %v2158_v48, %v2157_v43  ;;  %v13791_v43 = vpack.c.bf16 %v2162_v23, %v2161_v60  ;;  %v2164_v48 = vld [vmem:[#allocation2 + $0x112] sm:$0xff]  ;;  %v2170_v23 = vld [vmem:[#allocation2 + $0x15a] sm:$0xff] }
  0x97   : > { %11217 = vmatmul.mubr.msk.bf16.gmra.mrb[4].mxu1 %vm523_vm0, %v13578_v37  ;;  %v2169_v60 = vld [vmem:[#allocation2 + $0x152] sm:$0xff] }
  0x98   : > { %11220 = vmatprep.mubr.msk.bf16.mxu1 %vm523_vm0, %v13600_v6 }
  0x9c   : > { %11319 = vmatmul.mubr.msk.bf16.gmra.mrb[4].mxu0 %vm523_vm0, %v13606_v29 }
  0x9d   : > { %11322 = vmatprep.mubr.msk.bf16.mxu0 %vm523_vm0, %v13620_v2 }
  0x9f   : > { %11221 = vmatmul.mubr.msk.bf16.gmra.mrb[8].mxu1 %vm523_vm0, %v13602_v28 }
  0xa0   : > { %11224 = vmatprep.mubr.msk.bf16.mxu1 %vm523_vm0, %v13616_v58 }
  0xa4   : > { %11323 = vmatmul.mubr.msk.bf16.gmra.mrb[8].mxu0 %vm523_vm0, %v13622_v7 }
  0xa5   : > { %11326 = vmatprep.mubr.msk.bf16.mxu0 %vm523_vm0, %v13636_v55 }
  0xa7   : > { %11225 = vmatmul.mubr.msk.bf16.gmra.mrb[12].mxu1 %vm523_vm0, %v13618_v63 }
  0xa8   : > { %11228 = vmatprep.mubr.msk.bf16.mxu1 %vm523_vm0, %v13632_v57 }
  0xac   : > { %11327 = vmatmul.mubr.msk.bf16.gmra.mrb[12].mxu0 %vm523_vm0, %v13638_v53 }
  0xad   : > { %11330 = vmatprep.mubr.msk.bf16.mxu0 %vm523_vm0, %v13652_v50 }
  0xaf   : > { %11229 = vmatmul.mubr.msk.bf16.gmra.mrb[16].mxu1 %vm523_vm0, %v13634_v1 }
  0xb0   : > { %11232 = vmatprep.mubr.msk.bf16.mxu1 %vm523_vm0, %v13648_v41 }
  0xb4   : > { %11331 = vmatmul.mubr.msk.bf16.gmra.mrb[16].mxu0 %vm523_vm0, %v13654_v49 }
  0xb5   : > { %11334 = vmatprep.mubr.msk.bf16.mxu0 %vm523_vm0, %v13668_v46 }
  0xb7   : > { %11233 = vmatmul.mubr.msk.bf16.gmra.mrb[20].mxu1 %vm523_vm0, %v13650_v51 }
  0xb8   : > { %11236 = vmatprep.mubr.msk.bf16.mxu1 %vm523_vm0, %v13664_v38 }
  0xbc   : > { %11335 = vmatmul.mubr.msk.bf16.gmra.mrb[20].mxu0 %vm523_vm0, %v13670_v45 }
  0xbd   : > { %11338 = vmatprep.mubr.msk.bf16.mxu0 %vm523_vm0, %v13684_v25 }
  0xbf   : > { %11237 = vmatmul.mubr.msk.bf16.gmra.mrb[24].mxu1 %vm523_vm0, %v13666_v47 }
  0xc0   : > { %11240 = vmatprep.mubr.msk.bf16.mxu1 %vm523_vm0, %v13680_v36 }
  0xc4   : > { %11339 = vmatmul.mubr.msk.bf16.gmra.mrb[24].mxu0 %vm523_vm0, %v13686_v24 }
  0xc5   : > { %11342 = vmatprep.mubr.msk.bf16.mxu0 %vm523_vm0, %v13698_v31 }
  0xc7   : > { %11241 = vmatmul.mubr.msk.bf16.gmra.mrb[28].mxu1 %vm523_vm0, %v13682_v26 }
  0xc8   : > { %11262 = vmatprep.mubr.msk.bf16.mxu1 %vm523_vm0, %v13774_v52 }
  0xcc   : > { %11343 = vmatmul.mubr.msk.bf16.gmra.mrb[28].mxu0 %vm523_vm0, %v13772_v42 }
  0xcd   : > { %11348 = vmatprep.mubr.msk.bf16.mxu0 %vm523_vm0, %v13484_v30  ;;  %v2163_v30 = vld [vmem:[#allocation2 + $0x10a] sm:$0xff] }
  0xce   : > { %v13799_v22 = vpack.c.bf16 %v2164_v48, %v2163_v30  ;;  %v13813_v48 = vpack.c.bf16 %v2170_v23, %v2169_v60  ;;  %v3042_v60 = vld [vmem:[#allocation2 + $0x62] sm:$0xff]  ;;  %v3043_v23 = vld [vmem:[#allocation2 + $0x6a] sm:$0xff] }
  0xcf   : > { %11263 = vmatmul.mubr.msk.bf16.vlgmr.msra.gmra.mrb[16].mxu1 %vm523_vm0, %v13784_v0 }
  0xd0   : > { %11266 = vmatprep.mubr.msk.bf16.mxu1 %vm523_vm0, %v13791_v43 }
  0xd4   : > { %11349 = vmatmul.mubr.msk.bf16.vlgmr.msra.gmra.mrb[0].mxu0 %vm523_vm0, %v13491_v34  ;;  %v13801_v34 = vpack.c.bf16 %v2166_v59, %v2165_v32 }
  0xd5   : > { %11381 = vmatpush3.bf16.msra.mxu0 %v13131_v27  ;;  %11352 = vmatprep.mubr.msk.bf16.mxu0 %vm523_vm0, %v13499_v39  ;;  %v2167_v39 = vld [vmem:[#allocation2 + $0x13a] sm:$0xff]  ;;  %v2168_v27 = vld [vmem:[#allocation2 + $0x142] sm:$0xff] }
  0xd6   : > { %11414 = vmatprep.subr.bf16.mxu0 %v13133_v62  ;;  %v13811_v30 = vpack.c.bf16 %v2168_v27, %v2167_v39  ;;  %v13852_v39 = vld [vmem:[%s15585_s1 + $0x40] sm:$0xff]   ;;  %v3041_v27 = vld [vmem:[#allocation2 + $0x52] sm:$0xff] }
  0xd7   : > { %11267 = vmatmul.mubr.msk.bf16.gmra.mrb[20].mxu1 %vm523_vm0, %v13799_v22 }
  0xd8   : > { %11270 = vmatprep.mubr.msk.bf16.mxu1 %vm523_vm0, %v13801_v34 }
  0xdc   : > { %11353 = vmatmul.mubr.msk.bf16.gmra.mrb[4].mxu0 %vm523_vm0, %v13501_v40  ;;  %v2171_v40 = vld [vmem:[#allocation2 + $0x16a] sm:$0xff] }
  0xdd   : > { %11356 = vmatprep.mubr.msk.bf16.mxu0 %vm523_vm0, %v13546_v54  ;;  %v2172_v54 = vld [vmem:[#allocation2 + $0x172] sm:$0xff] }
  0xde   : > { %v13823_v32 = vpack.c.bf16 %v2172_v54, %v2171_v40  ;;  %v3072_v54 = vpack.c.bf16 %v3043_v23, %v3042_v60 }
  0xdf   : > { %11271 = vmatmul.mubr.msk.bf16.gmra.mrb[24].mxu1 %vm523_vm0, %v13811_v30 }
  0xe0   : > { %11274 = vmatprep.mubr.msk.bf16.mxu1 %vm523_vm0, %v13813_v48 }
  0xe4   : > { %11357 = vmatmul.mubr.msk.bf16.gmra.mrb[8].mxu0 %vm523_vm0, %v13557_v56  ;;  %v2173_v56 = vld [vmem:[#allocation2 + $0x182] sm:$0xff] }
  0xe5   : > { %11360 = vmatprep.mubr.msk.bf16.mxu0 %vm523_vm0, %v13565_v61  ;;  %v2174_v61 = vld [vmem:[#allocation2 + $0x18a] sm:$0xff] }
  0xe6   : > { %v13843_v59 = vpack.c.bf16 %v2174_v61, %v2173_v56  ;;  %v3046_v56 = vld [vmem:[#allocation2 + $0x92] sm:$0xff]  ;;  %v3047_v61 = vld [vmem:[#allocation2 + $0x9a] sm:$0xff] }
  0xe7   : > { %11275 = vmatmul.mubr.msk.bf16.gmra.mrb[28].mxu1 %vm523_vm0, %v13823_v32 }
  0xec   : > { %11361 = vmatmul.mubr.msk.bf16.gmra.mrb[12].mxu0 %vm523_vm0, %v13774_v52 }
  0xed   : > { %11364 = vmatprep.mubr.msk.bf16.mxu0 %vm523_vm0, %v13784_v0 }
  0xf4   : > { %11365 = vmatmul.mubr.msk.bf16.gmra.mrb[16].mxu0 %vm523_vm0, %v13791_v43 }
  0xf5   : > { %11368 = vmatprep.mubr.msk.bf16.mxu0 %vm523_vm0, %v13799_v22 }
  0xfc   : > { %11369 = vmatmul.mubr.msk.bf16.gmra.mrb[20].mxu0 %vm523_vm0, %v13801_v34 }
  0xfd   : > { %11372 = vmatprep.mubr.msk.bf16.mxu0 %vm523_vm0, %v13811_v30 }
 0x104   : > { %11373 = vmatmul.mubr.msk.bf16.gmra.mrb[24].mxu0 %vm523_vm0, %v13813_v48 }
 0x105   : > { %11376 = vmatprep.mubr.msk.bf16.mxu0 %vm523_vm0, %v13823_v32 }
 0x10c   : > { %11377 = vmatmul.mubr.msk.bf16.gmra.mrb[28].mxu0 %vm523_vm0, %v13843_v59 }
 0x10d   : > { %11382 = vmatprep.mubr.msk.bf16.mxu0 %vm523_vm0, %v13576_v35  ;;  %v2473_v35 = vld [vmem:[#allocation2 + $0x1a0] sm:$0xff] }
 0x114   : > { %11383 = vmatmul.mubr.msk.bf16.vlgmr.msra.gmra.mrb[0].mxu0 %vm523_vm0, %v13578_v37 }
 0x115   : > { %11415 = vmatpush3.bf16.msra.mxu0 %v13133_v62  ;;  %11386 = vmatprep.mubr.msk.bf16.mxu0 %vm523_vm0, %v13600_v6  ;;  %v3040_v62 = vld [vmem:[#allocation2 + $0x4a] sm:$0xff] }
 0x116   : > { %11448 = vmatprep.subr.bf16.mxu0 %v13852_v39  ;;  %v3071_v40 = vpack.c.bf16 %v3041_v27, %v3040_v62 }
 0x11c   : > { %11387 = vmatmul.mubr.msk.bf16.gmra.mrb[4].mxu0 %vm523_vm0, %v13602_v28 }
 0x11d   : > { %11390 = vmatprep.mubr.msk.bf16.mxu0 %vm523_vm0, %v13616_v58 }
 0x124   : > { %11391 = vmatmul.mubr.msk.bf16.gmra.mrb[8].mxu0 %vm523_vm0, %v13618_v63 }
 0x125   : > { %11394 = vmatprep.mubr.msk.bf16.mxu0 %vm523_vm0, %v13632_v57 }
 0x12c   : > { %11395 = vmatmul.mubr.msk.bf16.gmra.mrb[12].mxu0 %vm523_vm0, %v13634_v1  ;;  %v2472_v1 = vld [vmem:[#allocation2 + $0x198] sm:$0xff] }
 0x12d   : > { %11398 = vmatprep.mubr.msk.bf16.mxu0 %vm523_vm0, %v13648_v41  ;;  %v2489_v37 = vpack.c.bf16 %v2473_v35, %v2472_v1  ;;  %v2770_v41 = vld [vmem:[#allocation2 + $0x199] sm:$0xff]  ;;  %v3074_v1 = vpack.c.bf16 %v3047_v61, %v3046_v56  ;;  %v3048_v35 = vld [vmem:[#allocation2 + $0xaa] sm:$0xff] }
 0x12e   : > { %v14130_v56 = vld [vmem:[%s15587_s3] ss:$0 sm:$0xff] }
 0x134   : > { %11399 = vmatmul.mubr.msk.bf16.gmra.mrb[16].mxu0 %vm523_vm0, %v13650_v51  ;;  %v3462_v51 = vld [vmem:[%s15595_s11] sm:$0xf] }
 0x135   : > { %11402 = vmatprep.mubr.msk.bf16.mxu0 %vm523_vm0, %v13664_v38  ;;  %13096 = vmatprep.subr.msk.bf16.mxu1 %vm3511_vm2, %v3462_v51  ;;  %v2771_v38 = vld [vmem:[#allocation2 + $0x1a1] sm:$0xff] }
 0x13c   : > { %11403 = vmatmul.mubr.msk.bf16.gmra.mrb[20].mxu0 %vm523_vm0, %v13666_v47  ;;  %v15663_v47 = vmov 0.0  }
 0x13d   : > { %11406 = vmatprep.mubr.msk.bf16.mxu0 %vm523_vm0, %v13680_v36  ;;  %587 = vst.msk [vmem:[#allocation3 + $0x30] sm:$0xff] %vm579_vm3, %v15663_v47  ;;  %588 = vst.msk [vmem:[#allocation3 + $0x38] sm:$0xff] %vm579_vm3, %v15663_v47  ;;  %v3039_v36 = vld [vmem:[#allocation2 + $0x3a] sm:$0xff] }
 0x13e   : > { %580 = vst.msk [vmem:[#allocation3] sm:$0xff] %vm579_vm3, %v15663_v47  ;;  %581 = vst.msk [vmem:[#allocation3 + $0x8] sm:$0xff] %vm579_vm3, %v15663_v47 }
 0x13f   : > { %584 = vst.msk [vmem:[#allocation3 + $0x18] sm:$0xff] %vm579_vm3, %v15663_v47  ;;  %585 = vst.msk [vmem:[#allocation3 + $0x20] sm:$0xff] %vm579_vm3, %v15663_v47 }
 0x140   : > { %590 = vst.msk [vmem:[#allocation3 + $0x48] sm:$0xff] %vm579_vm3, %v15663_v47  ;;  %591 = vst.msk [vmem:[#allocation3 + $0x50] sm:$0xff] %vm579_vm3, %v15663_v47 }
 0x141   : > { %593 = vst.msk [vmem:[#allocation3 + $0x60] sm:$0xff] %vm579_vm3, %v15663_v47  ;;  %594 = vst.msk [vmem:[#allocation3 + $0x68] sm:$0xff] %vm579_vm3, %v15663_v47 }
 0x142   : > { %596 = vst.msk [vmem:[#allocation3 + $0x78] sm:$0xff] %vm579_vm3, %v15663_v47  ;;  %597 = vst.msk [vmem:[#allocation3 + $0x80] sm:$0xff] %vm579_vm3, %v15663_v47 }
 0x143   : > { %599 = vst.msk [vmem:[#allocation3 + $0x90] sm:$0xff] %vm579_vm3, %v15663_v47  ;;  %600 = vst.msk [vmem:[#allocation3 + $0x98] sm:$0xff] %vm579_vm3, %v15663_v47 }
 0x144   : > { %11407 = vmatmul.mubr.msk.bf16.gmra.mrb[24].mxu0 %vm523_vm0, %v13682_v26  ;;  %v3513_v26 = vsel %vm3511_vm2, %v3462_v51, 0  ;;  %602 = vst.msk [vmem:[#allocation3 + $0xa8] sm:$0xff] %vm579_vm3, %v15663_v47  ;;  %603 = vst.msk [vmem:[#allocation3 + $0xb0] sm:$0xff] %vm579_vm3, %v15663_v47 }
 0x145   : > { %11410 = vmatprep.mubr.msk.bf16.mxu0 %vm523_vm0, %v13696_v9  ;;  %605 = vst.msk [vmem:[#allocation3 + $0xc0] sm:$0xff] %vm579_vm3, %v15663_v47  ;;  %606 = vst.msk [vmem:[#allocation3 + $0xc8] sm:$0xff] %vm579_vm3, %v15663_v47  ;;  %11483 = vmatpush3.bf16.msra.mxu1 %v3513_v26  ;;  %v2787_v9 = vpack.c.bf16 %v2771_v38, %v2770_v41 }
 0x146   : > { %608 = vst.msk [vmem:[#allocation3 + $0xd8] sm:$0xff] %vm579_vm3, %v15663_v47  ;;  %609 = vst.msk [vmem:[#allocation3 + $0xe0] sm:$0xff] %vm579_vm3, %v15663_v47 }
 0x147   : > { %611 = vst.msk [vmem:[#allocation3 + $0xf0] sm:$0xff] %vm579_vm3, %v15663_v47  ;;  %612 = vst.msk [vmem:[#allocation3 + $0xf8] sm:$0xff] %vm579_vm3, %v15663_v47 }
 0x148   : > { %614 = vst.msk [vmem:[#allocation3 + $0x108] sm:$0xff] %vm579_vm3, %v15663_v47  ;;  %615 = vst.msk [vmem:[#allocation3 + $0x110] sm:$0xff] %vm579_vm3, %v15663_v47 }
 0x149   : > { %617 = vst.msk [vmem:[#allocation3 + $0x120] sm:$0xff] %vm579_vm3, %v15663_v47  ;;  %618 = vst.msk [vmem:[#allocation3 + $0x128] sm:$0xff] %vm579_vm3, %v15663_v47 }
 0x14a   : > { %620 = vst.msk [vmem:[#allocation3 + $0x138] sm:$0xff] %vm579_vm3, %v15663_v47  ;;  %621 = vst.msk [vmem:[#allocation3 + $0x140] sm:$0xff] %vm579_vm3, %v15663_v47 }
 0x14b   : > { %623 = vst.msk [vmem:[#allocation3 + $0x150] sm:$0xff] %vm579_vm3, %v15663_v47  ;;  %624 = vst.msk [vmem:[#allocation3 + $0x158] sm:$0xff] %vm579_vm3, %v15663_v47 }
 0x14c   : > { %11411 = vmatmul.mubr.msk.bf16.gmra.mrb[28].mxu0 %vm523_vm0, %v2489_v37  ;;  %626 = vst.msk [vmem:[#allocation3 + $0x168] sm:$0xff] %vm579_vm3, %v15663_v47  ;;  %627 = vst.msk [vmem:[#allocation3 + $0x170] sm:$0xff] %vm579_vm3, %v15663_v47  ;;  %v3049_v37 = vld [vmem:[#allocation2 + $0xb2] sm:$0xff] }
 0x14d   : > { %11416 = vmatprep.mubr.msk.bf16.mxu0 %vm523_vm0, %v13590_v44  ;;  %629 = vst.msk [vmem:[#allocation3 + $0x180] sm:$0xff] %vm579_vm3, %v15663_v47  ;;  %630 = vst.msk [vmem:[#allocation3 + $0x188] sm:$0xff] %vm579_vm3, %v15663_v47  ;;  %v3075_v51 = vpack.c.bf16 %v3049_v37, %v3048_v35 }
 0x14e   : > { %632 = vst.msk [vmem:[#allocation3 + $0x198] sm:$0xff] %vm579_vm3, %v15663_v47  ;;  %633 = vst.msk [vmem:[#allocation3 + $0x1a0] sm:$0xff] %vm579_vm3, %v15663_v47 }
 0x14f   : > { %589 = vst.msk [vmem:[#allocation3 + $0x40] sm:$0x3] %vm582_vm4, %v15663_v47  ;;  %583 = vst.msk [vmem:[#allocation3 + $0x10] sm:$0x3] %vm582_vm4, %v15663_v47 }
 0x150   : > { %586 = vst.msk [vmem:[#allocation3 + $0x28] sm:$0x3] %vm582_vm4, %v15663_v47  ;;  %592 = vst.msk [vmem:[#allocation3 + $0x58] sm:$0x3] %vm582_vm4, %v15663_v47 }
 0x151   : > { %595 = vst.msk [vmem:[#allocation3 + $0x70] sm:$0x3] %vm582_vm4, %v15663_v47  ;;  %598 = vst.msk [vmem:[#allocation3 + $0x88] sm:$0x3] %vm582_vm4, %v15663_v47 }
 0x152   : > { %601 = vst.msk [vmem:[#allocation3 + $0xa0] sm:$0x3] %vm582_vm4, %v15663_v47  ;;  %604 = vst.msk [vmem:[#allocation3 + $0xb8] sm:$0x3] %vm582_vm4, %v15663_v47 }
 0x153   : > { %607 = vst.msk [vmem:[#allocation3 + $0xd0] sm:$0x3] %vm582_vm4, %v15663_v47  ;;  %610 = vst.msk [vmem:[#allocation3 + $0xe8] sm:$0x3] %vm582_vm4, %v15663_v47 }
 0x154   : > { %11417 = vmatmul.mubr.msk.bf16.vlgmr.msra.gmra.mrb[0].mxu0 %vm523_vm0, %v13604_v33  ;;  %613 = vst.msk [vmem:[#allocation3 + $0x100] sm:$0x3] %vm582_vm4, %v15663_v47  ;;  %616 = vst.msk [vmem:[#allocation3 + $0x118] sm:$0x3] %vm582_vm4, %v15663_v47 }
 0x155   : > { %11449 = vmatpush3.bf16.msra.mxu0 %v13852_v39  ;;  %11420 = vmatprep.mubr.msk.bf16.mxu0 %vm523_vm0, %v13606_v29  ;;  %619 = vst.msk [vmem:[#allocation3 + $0x130] sm:$0x3] %vm582_vm4, %v15663_v47  ;;  %622 = vst.msk [vmem:[#allocation3 + $0x148] sm:$0x3] %vm582_vm4, %v15663_v47 }
 0x156   : > { %625 = vst.msk [vmem:[#allocation3 + $0x160] sm:$0x3] %vm582_vm4, %v15663_v47  ;;  %628 = vst.msk [vmem:[#allocation3 + $0x178] sm:$0x3] %vm582_vm4, %v15663_v47 }
 0x157   : > { %631 = vst.msk [vmem:[#allocation3 + $0x190] sm:$0x3] %vm582_vm4, %v15663_v47  ;;  %634 = vst.msk [vmem:[#allocation3 + $0x1a8] sm:$0x3] %vm582_vm4, %v15663_v47 }
 0x15c   : > { %11421 = vmatmul.mubr.msk.bf16.gmra.mrb[4].mxu0 %vm523_vm0, %v13620_v2 }
 0x15d   : > { %11424 = vmatprep.mubr.msk.bf16.mxu0 %vm523_vm0, %v13622_v7 }
 0x162   : > { %v13976_v44 = vpop.f32.mrb[0].mxu1 }
 0x163   : > { %v13978_v6 = vpop.f32.mrb[1].mxu1 }
 0x164   : > { %11425 = vmatmul.mubr.msk.bf16.gmra.mrb[8].mxu0 %vm523_vm0, %v13636_v55  ;;  %v13980_v28 = vpop.f32.mrb[2].mxu1 }
 0x165   : > { %11428 = vmatprep.mubr.msk.bf16.mxu0 %vm523_vm0, %v13638_v53  ;;  %v13982_v33 = vpop.f32.mrb[3].mxu1 }
 0x16a   : > { %v13988_v29 = vpop.f32.mrb[4].mxu1 }
 0x16b   : > { %v13990_v55 = vpop.f32.mrb[5].mxu1 }
 0x16c   : > { %11429 = vmatmul.mubr.msk.bf16.gmra.mrb[12].mxu0 %vm523_vm0, %v13652_v50  ;;  %v13992_v58 = vpop.f32.mrb[6].mxu1 }
 0x16d   : > { %11432 = vmatprep.mubr.msk.bf16.mxu0 %vm523_vm0, %v13654_v49  ;;  %v13994_v53 = vpop.f32.mrb[7].mxu1 }
 0x172   : > { %v14000_v63 = vpop.f32.mrb[8].mxu1 }
 0x173   : > { %v14002_v50 = vpop.f32.mrb[9].mxu1 }
 0x174   : > { %11433 = vmatmul.mubr.msk.bf16.gmra.mrb[16].mxu0 %vm523_vm0, %v13668_v46  ;;  %v14004_v2 = vpop.f32.mrb[10].mxu1 }
 0x175   : > { %11436 = vmatprep.mubr.msk.bf16.mxu0 %vm523_vm0, %v13670_v45  ;;  %v14006_v49 = vpop.f32.mrb[11].mxu1 }
 0x17a   : > { %v14012_v7 = vpop.f32.mrb[12].mxu1 }
 0x17b   : > { %v14014_v46 = vpop.f32.mrb[13].mxu1 }
 0x17c   : > { %11437 = vmatmul.mubr.msk.bf16.gmra.mrb[20].mxu0 %vm523_vm0, %v13684_v25  ;;  %v14016_v57 = vpop.f32.mrb[14].mxu1  ;;  %v3038_v25 = vld [vmem:[#allocation2 + $0x32] sm:$0xff] }
 0x17d   : > { %11440 = vmatprep.mubr.msk.bf16.mxu0 %vm523_vm0, %v13686_v24  ;;  %v14018_v45 = vpop.f32.mrb[15].mxu1  ;;  %v3070_v24 = vpack.c.bf16 %v3039_v36, %v3038_v25 }
 0x184   : > { %11441 = vmatmul.mubr.msk.bf16.gmra.mrb[24].mxu0 %vm523_vm0, %v13698_v31  ;;  %v3044_v31 = vld [vmem:[#allocation2 + $0x7a] sm:$0xff] }
 0x185   : > { %11444 = vmatprep.mubr.msk.bf16.mxu0 %vm523_vm0, %v13772_v42  ;;  %v3045_v42 = vld [vmem:[#allocation2 + $0x82] sm:$0xff] }
 0x186   : > { %v3073_v39 = vpack.c.bf16 %v3045_v42, %v3044_v31 }
 0x18c   : > { %11445 = vmatmul.mubr.msk.bf16.gmra.mrb[28].mxu0 %vm523_vm0, %v2787_v9 }
 0x18d   : > { %11450 = vmatprep.mubr.msk.bf16.mxu0 %vm523_vm0, %v3070_v24 }
 0x194   : > { %11451 = vmatmul.mubr.msk.bf16.vlgmr.msra.gmra.mrb[0].mxu0 %vm523_vm0, %v3071_v40  ;;  %v3068_v40 = vld [vmem:[#allocation2 + $0x19a] sm:$0xff] }
 0x195   : > { %11454 = vmatprep.mubr.msk.bf16.mxu0 %vm523_vm0, %v3072_v54  ;;  %v3069_v54 = vld [vmem:[#allocation2 + $0x1a2] sm:$0xff] }
 0x19c   : > { %11455 = vmatmul.mubr.msk.bf16.gmra.mrb[4].mxu0 %vm523_vm0, %v3073_v39 }
 0x19d   : > { %11458 = vmatprep.mubr.msk.bf16.mxu0 %vm523_vm0, %v3074_v1 }
 0x1a2   : > { %v14033_v26 = vpop.f32.mrb[16].mxu1 }
 0x1a3   : > { %v14035_v41 = vpop.f32.mrb[17].mxu1 }
 0x1a4   : > { %11459 = vmatmul.mubr.msk.bf16.gmra.mrb[8].mxu0 %vm523_vm0, %v3075_v51  ;;  %v14037_v38 = vpop.f32.mrb[18].mxu1 }
 0x1a5   : > { %11462 = vmatprep.mubr.msk.bf16.mxu0 %vm523_vm0, %v13774_v52  ;;  %v14039_v25 = vpop.f32.mrb[19].mxu1 }
 0x1aa   : > { %v14045_v36 = vpop.f32.mrb[20].mxu1 }
 0x1ab   : > { %v14047_v9 = vpop.f32.mrb[21].mxu1 }
 0x1ac   : > { %11463 = vmatmul.mubr.msk.bf16.gmra.mrb[12].mxu0 %vm523_vm0, %v13784_v0  ;;  %v14049_v24 = vpop.f32.mrb[22].mxu1 }
 0x1ad   : > { %11466 = vmatprep.mubr.msk.bf16.mxu0 %vm523_vm0, %v13791_v43  ;;  %v14051_v52 = vpop.f32.mrb[23].mxu1 }
 0x1b2   : > { %v14057_v62 = vpop.f32.mrb[24].mxu1 }
 0x1b3   : > { %v14059_v0 = vpop.f32.mrb[25].mxu1 }
 0x1b4   : > { %11467 = vmatmul.mubr.msk.bf16.gmra.mrb[16].mxu0 %vm523_vm0, %v13799_v22  ;;  %v14061_v27 = vpop.f32.mrb[26].mxu1 }
 0x1b5   : > { %11470 = vmatprep.mubr.msk.bf16.mxu0 %vm523_vm0, %v13801_v34  ;;  %v14063_v43 = vpop.f32.mrb[27].mxu1 }
 0x1ba   : > { %v14069_v60 = vpop.f32.mrb[28].mxu1 }
 0x1bb   : > { %v14071_v22 = vpop.f32.mrb[29].mxu1 }
 0x1bc   : > { %11471 = vmatmul.mubr.msk.bf16.gmra.mrb[20].mxu0 %vm523_vm0, %v13811_v30  ;;  %v14073_v23 = vpop.f32.mrb[30].mxu1  ;;  %v3085_v30 = vpack.c.bf16 %v3069_v54, %v3068_v40 }
 0x1bd   : > { %11474 = vmatprep.mubr.msk.bf16.mxu0 %vm523_vm0, %v13813_v48  ;;  %v14075_v34 = vpop.f32.mrb[31].mxu1  ;;  %v13135_v48 = vld [vmem:[%s15594_s10] sm:$0xff]  }
 0x1be   : > { %11516 = vmatprep.subr.bf16.mxu1 %v13135_v48 }
 0x1c4   : > { %11475 = vmatmul.mubr.msk.bf16.gmra.mrb[24].mxu0 %vm523_vm0, %v13823_v32 }
 0x1c5   : > { %11478 = vmatprep.mubr.msk.bf16.mxu0 %vm523_vm0, %v13843_v59  ;;  %v14124_v59 = vld [vmem:[%s15586_s2] ss:$0 sm:$0xff] }
 0x1cc   : > { %11479 = vmatmul.mubr.msk.bf16.gmra.mrb[28].mxu0 %vm523_vm0, %v3085_v30 }
 0x267   : > { %v11452_v32 = vpop.f32.mrb[0].mxu0 }
 0x268   : > { %v12232_v31 = vadd.f32 %v11452_v32, %v13976_v44  ;;  %v3177_v42 = vpop.f32.mrb[1].mxu0 }
 0x269   : > { %v12233_v47 = vadd.f32 %v3177_v42, %v13978_v6  ;;  %v11453_v61 = vpop.f32.mrb[2].mxu0 }
 0x26a   : > { %v3345_v39 = vmul.f32 %v12232_v31, %v14124_v59  ;;  %v12234_v1 = vadd.f32 %v11453_v61, %v13980_v28  ;;  %v3180_v35 = vpop.f32.mrb[3].mxu0 }
 0x26b   : > { %v3343_v37 = vmul.f32 %v12233_v47, %v14124_v59  ;;  %v12235_v51 = vadd.f32 %v3180_v35, %v13982_v33 }
 0x26c   : > { %v3384_v44 = vadd.f32 %v14130_v56, %v3345_v39  ;;  %v3346_v40 = vmul.f32 %v12234_v1, %v14124_v59 }
 0x26d   : > { %v3382_v54 = vadd.f32 %v14130_v56, %v3343_v37  ;;  %v3344_v30 = vmul.f32 %v12235_v51, %v14124_v59 }
 0x26e   : > { %v3416_v32 = vmax.f32 %v3384_v44, 0.0  ;;  %v3385_v6 = vadd.f32 %v14130_v56, %v3346_v40 }
 0x26f   : > { %v3414_v42 = vmax.f32 %v3382_v54, 0.0  ;;  %v3383_v31 = vadd.f32 %v14130_v56, %v3344_v30  ;;  %v11456_v28 = vpop.f32.mrb[4].mxu0 }
 0x270   : > { %3894 = vst.msk [vmem:[#allocation3 + $0x31] sm:$0xff] %vm579_vm3, %v3416_v32  ;;  %v3417_v47 = vmax.f32 %v3385_v6, 0.0  ;;  %v12236_v33 = vadd.f32 %v11456_v28, %v13988_v29  ;;  %v3193_v61 = vpop.f32.mrb[5].mxu0 }
 0x271   : > { %3892 = vst.msk [vmem:[#allocation3 + $0x19] sm:$0xff] %vm579_vm3, %v3414_v42  ;;  %v3415_v39 = vmax.f32 %v3383_v31, 0.0  ;;  %v12237_v1 = vadd.f32 %v3193_v61, %v13990_v55  ;;  %v11457_v35 = vpop.f32.mrb[6].mxu0 }
 0x272   : > { %v3447_v37 = vpack.c.bf16 %v3417_v47, %v3416_v32  ;;  %3895 = vst.msk [vmem:[#allocation3 + $0x39] sm:$0xff] %vm579_vm3, %v3417_v47  ;;  %v3349_v51 = vmul.f32 %v12236_v33, %v14124_v59  ;;  %v12238_v44 = vadd.f32 %v11457_v35, %v13992_v58  ;;  %v3196_v40 = vpop.f32.mrb[7].mxu0  ;;  %v14161_v58 = vld [vmem:[%s15588_s4 + $0x4] sm:$0xf] }
 0x273   : > { %v3446_v54 = vpack.c.bf16 %v3415_v39, %v3414_v42  ;;  %3893 = vst.msk [vmem:[#allocation3 + $0x21] sm:$0xff] %vm579_vm3, %v3415_v39  ;;  %v3347_v29 = vmul.f32 %v12237_v1, %v14124_v59  ;;  %v12239_v30 = vadd.f32 %v3196_v40, %v13994_v53 }
 0x274   : > { %v3388_v6 = vadd.f32 %v14130_v56, %v3349_v51  ;;  %v3350_v55 = vmul.f32 %v12238_v44, %v14124_v59 }
 0x275   : > { %v3386_v32 = vadd.f32 %v14130_v56, %v3347_v29  ;;  %v3348_v31 = vmul.f32 %v12239_v30, %v14124_v59  ;;  %11484 = vmatprep.mubr.msk.bf16.mxu1 %vm579_vm3, %v3446_v54 }
 0x276   : > { %v3420_v42 = vmax.f32 %v3388_v6, 0.0  ;;  %v3389_v28 = vadd.f32 %v14130_v56, %v3350_v55  ;;  %11485 = vmatmul.mubr.msk.bf16.vlgmr.msra.gmra.mrb[32].mxu1 %vm579_vm3, %v3447_v37 }
 0x277   : > { %v3418_v53 = vmax.f32 %v3386_v32, 0.0  ;;  %v3387_v47 = vadd.f32 %v14130_v56, %v3348_v31  ;;  %11517 = vmatpush3.bf16.msra.mxu1 %v13135_v48  ;;  %v11460_v33 = vpop.f32.mrb[8].mxu0 }
 0x278   : > { %3898 = vst.msk [vmem:[#allocation3 + $0x61] sm:$0xff] %vm579_vm3, %v3420_v42  ;;  %v3421_v61 = vmax.f32 %v3389_v28, 0.0  ;;  %v12240_v39 = vadd.f32 %v11460_v33, %v14000_v63  ;;  %v3209_v1 = vpop.f32.mrb[9].mxu0  ;;  %13097 = vmatprep.subr.msk.bf16.mxu1 %vm3511_vm2, %v14161_v58 }
 0x279   : > { %3896 = vst.msk [vmem:[#allocation3 + $0x49] sm:$0xff] %vm579_vm3, %v3418_v53  ;;  %v3419_v35 = vmax.f32 %v3387_v47, 0.0  ;;  %v12241_v51 = vadd.f32 %v3209_v1, %v14002_v50  ;;  %v11461_v37 = vpop.f32.mrb[10].mxu0 }
 0x27a   : > { %v3449_v44 = vpack.c.bf16 %v3421_v61, %v3420_v42  ;;  %3899 = vst.msk [vmem:[#allocation3 + $0x69] sm:$0xff] %vm579_vm3, %v3421_v61  ;;  %v3353_v48 = vmul.f32 %v12240_v39, %v14124_v59  ;;  %v12242_v40 = vadd.f32 %v11461_v37, %v14004_v2  ;;  %v3212_v54 = vpop.f32.mrb[11].mxu0 }
 0x27b   : > { %v3448_v29 = vpack.c.bf16 %v3419_v35, %v3418_v53  ;;  %3897 = vst.msk [vmem:[#allocation3 + $0x51] sm:$0xff] %vm579_vm3, %v3419_v35  ;;  %v3351_v63 = vmul.f32 %v12241_v51, %v14124_v59  ;;  %v12243_v30 = vadd.f32 %v3212_v54, %v14006_v49 }
 0x27c   : > { %v3392_v6 = vadd.f32 %v14130_v56, %v3353_v48  ;;  %v3354_v50 = vmul.f32 %v12242_v40, %v14124_v59 }
 0x27d   : > { %v3390_v55 = vadd.f32 %v14130_v56, %v3351_v63  ;;  %v3352_v32 = vmul.f32 %v12243_v30, %v14124_v59  ;;  %11488 = vmatprep.mubr.msk.bf16.mxu1 %vm579_vm3, %v3448_v29 }
 0x27e   : > { %v3424_v31 = vmax.f32 %v3392_v6, 0.0  ;;  %v3393_v2 = vadd.f32 %v14130_v56, %v3354_v50  ;;  %11489 = vmatmul.mubr.msk.bf16.gmra.mrb[36].mxu1 %vm579_vm3, %v3449_v44 }
 0x27f   : > { %v3422_v42 = vmax.f32 %v3390_v55, 0.0  ;;  %v3391_v28 = vadd.f32 %v14130_v56, %v3352_v32  ;;  %v11464_v53 = vpop.f32.mrb[12].mxu0 }
 0x280   : > { %3902 = vst.msk [vmem:[#allocation3 + $0x91] sm:$0xff] %vm579_vm3, %v3424_v31  ;;  %v3425_v49 = vmax.f32 %v3393_v2, 0.0  ;;  %v12244_v47 = vadd.f32 %v11464_v53, %v14012_v7  ;;  %v3225_v33 = vpop.f32.mrb[13].mxu0 }
 0x281   : > { %3900 = vst.msk [vmem:[#allocation3 + $0x79] sm:$0xff] %vm579_vm3, %v3422_v42  ;;  %v3423_v61 = vmax.f32 %v3391_v28, 0.0  ;;  %v12245_v39 = vadd.f32 %v3225_v33, %v14014_v46  ;;  %v11465_v1 = vpop.f32.mrb[14].mxu0 }
 0x282   : > { %v3451_v35 = vpack.c.bf16 %v3425_v49, %v3424_v31  ;;  %3903 = vst.msk [vmem:[#allocation3 + $0x99] sm:$0xff] %vm579_vm3, %v3425_v49  ;;  %v3357_v51 = vmul.f32 %v12244_v47, %v14124_v59  ;;  %v12246_v37 = vadd.f32 %v11465_v1, %v14016_v57  ;;  %v3228_v44 = vpop.f32.mrb[15].mxu0 }
 0x283   : > { %v3450_v48 = vpack.c.bf16 %v3423_v61, %v3422_v42  ;;  %3901 = vst.msk [vmem:[#allocation3 + $0x81] sm:$0xff] %vm579_vm3, %v3423_v61  ;;  %v3355_v7 = vmul.f32 %v12245_v39, %v14124_v59  ;;  %v12247_v40 = vadd.f32 %v3228_v44, %v14018_v45 }
 0x284   : > { %v3396_v54 = vadd.f32 %v14130_v56, %v3357_v51  ;;  %v3358_v46 = vmul.f32 %v12246_v37, %v14124_v59 }
 0x285   : > { %v3394_v29 = vadd.f32 %v14130_v56, %v3355_v7  ;;  %v3356_v63 = vmul.f32 %v12247_v40, %v14124_v59  ;;  %11492 = vmatprep.mubr.msk.bf16.mxu1 %vm579_vm3, %v3450_v48 }
 0x286   : > { %v3428_v30 = vmax.f32 %v3396_v54, 0.0  ;;  %v3397_v57 = vadd.f32 %v14130_v56, %v3358_v46  ;;  %11493 = vmatmul.mubr.msk.bf16.gmra.mrb[40].mxu1 %vm579_vm3, %v3451_v35 }
 0x287   : > { %v3426_v6 = vmax.f32 %v3394_v29, 0.0  ;;  %v3395_v50 = vadd.f32 %v14130_v56, %v3356_v63  ;;  %v11468_v55 = vpop.f32.mrb[16].mxu0 }
 0x288   : > { %3906 = vst.msk [vmem:[#allocation3 + $0xc1] sm:$0xff] %vm579_vm3, %v3428_v30  ;;  %v3429_v45 = vmax.f32 %v3397_v57, 0.0  ;;  %v12248_v32 = vadd.f32 %v11468_v55, %v14033_v26  ;;  %v3241_v31 = vpop.f32.mrb[17].mxu0 }
 0x289   : > { %3904 = vst.msk [vmem:[#allocation3 + $0xa9] sm:$0xff] %vm579_vm3, %v3426_v6  ;;  %v3427_v2 = vmax.f32 %v3395_v50, 0.0  ;;  %v12249_v42 = vadd.f32 %v3241_v31, %v14035_v41  ;;  %v11469_v28 = vpop.f32.mrb[18].mxu0 }
 0x28a   : > { %v3453_v53 = vpack.c.bf16 %v3429_v45, %v3428_v30  ;;  %3907 = vst.msk [vmem:[#allocation3 + $0xc9] sm:$0xff] %vm579_vm3, %v3429_v45  ;;  %v3361_v49 = vmul.f32 %v12248_v32, %v14124_v59  ;;  %v12250_v47 = vadd.f32 %v11469_v28, %v14037_v38  ;;  %v3244_v33 = vpop.f32.mrb[19].mxu0 }
 0x28b   : > { %v3452_v61 = vpack.c.bf16 %v3427_v2, %v3426_v6  ;;  %3905 = vst.msk [vmem:[#allocation3 + $0xb1] sm:$0xff] %vm579_vm3, %v3427_v2  ;;  %v3359_v26 = vmul.f32 %v12249_v42, %v14124_v59  ;;  %v12251_v39 = vadd.f32 %v3244_v33, %v14039_v25 }
 0x28c   : > { %v3400_v1 = vadd.f32 %v14130_v56, %v3361_v49  ;;  %v3362_v41 = vmul.f32 %v12250_v47, %v14124_v59 }
 0x28d   : > { %v3398_v35 = vadd.f32 %v14130_v56, %v3359_v26  ;;  %v3360_v51 = vmul.f32 %v12251_v39, %v14124_v59  ;;  %11496 = vmatprep.mubr.msk.bf16.mxu1 %vm579_vm3, %v3452_v61 }
 0x28e   : > { %v3432_v37 = vmax.f32 %v3400_v1, 0.0  ;;  %v3401_v38 = vadd.f32 %v14130_v56, %v3362_v41  ;;  %11497 = vmatmul.mubr.msk.bf16.gmra.mrb[44].mxu1 %vm579_vm3, %v3453_v53 }
 0x28f   : > { %v3430_v44 = vmax.f32 %v3398_v35, 0.0  ;;  %v3399_v48 = vadd.f32 %v14130_v56, %v3360_v51  ;;  %v11472_v7 = vpop.f32.mrb[20].mxu0 }
 0x290   : > { %3910 = vst.msk [vmem:[#allocation3 + $0xf1] sm:$0xff] %vm579_vm3, %v3432_v37  ;;  %v3433_v25 = vmax.f32 %v3401_v38, 0.0  ;;  %v12252_v40 = vadd.f32 %v11472_v7, %v14045_v36  ;;  %v3257_v54 = vpop.f32.mrb[21].mxu0 }
 0x291   : > { %3908 = vst.msk [vmem:[#allocation3 + $0xd9] sm:$0xff] %vm579_vm3, %v3430_v44  ;;  %v3431_v46 = vmax.f32 %v3399_v48, 0.0  ;;  %v12253_v29 = vadd.f32 %v3257_v54, %v14047_v9  ;;  %v11473_v63 = vpop.f32.mrb[22].mxu0 }
 0x292   : > { %v3455_v30 = vpack.c.bf16 %v3433_v25, %v3432_v37  ;;  %3911 = vst.msk [vmem:[#allocation3 + $0xf9] sm:$0xff] %vm579_vm3, %v3433_v25  ;;  %v3365_v57 = vmul.f32 %v12252_v40, %v14124_v59  ;;  %v12254_v6 = vadd.f32 %v11473_v63, %v14049_v24  ;;  %v3260_v50 = vpop.f32.mrb[23].mxu0 }
 0x293   : > { %v3454_v55 = vpack.c.bf16 %v3431_v46, %v3430_v44  ;;  %3909 = vst.msk [vmem:[#allocation3 + $0xe1] sm:$0xff] %vm579_vm3, %v3431_v46  ;;  %v3363_v36 = vmul.f32 %v12253_v29, %v14124_v59  ;;  %v12255_v45 = vadd.f32 %v3260_v50, %v14051_v52 }
 0x294   : > { %v3404_v32 = vadd.f32 %v14130_v56, %v3365_v57  ;;  %v3366_v9 = vmul.f32 %v12254_v6, %v14124_v59 }
 0x295   : > { %v3402_v31 = vadd.f32 %v14130_v56, %v3363_v36  ;;  %v3364_v2 = vmul.f32 %v12255_v45, %v14124_v59  ;;  %11500 = vmatprep.mubr.msk.bf16.mxu1 %vm579_vm3, %v3454_v55 }
 0x296   : > { %v3436_v42 = vmax.f32 %v3404_v32, 0.0  ;;  %v3405_v24 = vadd.f32 %v14130_v56, %v3366_v9  ;;  %11501 = vmatmul.mubr.msk.bf16.gmra.mrb[48].mxu1 %vm579_vm3, %v3455_v30 }
 0x297   : > { %v3434_v28 = vmax.f32 %v3402_v31, 0.0  ;;  %v3403_v53 = vadd.f32 %v14130_v56, %v3364_v2  ;;  %v11476_v49 = vpop.f32.mrb[24].mxu0 }
 0x298   : > { %3914 = vst.msk [vmem:[#allocation3 + $0x121] sm:$0xff] %vm579_vm3, %v3436_v42  ;;  %v3437_v52 = vmax.f32 %v3405_v24, 0.0  ;;  %v12256_v47 = vadd.f32 %v11476_v49, %v14057_v62  ;;  %v3273_v33 = vpop.f32.mrb[25].mxu0 }
 0x299   : > { %3912 = vst.msk [vmem:[#allocation3 + $0x109] sm:$0xff] %vm579_vm3, %v3434_v28  ;;  %v3435_v61 = vmax.f32 %v3403_v53, 0.0  ;;  %v12257_v26 = vadd.f32 %v3273_v33, %v14059_v0  ;;  %v11477_v39 = vpop.f32.mrb[26].mxu0  ;;  %v702_v33 = vpack.c.bf16 %v13397_v11, %v13394_v10 }
 0x29a   : > { %v3457_v1 = vpack.c.bf16 %v3437_v52, %v3436_v42  ;;  %3915 = vst.msk [vmem:[#allocation3 + $0x129] sm:$0xff] %vm579_vm3, %v3437_v52  ;;  %v3369_v41 = vmul.f32 %v12256_v47, %v14124_v59  ;;  %v12258_v35 = vadd.f32 %v11477_v39, %v14061_v27  ;;  %v3276_v51 = vpop.f32.mrb[27].mxu0  ;;  %v700_v47 = vpack.c.bf16 %v13377_v4, %v13374_v3 }
 0x29b   : > { %v3456_v37 = vpack.c.bf16 %v3435_v61, %v3434_v28  ;;  %3913 = vst.msk [vmem:[#allocation3 + $0x111] sm:$0xff] %vm579_vm3, %v3435_v61  ;;  %v3367_v62 = vmul.f32 %v12257_v26, %v14124_v59  ;;  %v12259_v38 = vadd.f32 %v3276_v51, %v14063_v43  ;;  %v4072_v61 = vsel %vm3511_vm2, %v14161_v58, 0  ;;  %v3972_v26 = vld [vmem:[%s15588_s4] sm:$0xf]  ;;  %v15664_v51 = vld [vmem:[#allocation9_spill] sm:$0xff] }
 0x29c   : > { %v3408_v44 = vadd.f32 %v14130_v56, %v3369_v41  ;;  %v3370_v0 = vmul.f32 %v12258_v35, %v14124_v59  ;;  %v703_v39 = vpack.c.bf16 %v13407_v13, %v13400_v12  ;;  %v705_v58 = vpack.c.bf16 %v13428_v17, %v13425_v16 }
 0x29d   : > { %v3406_v48 = vadd.f32 %v14130_v56, %v3367_v62  ;;  %v3368_v7 = vmul.f32 %v12259_v38, %v14124_v59  ;;  %11504 = vmatprep.mubr.msk.bf16.mxu1 %vm579_vm3, %v3456_v37  ;;  %v706_v41 = vpack.c.bf16 %v13438_v19, %v13431_v18  ;;  %v707_v35 = vpack.c.bf16 %v13446_v21, %v13443_v20  ;;  %v15665_v37 = vld [vmem:[#allocation10_spill] sm:$0xff]  ;;  %v15666_v38 = vld [vmem:[#allocation11_spill] sm:$0xff] }
 0x29e   : > { %v3440_v25 = vmax.f32 %v3408_v44, 0.0  ;;  %v3409_v27 = vadd.f32 %v14130_v56, %v3370_v0  ;;  %11505 = vmatmul.mubr.msk.bf16.gmra.mrb[52].mxu1 %vm579_vm3, %v3457_v1  ;;  %v704_v1 = vpack.c.bf16 %v13415_v15, %v13412_v14  ;;  %v708_v62 = vpack.c.bf16 %v15665_v37, %v15664_v51  ;;  %v15667_v44 = vld [vmem:[#allocation12_spill] sm:$0xff] }
 0x29f   : > { %v3438_v40 = vmax.f32 %v3406_v48, 0.0  ;;  %v3407_v54 = vadd.f32 %v14130_v56, %v3368_v7  ;;  %v11480_v46 = vpop.f32.mrb[28].mxu0  ;;  %v709_v0 = vpack.c.bf16 %v15667_v44, %v15666_v38  ;;  %v15668_v48 = vld [vmem:[#allocation13_spill] sm:$0xff]  ;;  %v15669_v7 = vld [vmem:[#allocation14_spill] sm:$0xff] }
 0x2a0   : > { %3918 = vst.msk [vmem:[#allocation3 + $0x151] sm:$0xff] %vm579_vm3, %v3440_v25  ;;  %v3441_v43 = vmax.f32 %v3409_v27, 0.0  ;;  %v12260_v29 = vadd.f32 %v11480_v46, %v14069_v60  ;;  %v3289_v63 = vpop.f32.mrb[29].mxu0  ;;  %v15670_v27 = vld [vmem:[#allocation15_spill] sm:$0xff]  ;;  %v15672_v46 = vld [vmem:[#allocation17_spill] sm:$0xff] }
 0x2a1   : > { %3916 = vst.msk [vmem:[#allocation3 + $0x139] sm:$0xff] %vm579_vm3, %v3438_v40  ;;  %v3439_v30 = vmax.f32 %v3407_v54, 0.0  ;;  %v12261_v57 = vadd.f32 %v3289_v63, %v14071_v22  ;;  %v11481_v6 = vpop.f32.mrb[30].mxu0  ;;  %v15674_v63 = vld [vmem:[#allocation19_spill] sm:$0xff] }
 0x2a2   : > { %v3459_v50 = vpack.c.bf16 %v3441_v43, %v3440_v25  ;;  %3919 = vst.msk [vmem:[#allocation3 + $0x159] sm:$0xff] %vm579_vm3, %v3441_v43  ;;  %v3373_v55 = vmul.f32 %v12260_v29, %v14124_v59  ;;  %v12262_v36 = vadd.f32 %v11481_v6, %v14073_v23  ;;  %v3292_v45 = vpop.f32.mrb[31].mxu0  ;;  %v710_v25 = vpack.c.bf16 %v15669_v7, %v15668_v48  ;;  %v15673_v43 = vld [vmem:[#allocation18_spill] sm:$0xff]  ;;  %v15676_v6 = vld [vmem:[#allocation21_spill] sm:$0xff] }
 0x2a3   : > { %v3458_v32 = vpack.c.bf16 %v3439_v30, %v3438_v40  ;;  %3917 = vst.msk [vmem:[#allocation3 + $0x141] sm:$0xff] %vm579_vm3, %v3439_v30  ;;  %v3371_v60 = vmul.f32 %v12261_v57, %v14124_v59  ;;  %v12263_v9 = vadd.f32 %v3292_v45, %v14075_v34  ;;  %v15671_v40 = vld [vmem:[#allocation16_spill] sm:$0xff]  ;;  %v712_v29 = vpack.c.bf16 %v15673_v43, %v15672_v46 }
 0x2a4   : > { %v3412_v31 = vadd.f32 %v14130_v56, %v3373_v55  ;;  %v3374_v22 = vmul.f32 %v12262_v36, %v14124_v59  ;;  %v711_v54 = vpack.c.bf16 %v15671_v40, %v15670_v27  ;;  %v15675_v30 = vld [vmem:[#allocation20_spill] sm:$0xff]  ;;  %v3973_v36 = vld [vmem:[#allocation3 + $0x1] sm:$0xff] }
 0x2a5   : > { %v3410_v2 = vadd.f32 %v14130_v56, %v3371_v60  ;;  %v3372_v42 = vmul.f32 %v12263_v9, %v14124_v59  ;;  %11508 = vmatprep.mubr.msk.bf16.mxu1 %vm579_vm3, %v3458_v32  ;;  %v713_v57 = vpack.c.bf16 %v15675_v30, %v15674_v63  ;;  %v3974_v45 = vld [vmem:[#allocation3 + $0x9] sm:$0xff] }
 0x2a6   : > { %v3444_v24 = vmax.f32 %v3412_v31, 0.0  ;;  %v3413_v23 = vadd.f32 %v14130_v56, %v3374_v22  ;;  %11509 = vmatmul.mubr.msk.bf16.gmra.mrb[56].mxu1 %vm579_vm3, %v3459_v50  ;;  %v15677_v50 = vld [vmem:[#allocation22_spill] sm:$0xff]  ;;  %v15678_v32 = vld [vmem:[#allocation23_spill] sm:$0xff]  ;;  %v15679_v60 = vld [vmem:[#allocation24_spill] sm:$0xff]  ;;  %v4005_v31 = vpack.c.bf16 %v3974_v45, %v3973_v36 }
 0x2a7   : > { %v3442_v28 = vmax.f32 %v3410_v2, 0.0  ;;  %v3411_v53 = vadd.f32 %v14130_v56, %v3372_v42  ;;  %v701_v56 = vpack.c.bf16 %v13387_v8, %v13380_v5  ;;  %v714_v55 = vpack.c.bf16 %v15677_v50, %v15676_v6  ;;  %v3976_v22 = vld [vmem:[#allocation3 + $0x21] sm:$0xff]  ;;  %v3978_v2 = vld [vmem:[#allocation3 + $0x39] sm:$0xff]  ;;  %v3944_v50 = vld [vmem:[#allocation3 + $0xf0] sm:$0xff] }
 0x2a8   : > { %3922 = vst.msk [vmem:[#allocation3 + $0x181] sm:$0xff] %vm579_vm3, %v3444_v24  ;;  %v3445_v34 = vmax.f32 %v3413_v23, 0.0  ;;  %v715_v9 = vpack.c.bf16 %v15679_v60, %v15678_v32  ;;  %v3975_v42 = vld [vmem:[#allocation3 + $0x19] sm:$0xff]  ;;  %v4284_v23 = vsel %vm3511_vm2, %v3972_v26, 0  ;;  %v3952_v43 = vld [vmem:[#allocation3 + $0x150] sm:$0xff] }
 0x2a9   : > { %3920 = vst.msk [vmem:[#allocation3 + $0x169] sm:$0xff] %vm579_vm3, %v3442_v28  ;;  %v3443_v49 = vmax.f32 %v3411_v53, 0.0  ;;  %v3991_v36 = vld [vmem:[#allocation3 + $0xd9] sm:$0xff] }
 0x2aa   : > { %v3461_v52 = vpack.c.bf16 %v3445_v34, %v3444_v24  ;;  %3923 = vst.msk [vmem:[#allocation3 + $0x189] sm:$0xff] %vm579_vm3, %v3445_v34  ;;  %v14337_v24 = vpack.c.bf16 %v3976_v22, %v3975_v42  ;;  %v14345_v34 = vld [vmem:[%s15588_s4 + $0x8] sm:$0xf]  ;;  %v3995_v42 = vld [vmem:[#allocation3 + $0x109] sm:$0xff]  ;;  %v3948_v6 = vld [vmem:[#allocation3 + $0x120] sm:$0xff] }
 0x2ab   : > { %v3460_v59 = vpack.c.bf16 %v3443_v49, %v3442_v28  ;;  %3921 = vst.msk [vmem:[#allocation3 + $0x171] sm:$0xff] %vm579_vm3, %v3443_v49  ;;  %v3977_v28 = vld [vmem:[#allocation3 + $0x31] sm:$0xff] }
 0x2ac   : > { %v14340_v53 = vpack.c.bf16 %v3978_v2, %v3977_v28  ;;  %v3980_v49 = vld [vmem:[#allocation3 + $0x51] sm:$0xff]  ;;  %v3998_v2 = vld [vmem:[#allocation3 + $0x129] sm:$0xff]  ;;  %v3997_v28 = vld [vmem:[#allocation3 + $0x121] sm:$0xff] }
 0x2ad   : > { %11512 = vmatprep.mubr.msk.bf16.mxu1 %vm579_vm3, %v3460_v59  ;;  %v3979_v59 = vld [vmem:[#allocation3 + $0x49] sm:$0xff]  ;;  %v3996_v22 = vld [vmem:[#allocation3 + $0x111] sm:$0xff] }
 0x2ae   : > { %11513 = vmatmul.mubr.msk.bf16.gmra.mrb[60].mxu1 %vm579_vm3, %v3461_v52  ;;  %v3982_v52 = vld [vmem:[#allocation3 + $0x69] sm:$0xff] }
 0x2af   : > { %11518 = vmatprep.mubr.msk.bf16.mxu1 %vm523_vm0, %v700_v47  ;;  %v14353_v47 = vpack.c.bf16 %v3980_v49, %v3979_v59  ;;  %v14387_v49 = vpack.c.bf16 %v3998_v2, %v3997_v28  ;;  %v4002_v59 = vld [vmem:[#allocation3 + $0x159] sm:$0xff]  ;;  %v4546_v2 = vsel %vm3511_vm2, %v14345_v34, 0 }
 0x2b6   : > { %11519 = vmatmul.mubr.msk.bf16.vlgmr.msra.gmra.mrb[32].mxu1 %vm523_vm0, %v701_v56  ;;  %v3981_v56 = vld [vmem:[#allocation3 + $0x61] sm:$0xff] }
 0x2b7   : > { %11551 = vmatpush3.bf16.msra.mxu1 %v4072_v61  ;;  %11522 = vmatprep.mubr.msk.bf16.mxu1 %vm523_vm0, %v702_v33  ;;  %v14355_v33 = vpack.c.bf16 %v3982_v52, %v3981_v56  ;;  %v3984_v61 = vld [vmem:[#allocation3 + $0x81] sm:$0xff]  ;;  %v3999_v56 = vld [vmem:[#allocation3 + $0x139] sm:$0xff] }
 0x2b8   : > { %13098 = vmatprep.subr.msk.bf16.mxu1 %vm3511_vm2, %v3972_v26  ;;  %v3986_v26 = vld [vmem:[#allocation3 + $0x99] sm:$0xff]  ;;  %v4000_v52 = vld [vmem:[#allocation3 + $0x141] sm:$0xff] }
 0x2be   : > { %11523 = vmatmul.mubr.msk.bf16.gmra.mrb[36].mxu1 %vm523_vm0, %v703_v39  ;;  %v3983_v39 = vld [vmem:[#allocation3 + $0x79] sm:$0xff] }
 0x2bf   : > { %11526 = vmatprep.mubr.msk.bf16.mxu1 %vm523_vm0, %v704_v1  ;;  %v14361_v1 = vpack.c.bf16 %v3984_v61, %v3983_v39  ;;  %v14393_v61 = vpack.c.bf16 %v4000_v52, %v3999_v56  ;;  %v14415_v52 = vld [vmem:[%s15588_s4 + $0xc] sm:$0xf]  ;;  %v3930_v56 = vld [vmem:[#allocation3 + $0x48] sm:$0xff] }
 0x2c0   : > { %v4840_v40 = vsel %vm3511_vm2, %v14415_v52, 0 }
 0x2c6   : > { %11527 = vmatmul.mubr.msk.bf16.gmra.mrb[40].mxu1 %vm523_vm0, %v705_v58  ;;  %v3985_v58 = vld [vmem:[#allocation3 + $0x91] sm:$0xff] }
 0x2c7   : > { %11530 = vmatprep.mubr.msk.bf16.mxu1 %vm523_vm0, %v706_v41  ;;  %v14363_v41 = vpack.c.bf16 %v3986_v26, %v3985_v58  ;;  %v4001_v26 = vld [vmem:[#allocation3 + $0x151] sm:$0xff]  ;;  %v3924_v58 = vld [vmem:[#allocation3] sm:$0xff] }
 0x2c8   : > { %v14395_v39 = vpack.c.bf16 %v4002_v59, %v4001_v26  ;;  %v3931_v59 = vld [vmem:[#allocation3 + $0x50] sm:$0xff] }
 0x2c9   : > { %v14423_v26 = vpack.c.bf16 %v3931_v59, %v3930_v56  ;;  %v3938_v59 = vld [vmem:[#allocation3 + $0xa8] sm:$0xff]  ;;  %v3940_v56 = vld [vmem:[#allocation3 + $0xc0] sm:$0xff] }
 0x2ce   : > { %11531 = vmatmul.mubr.msk.bf16.gmra.mrb[44].mxu1 %vm523_vm0, %v707_v35  ;;  %v3988_v35 = vld [vmem:[#allocation3 + $0xb1] sm:$0xff] }
 0x2cf   : > { %11534 = vmatprep.mubr.msk.bf16.mxu1 %vm523_vm0, %v708_v62  ;;  %v3990_v62 = vld [vmem:[#allocation3 + $0xc9] sm:$0xff] }
 0x2d6   : > { %11535 = vmatmul.mubr.msk.bf16.gmra.mrb[48].mxu1 %vm523_vm0, %v709_v0  ;;  %v3987_v0 = vld [vmem:[#allocation3 + $0xa9] sm:$0xff] }
 0x2d7   : > { %11538 = vmatprep.mubr.msk.bf16.mxu1 %vm523_vm0, %v710_v25  ;;  %v14369_v25 = vpack.c.bf16 %v3988_v35, %v3987_v0  ;;  %v3925_v35 = vld [vmem:[#allocation3 + $0x8] sm:$0xff] }
 0x2d8   : > { %v4003_v0 = vld [vmem:[#allocation3 + $0x169] sm:$0xff] }
 0x2de   : > { %11539 = vmatmul.mubr.msk.bf16.gmra.mrb[52].mxu1 %vm523_vm0, %v711_v54  ;;  %v3989_v54 = vld [vmem:[#allocation3 + $0xc1] sm:$0xff] }
 0x2df   : > { %11542 = vmatprep.mubr.msk.bf16.mxu1 %vm523_vm0, %v712_v29  ;;  %v14371_v29 = vpack.c.bf16 %v3990_v62, %v3989_v54  ;;  %v4004_v62 = vld [vmem:[#allocation3 + $0x171] sm:$0xff]  ;;  %v3956_v54 = vpack.c.bf16 %v3925_v35, %v3924_v58  ;;  %v3932_v58 = vld [vmem:[#allocation3 + $0x60] sm:$0xff] }
 0x2e6   : > { %11543 = vmatmul.mubr.msk.bf16.gmra.mrb[56].mxu1 %vm523_vm0, %v713_v57  ;;  %v3992_v57 = vld [vmem:[#allocation3 + $0xe1] sm:$0xff] }
 0x2e7   : > { %11546 = vmatprep.mubr.msk.bf16.mxu1 %vm523_vm0, %v714_v55  ;;  %v3994_v55 = vld [vmem:[#allocation3 + $0xf9] sm:$0xff]  ;;  %v14377_v45 = vpack.c.bf16 %v3992_v57, %v3991_v36  ;;  %v14401_v57 = vpack.c.bf16 %v4004_v62, %v4003_v0 }
 0x2e8   : > { %v3929_v36 = vld [vmem:[#allocation3 + $0x38] sm:$0xff]  ;;  %v3935_v62 = vld [vmem:[#allocation3 + $0x80] sm:$0xff] }
 0x2e9   : > { %v3937_v0 = vld [vmem:[#allocation3 + $0x98] sm:$0xff] }
 0x2ee   : > { %11547 = vmatmul.mubr.msk.bf16.gmra.mrb[60].mxu1 %vm523_vm0, %v715_v9  ;;  %v3993_v9 = vld [vmem:[#allocation3 + $0xf1] sm:$0xff] }
 0x2ef   : > { %11552 = vmatprep.mubr.msk.bf16.mxu1 %vm579_vm3, %v4005_v31  ;;  %v14379_v31 = vpack.c.bf16 %v3994_v55, %v3993_v9  ;;  %v3927_v55 = vld [vmem:[#allocation3 + $0x20] sm:$0xff]  ;;  %v3926_v9 = vld [vmem:[#allocation3 + $0x18] sm:$0xff] }
 0x2f6   : > { %11553 = vmatmul.mubr.msk.bf16.vlgmr.msra.gmra.mrb[64].mxu1 %vm579_vm3, %v14337_v24 }
 0x2f7   : > { %11585 = vmatpush3.bf16.msra.mxu1 %v4284_v23  ;;  %11556 = vmatprep.mubr.msk.bf16.mxu1 %vm579_vm3, %v14340_v53  ;;  %v14385_v23 = vpack.c.bf16 %v3996_v22, %v3995_v42  ;;  %v14406_v22 = vpack.c.bf16 %v3927_v55, %v3926_v9  ;;  %v3928_v42 = vld [vmem:[#allocation3 + $0x30] sm:$0xff] }
 0x2f8   : > { %13099 = vmatprep.subr.msk.bf16.mxu1 %vm3511_vm2, %v14345_v34  ;;  %v14410_v28 = vpack.c.bf16 %v3929_v36, %v3928_v42  ;;  %v3933_v34 = vld [vmem:[#allocation3 + $0x68] sm:$0xff]  ;;  %v3936_v36 = vld [vmem:[#allocation3 + $0x90] sm:$0xff] }
 0x2f9   : > { %v14425_v35 = vpack.c.bf16 %v3933_v34, %v3932_v58  ;;  %v14433_v9 = vpack.c.bf16 %v3937_v0, %v3936_v36  ;;  %v3941_v42 = vld [vmem:[#allocation3 + $0xc8] sm:$0xff]  ;;  %v3945_v0 = vld [vmem:[#allocation3 + $0xf8] sm:$0xff] }
 0x2fa   : > { %v14441_v58 = vpack.c.bf16 %v3941_v42, %v3940_v56  ;;  %v14449_v60 = vpack.c.bf16 %v3945_v0, %v3944_v50  ;;  %v3949_v42 = vld [vmem:[#allocation3 + $0x128] sm:$0xff]  ;;  %v3951_v50 = vld [vmem:[#allocation3 + $0x140] sm:$0xff]  ;;  %v3950_v0 = vld [vmem:[#allocation3 + $0x138] sm:$0xff] }
 0x2fb   : > { %v14457_v32 = vpack.c.bf16 %v3949_v42, %v3948_v6  ;;  %v4447_v6 = vld [vmem:[#allocation3 + $0x2] sm:$0xff]  ;;  %v3955_v42 = vld [vmem:[#allocation3 + $0x170] sm:$0xff] }
 0x2fe   : > { %11557 = vmatmul.mubr.msk.bf16.gmra.mrb[68].mxu1 %vm579_vm3, %v14353_v47 }
 0x2ff   : > { %11560 = vmatprep.mubr.msk.bf16.mxu1 %vm579_vm3, %v14355_v33 }
 0x306   : > { %11561 = vmatmul.mubr.msk.bf16.gmra.mrb[72].mxu1 %vm579_vm3, %v14361_v1 }
 0x307   : > { %11564 = vmatprep.mubr.msk.bf16.mxu1 %vm579_vm3, %v14363_v41 }
 0x30e   : > { %11565 = vmatmul.mubr.msk.bf16.gmra.mrb[76].mxu1 %vm579_vm3, %v14369_v25 }
 0x30f   : > { %11568 = vmatprep.mubr.msk.bf16.mxu1 %vm579_vm3, %v14371_v29 }
 0x316   : > { %11569 = vmatmul.mubr.msk.bf16.gmra.mrb[80].mxu1 %vm579_vm3, %v14377_v45 }
 0x317   : > { %11572 = vmatprep.mubr.msk.bf16.mxu1 %vm579_vm3, %v14379_v31 }
 0x31e   : > { %11573 = vmatmul.mubr.msk.bf16.gmra.mrb[84].mxu1 %vm579_vm3, %v14385_v23 }
 0x31f   : > { %11576 = vmatprep.mubr.msk.bf16.mxu1 %vm579_vm3, %v14387_v49 }
 0x326   : > { %11577 = vmatmul.mubr.msk.bf16.gmra.mrb[88].mxu1 %vm579_vm3, %v14393_v61 }
 0x327   : > { %11580 = vmatprep.mubr.msk.bf16.mxu1 %vm579_vm3, %v14395_v39 }
 0x32e   : > { %11581 = vmatmul.mubr.msk.bf16.gmra.mrb[92].mxu1 %vm579_vm3, %v14401_v57 }
 0x32f   : > { %11586 = vmatprep.mubr.msk.bf16.mxu1 %vm579_vm3, %v3956_v54  ;;  %v3934_v54 = vld [vmem:[#allocation3 + $0x78] sm:$0xff] }
 0x330   : > { %v14431_v55 = vpack.c.bf16 %v3935_v62, %v3934_v54  ;;  %v3943_v62 = vld [vmem:[#allocation3 + $0xe0] sm:$0xff]  ;;  %v3942_v54 = vld [vmem:[#allocation3 + $0xd8] sm:$0xff] }
 0x331   : > { %v14447_v36 = vpack.c.bf16 %v3943_v62, %v3942_v54  ;;  %v3953_v62 = vld [vmem:[#allocation3 + $0x158] sm:$0xff]  ;;  %v14463_v54 = vpack.c.bf16 %v3951_v50, %v3950_v0  ;;  %v4450_v50 = vld [vmem:[#allocation3 + $0x22] sm:$0xff] }
 0x332   : > { %v14465_v30 = vpack.c.bf16 %v3953_v62, %v3952_v43  ;;  %v4449_v43 = vld [vmem:[#allocation3 + $0x1a] sm:$0xff]  ;;  %v4451_v62 = vld [vmem:[#allocation3 + $0x32] sm:$0xff] }
 0x333   : > { %v4452_v0 = vld [vmem:[#allocation3 + $0x3a] sm:$0xff]  ;;  %v14476_v7 = vpack.c.bf16 %v4450_v50, %v4449_v43  ;;  %v4458_v50 = vld [vmem:[#allocation3 + $0x82] sm:$0xff] }
 0x334   : > { %v14480_v48 = vpack.c.bf16 %v4452_v0, %v4451_v62  ;;  %v4459_v62 = vld [vmem:[#allocation3 + $0x92] sm:$0xff]  ;;  %v4460_v0 = vld [vmem:[#allocation3 + $0x9a] sm:$0xff] }
 0x335   : > { %v14500_v37 = vpack.c.bf16 %v4460_v0, %v4459_v62  ;;  %v4467_v62 = vld [vmem:[#allocation3 + $0xf2] sm:$0xff]  ;;  %v4468_v0 = vld [vmem:[#allocation3 + $0xfa] sm:$0xff] }
 0x336   : > { %11587 = vmatmul.mubr.msk.bf16.vlgmr.msra.gmra.mrb[64].mxu1 %vm579_vm3, %v14406_v22  ;;  %v14516_v19 = vpack.c.bf16 %v4468_v0, %v4467_v62  ;;  %v4475_v62 = vld [vmem:[#allocation3 + $0x152] sm:$0xff]  ;;  %v4476_v0 = vld [vmem:[#allocation3 + $0x15a] sm:$0xff] }
 0x337   : > { %11619 = vmatpush3.bf16.msra.mxu1 %v4546_v2  ;;  %11590 = vmatprep.mubr.msk.bf16.mxu1 %vm579_vm3, %v14410_v28  ;;  %v3939_v2 = vld [vmem:[#allocation3 + $0xb0] sm:$0xff]  ;;  %v14532_v15 = vpack.c.bf16 %v4476_v0, %v4475_v62  ;;  %v10404_v0 = vld [vmem:[%s15588_s4 + $0x18] sm:$0xf] }
 0x338   : > { %13100 = vmatprep.subr.msk.bf16.mxu1 %vm3511_vm2, %v14415_v52  ;;  %v14439_v34 = vpack.c.bf16 %v3939_v2, %v3938_v59  ;;  %v3947_v2 = vld [vmem:[#allocation3 + $0x110] sm:$0xff]  ;;  %v3946_v59 = vld [vmem:[#allocation3 + $0x108] sm:$0xff] }
 0x339   : > { %v14455_v56 = vpack.c.bf16 %v3947_v2, %v3946_v59  ;;  %v4448_v2 = vld [vmem:[#allocation3 + $0xa] sm:$0xff] }
 0x33a   : > { %v3954_v59 = vld [vmem:[#allocation3 + $0x168] sm:$0xff]  ;;  %v4479_v46 = vpack.c.bf16 %v4448_v2, %v4447_v6  ;;  %v10370_v6 = vld [vmem:[%s15588_s4 + $0x10] sm:$0xf]  ;;  %v4454_v2 = vld [vmem:[#allocation3 + $0x52] sm:$0xff] }
 0x33b   : > { %v14471_v63 = vpack.c.bf16 %v3955_v42, %v3954_v59  ;;  %v4455_v42 = vld [vmem:[#allocation3 + $0x62] sm:$0xff]  ;;  %v4456_v59 = vld [vmem:[#allocation3 + $0x6a] sm:$0xff] }
 0x33c   : > { %v14492_v43 = vpack.c.bf16 %v4456_v59, %v4455_v42  ;;  %v4463_v42 = vld [vmem:[#allocation3 + $0xc2] sm:$0xff]  ;;  %v4464_v59 = vld [vmem:[#allocation3 + $0xca] sm:$0xff] }
 0x33d   : > { %v14508_v51 = vpack.c.bf16 %v4464_v59, %v4463_v42  ;;  %v4471_v42 = vld [vmem:[#allocation3 + $0x122] sm:$0xff]  ;;  %v4472_v59 = vld [vmem:[#allocation3 + $0x12a] sm:$0xff] }
 0x33e   : > { %11591 = vmatmul.mubr.msk.bf16.gmra.mrb[68].mxu1 %vm579_vm3, %v14423_v26  ;;  %v14524_v18 = vpack.c.bf16 %v4472_v59, %v4471_v42  ;;  %v5134_v59 = vsel %vm3511_vm2, %v10370_v6, 0 }
 0x33f   : > { %11594 = vmatprep.mubr.msk.bf16.mxu1 %vm579_vm3, %v14425_v35 }
 0x346   : > { %11595 = vmatmul.mubr.msk.bf16.gmra.mrb[72].mxu1 %vm579_vm3, %v14431_v55 }
 0x347   : > { %11598 = vmatprep.mubr.msk.bf16.mxu1 %vm579_vm3, %v14433_v9 }
 0x34e   : > { %11599 = vmatmul.mubr.msk.bf16.gmra.mrb[76].mxu1 %vm579_vm3, %v14439_v34 }
 0x34f   : > { %11602 = vmatprep.mubr.msk.bf16.mxu1 %vm579_vm3, %v14441_v58 }
 0x356   : > { %11603 = vmatmul.mubr.msk.bf16.gmra.mrb[80].mxu1 %vm579_vm3, %v14447_v36 }
 0x357   : > { %11606 = vmatprep.mubr.msk.bf16.mxu1 %vm579_vm3, %v14449_v60 }
 0x35e   : > { %11607 = vmatmul.mubr.msk.bf16.gmra.mrb[84].mxu1 %vm579_vm3, %v14455_v56 }
 0x35f   : > { %11610 = vmatprep.mubr.msk.bf16.mxu1 %vm579_vm3, %v14457_v32 }
 0x366   : > { %11611 = vmatmul.mubr.msk.bf16.gmra.mrb[88].mxu1 %vm579_vm3, %v14463_v54 }
 0x367   : > { %11614 = vmatprep.mubr.msk.bf16.mxu1 %vm579_vm3, %v14465_v30 }
 0x36e   : > { %11615 = vmatmul.mubr.msk.bf16.gmra.mrb[92].mxu1 %vm579_vm3, %v14471_v63 }
 0x36f   : > { %11620 = vmatprep.mubr.msk.bf16.mxu1 %vm579_vm3, %v4479_v46  ;;  %v4453_v46 = vld [vmem:[#allocation3 + $0x4a] sm:$0xff] }
 0x370   : > { %v14490_v52 = vpack.c.bf16 %v4454_v2, %v4453_v46  ;;  %v4461_v46 = vld [vmem:[#allocation3 + $0xaa] sm:$0xff]  ;;  %v4462_v2 = vld [vmem:[#allocation3 + $0xb2] sm:$0xff] }
 0x371   : > { %v14506_v44 = vpack.c.bf16 %v4462_v2, %v4461_v46  ;;  %v4469_v46 = vld [vmem:[#allocation3 + $0x10a] sm:$0xff]  ;;  %v4470_v2 = vld [vmem:[#allocation3 + $0x112] sm:$0xff] }
 0x372   : > { %v14522_v21 = vpack.c.bf16 %v4470_v2, %v4469_v46  ;;  %v4477_v46 = vld [vmem:[#allocation3 + $0x16a] sm:$0xff]  ;;  %v4478_v2 = vld [vmem:[#allocation3 + $0x172] sm:$0xff] }
 0x373   : > { %v14538_v42 = vpack.c.bf16 %v4478_v2, %v4477_v46  ;;  %v5065_v46 = vld [vmem:[#allocation3 + $0x181] sm:$0xff] }
 0x376   : > { %11621 = vmatmul.mubr.msk.bf16.vlgmr.msra.gmra.mrb[64].mxu1 %vm579_vm3, %v14476_v7 }
 0x377   : > { %11653 = vmatpush3.bf16.msra.mxu1 %v4840_v40  ;;  %11624 = vmatprep.mubr.msk.bf16.mxu1 %vm579_vm3, %v14480_v48  ;;  %v4457_v40 = vld [vmem:[#allocation3 + $0x7a] sm:$0xff] }
 0x378   : > { %13101 = vmatprep.subr.msk.bf16.mxu1 %vm3511_vm2, %v10370_v6  ;;  %v14498_v27 = vpack.c.bf16 %v4458_v50, %v4457_v40  ;;  %v4465_v40 = vld [vmem:[#allocation3 + $0xda] sm:$0xff]  ;;  %v4466_v50 = vld [vmem:[#allocation3 + $0xe2] sm:$0xff] }
 0x379   : > { %v14514_v38 = vpack.c.bf16 %v4466_v50, %v4465_v40  ;;  %v4473_v40 = vld [vmem:[#allocation3 + $0x13a] sm:$0xff]  ;;  %v4474_v50 = vld [vmem:[#allocation3 + $0x142] sm:$0xff] }
 0x37a   : > { %v14530_v20 = vpack.c.bf16 %v4474_v50, %v4473_v40  ;;  %v10387_v40 = vld [vmem:[%s15588_s4 + $0x14] sm:$0xf] }
 0x37b   : > { %v4771_v6 = vld [vmem:[#allocation3 + $0x180] sm:$0xff]  ;;  %v5428_v62 = vsel %vm3511_vm2, %v10387_v40, 0 }
 0x37e   : > { %11625 = vmatmul.mubr.msk.bf16.gmra.mrb[68].mxu1 %vm579_vm3, %v14490_v52 }
 0x37f   : > { %11628 = vmatprep.mubr.msk.bf16.mxu1 %vm579_vm3, %v14492_v43 }
 0x386   : > { %11629 = vmatmul.mubr.msk.bf16.gmra.mrb[72].mxu1 %vm579_vm3, %v14498_v27 }
 0x387   : > { %11632 = vmatprep.mubr.msk.bf16.mxu1 %vm579_vm3, %v14500_v37 }
 0x38e   : > { %11633 = vmatmul.mubr.msk.bf16.gmra.mrb[76].mxu1 %vm579_vm3, %v14506_v44 }
 0x38f   : > { %11636 = vmatprep.mubr.msk.bf16.mxu1 %vm579_vm3, %v14508_v51 }
 0x396   : > { %11637 = vmatmul.mubr.msk.bf16.gmra.mrb[80].mxu1 %vm579_vm3, %v14514_v38 }
 0x397   : > { %11640 = vmatprep.mubr.msk.bf16.mxu1 %vm579_vm3, %v14516_v19 }
 0x39e   : > { %11641 = vmatmul.mubr.msk.bf16.gmra.mrb[84].mxu1 %vm579_vm3, %v14522_v21 }
 0x39f   : > { %11644 = vmatprep.mubr.msk.bf16.mxu1 %vm579_vm3, %v14524_v18 }
 0x3a6   : > { %11645 = vmatmul.mubr.msk.bf16.gmra.mrb[88].mxu1 %vm579_vm3, %v14530_v20 }
 0x3a7   : > { %11648 = vmatprep.mubr.msk.bf16.mxu1 %vm579_vm3, %v14532_v15 }
 0x3ae   : > { %11649 = vmatmul.mubr.msk.bf16.gmra.mrb[92].mxu1 %vm579_vm3, %v14538_v42 }
 0x3af   : > { %11654 = vmatprep.mubr.msk.bf16.mxu1 %vm579_vm3, %v14406_v22  ;;  %v4772_v22 = vld [vmem:[#allocation3 + $0x188] sm:$0xff] }
 0x3b0   : > { %v14577_v50 = vpack.c.bf16 %v4772_v22, %v4771_v6  ;;  %v5360_v22 = vld [vmem:[#allocation3 + $0x18a] sm:$0xff] }
 0x3b6   : > { %11655 = vmatmul.mubr.msk.bf16.vlgmr.msra.gmra.mrb[64].mxu1 %vm579_vm3, %v14410_v28 }
 0x3b7   : > { %11687 = vmatpush3.bf16.msra.mxu1 %v5134_v59  ;;  %11658 = vmatprep.mubr.msk.bf16.mxu1 %vm579_vm3, %v14423_v26  ;;  %v5723_v59 = vsel %vm3511_vm2, %v10404_v0, 0 }
 0x3b8   : > { %13102 = vmatprep.subr.msk.bf16.mxu1 %vm3511_vm2, %v10387_v40  ;;  %v10421_v40 = vld [vmem:[%s15588_s4 + $0x1c] sm:$0xf] }
 0x3be   : > { %11659 = vmatmul.mubr.msk.bf16.gmra.mrb[68].mxu1 %vm579_vm3, %v14425_v35 }
 0x3bf   : > { %11662 = vmatprep.mubr.msk.bf16.mxu1 %vm579_vm3, %v14431_v55 }
 0x3c6   : > { %11663 = vmatmul.mubr.msk.bf16.gmra.mrb[72].mxu1 %vm579_vm3, %v14433_v9 }
 0x3c7   : > { %11666 = vmatprep.mubr.msk.bf16.mxu1 %vm579_vm3, %v14439_v34 }
 0x3ce   : > { %11667 = vmatmul.mubr.msk.bf16.gmra.mrb[76].mxu1 %vm579_vm3, %v14441_v58 }
 0x3cf   : > { %11670 = vmatprep.mubr.msk.bf16.mxu1 %vm579_vm3, %v14447_v36 }
 0x3d6   : > { %11671 = vmatmul.mubr.msk.bf16.gmra.mrb[80].mxu1 %vm579_vm3, %v14449_v60 }
 0x3d7   : > { %11674 = vmatprep.mubr.msk.bf16.mxu1 %vm579_vm3, %v14455_v56 }
 0x3de   : > { %11675 = vmatmul.mubr.msk.bf16.gmra.mrb[84].mxu1 %vm579_vm3, %v14457_v32 }
 0x3df   : > { %11678 = vmatprep.mubr.msk.bf16.mxu1 %vm579_vm3, %v14463_v54 }
 0x3e6   : > { %11679 = vmatmul.mubr.msk.bf16.gmra.mrb[88].mxu1 %vm579_vm3, %v14465_v30 }
 0x3e7   : > { %11682 = vmatprep.mubr.msk.bf16.mxu1 %vm579_vm3, %v14471_v63 }
 0x3ee   : > { %11683 = vmatmul.mubr.msk.bf16.gmra.mrb[92].mxu1 %vm579_vm3, %v14577_v50 }
 0x3ef   : > { %11688 = vmatprep.mubr.msk.bf16.mxu1 %vm579_vm3, %v14337_v24  ;;  %v5066_v24 = vld [vmem:[#allocation3 + $0x189] sm:$0xff] }
 0x3f0   : > { %v14616_v2 = vpack.c.bf16 %v5066_v24, %v5065_v46 }
 0x3f6   : > { %11689 = vmatmul.mubr.msk.bf16.vlgmr.msra.gmra.mrb[64].mxu1 %vm579_vm3, %v14340_v53 }
 0x3f7   : > { %11721 = vmatpush3.bf16.msra.mxu1 %v5428_v62  ;;  %11692 = vmatprep.mubr.msk.bf16.mxu1 %vm579_vm3, %v14353_v47  ;;  %v6017_v62 = vsel %vm3511_vm2, %v10421_v40, 0 }
 0x3f8   : > { %13103 = vmatprep.subr.msk.bf16.mxu1 %vm3511_vm2, %v10404_v0  ;;  %v10438_v0 = vld [vmem:[%s15588_s4 + $0x20] sm:$0xf] }
 0x3fe   : > { %11693 = vmatmul.mubr.msk.bf16.gmra.mrb[68].mxu1 %vm579_vm3, %v14355_v33 }
 0x3ff   : > { %11696 = vmatprep.mubr.msk.bf16.mxu1 %vm579_vm3, %v14361_v1 }
 0x406   : > { %11697 = vmatmul.mubr.msk.bf16.gmra.mrb[72].mxu1 %vm579_vm3, %v14363_v41 }
 0x407   : > { %11700 = vmatprep.mubr.msk.bf16.mxu1 %vm579_vm3, %v14369_v25 }
 0x40e   : > { %11701 = vmatmul.mubr.msk.bf16.gmra.mrb[76].mxu1 %vm579_vm3, %v14371_v29 }
 0x40f   : > { %11704 = vmatprep.mubr.msk.bf16.mxu1 %vm579_vm3, %v14377_v45 }
 0x416   : > { %11705 = vmatmul.mubr.msk.bf16.gmra.mrb[80].mxu1 %vm579_vm3, %v14379_v31 }
 0x417   : > { %11708 = vmatprep.mubr.msk.bf16.mxu1 %vm579_vm3, %v14385_v23 }
 0x41e   : > { %11709 = vmatmul.mubr.msk.bf16.gmra.mrb[84].mxu1 %vm579_vm3, %v14387_v49 }
 0x41f   : > { %11712 = vmatprep.mubr.msk.bf16.mxu1 %vm579_vm3, %v14393_v61 }
 0x426   : > { %11713 = vmatmul.mubr.msk.bf16.gmra.mrb[88].mxu1 %vm579_vm3, %v14395_v39 }
 0x427   : > { %11716 = vmatprep.mubr.msk.bf16.mxu1 %vm579_vm3, %v14401_v57 }
 0x42e   : > { %11717 = vmatmul.mubr.msk.bf16.gmra.mrb[92].mxu1 %vm579_vm3, %v14616_v2 }
 0x42f   : > { %11722 = vmatprep.mubr.msk.bf16.mxu1 %vm579_vm3, %v14476_v7  ;;  %v5359_v7 = vld [vmem:[#allocation3 + $0x182] sm:$0xff] }
 0x430   : > { %v14655_v6 = vpack.c.bf16 %v5360_v22, %v5359_v7 }
 0x436   : > { %11723 = vmatmul.mubr.msk.bf16.vlgmr.msra.gmra.mrb[64].mxu1 %vm579_vm3, %v14480_v48 }
 0x437   : > { %11755 = vmatpush3.bf16.msra.mxu1 %v5723_v59  ;;  %11726 = vmatprep.mubr.msk.bf16.mxu1 %vm579_vm3, %v14490_v52 }
 0x438   : > { %13104 = vmatprep.subr.msk.bf16.mxu1 %vm3511_vm2, %v10421_v40 }
 0x43e   : > { %11727 = vmatmul.mubr.msk.bf16.gmra.mrb[68].mxu1 %vm579_vm3, %v14492_v43 }
 0x43f   : > { %11730 = vmatprep.mubr.msk.bf16.mxu1 %vm579_vm3, %v14498_v27 }
 0x446   : > { %11731 = vmatmul.mubr.msk.bf16.gmra.mrb[72].mxu1 %vm579_vm3, %v14500_v37 }
 0x447   : > { %11734 = vmatprep.mubr.msk.bf16.mxu1 %vm579_vm3, %v14506_v44 }
 0x44e   : > { %11735 = vmatmul.mubr.msk.bf16.gmra.mrb[76].mxu1 %vm579_vm3, %v14508_v51 }
 0x44f   : > { %11738 = vmatprep.mubr.msk.bf16.mxu1 %vm579_vm3, %v14514_v38 }
 0x456   : > { %11739 = vmatmul.mubr.msk.bf16.gmra.mrb[80].mxu1 %vm579_vm3, %v14516_v19 }
 0x457   : > { %11742 = vmatprep.mubr.msk.bf16.mxu1 %vm579_vm3, %v14522_v21 }
 0x45e   : > { %11743 = vmatmul.mubr.msk.bf16.gmra.mrb[84].mxu1 %vm579_vm3, %v14524_v18 }
 0x45f   : > { %11746 = vmatprep.mubr.msk.bf16.mxu1 %vm579_vm3, %v14530_v20 }
 0x466   : > { %11747 = vmatmul.mubr.msk.bf16.gmra.mrb[88].mxu1 %vm579_vm3, %v14532_v15 }
 0x467   : > { %11750 = vmatprep.mubr.msk.bf16.mxu1 %vm579_vm3, %v14538_v42 }
 0x46e   : > { %11751 = vmatmul.mubr.msk.bf16.gmra.mrb[92].mxu1 %vm579_vm3, %v14655_v6 }
 0x46f   : > { %11756 = vmatprep.mubr.msk.bf16.mxu1 %vm579_vm3, %v14410_v28  ;;  %v5654_v28 = vld [vmem:[#allocation3 + $0x198] sm:$0xff] }
 0x476   : > { %11757 = vmatmul.mubr.msk.bf16.vlgmr.msra.gmra.mrb[64].mxu1 %vm579_vm3, %v14423_v26 }
 0x477   : > { %11789 = vmatpush3.bf16.msra.mxu1 %v6017_v62  ;;  %11760 = vmatprep.mubr.msk.bf16.mxu1 %vm579_vm3, %v14425_v35 }
 0x478   : > { %13105 = vmatprep.subr.msk.bf16.mxu1 %vm3511_vm2, %v10438_v0 }
 0x47e   : > { %11761 = vmatmul.mubr.msk.bf16.gmra.mrb[68].mxu1 %vm579_vm3, %v14431_v55 }
 0x47f   : > { %11764 = vmatprep.mubr.msk.bf16.mxu1 %vm579_vm3, %v14433_v9 }
 0x486   : > { %11765 = vmatmul.mubr.msk.bf16.gmra.mrb[72].mxu1 %vm579_vm3, %v14439_v34 }
 0x487   : > { %11768 = vmatprep.mubr.msk.bf16.mxu1 %vm579_vm3, %v14441_v58 }
 0x48e   : > { %11769 = vmatmul.mubr.msk.bf16.gmra.mrb[76].mxu1 %vm579_vm3, %v14447_v36 }
 0x48f   : > { %11772 = vmatprep.mubr.msk.bf16.mxu1 %vm579_vm3, %v14449_v60  ;;  %v5655_v60 = vld [vmem:[#allocation3 + $0x1a0] sm:$0xff] }
 0x490   : > { %v5671_v26 = vpack.c.bf16 %v5655_v60, %v5654_v28 }
 0x496   : > { %11773 = vmatmul.mubr.msk.bf16.gmra.mrb[80].mxu1 %vm579_vm3, %v14455_v56 }
 0x497   : > { %11776 = vmatprep.mubr.msk.bf16.mxu1 %vm579_vm3, %v14457_v32  ;;  %v10473_v32 = vld [vmem:[%s15591_s7 + $0x4] sm:$0xf] }
 0x498   : > { %13107 = vmatprep.subr.msk.bf16.mxu0 %vm3511_vm2, %v10473_v32 }
 0x49e   : > { %11777 = vmatmul.mubr.msk.bf16.gmra.mrb[84].mxu1 %vm579_vm3, %v14463_v54 }
 0x49f   : > { %11780 = vmatprep.mubr.msk.bf16.mxu1 %vm579_vm3, %v14465_v30  ;;  %v7057_v30 = vsel %vm3511_vm2, %v10473_v32, 0 }
 0x4a0   : > { %11891 = vmatpush3.bf16.msra.mxu0 %v7057_v30 }
 0x4a6   : > { %11781 = vmatmul.mubr.msk.bf16.gmra.mrb[88].mxu1 %vm579_vm3, %v14471_v63  ;;  %v6311_v63 = vsel %vm3511_vm2, %v10438_v0, 0 }
 0x4a7   : > { %11784 = vmatprep.mubr.msk.bf16.mxu1 %vm579_vm3, %v14577_v50 }
 0x4ae   : > { %11785 = vmatmul.mubr.msk.bf16.gmra.mrb[92].mxu1 %vm579_vm3, %v5671_v26 }
 0x4af   : > { %11790 = vmatprep.mubr.msk.bf16.mxu1 %vm579_vm3, %v14340_v53  ;;  %v5948_v53 = vld [vmem:[#allocation3 + $0x199] sm:$0xff] }
 0x4b6   : > { %11791 = vmatmul.mubr.msk.bf16.vlgmr.msra.gmra.mrb[64].mxu1 %vm579_vm3, %v14353_v47  ;;  %v5949_v47 = vld [vmem:[#allocation3 + $0x1a1] sm:$0xff] }
 0x4b7   : > { %11823 = vmatpush3.bf16.msra.mxu1 %v6311_v63  ;;  %11794 = vmatprep.mubr.msk.bf16.mxu1 %vm579_vm3, %v14355_v33  ;;  %v5965_v33 = vpack.c.bf16 %v5949_v47, %v5948_v53 }
 0x4be   : > { %11795 = vmatmul.mubr.msk.bf16.gmra.mrb[68].mxu1 %vm579_vm3, %v14361_v1  ;;  %v14781_v1 = vld [vmem:[%s15590_s6] ss:$0 sm:$0xff] }
 0x4bf   : > { %11798 = vmatprep.mubr.msk.bf16.mxu1 %vm579_vm3, %v14363_v41 }
 0x4c6   : > { %11799 = vmatmul.mubr.msk.bf16.gmra.mrb[72].mxu1 %vm579_vm3, %v14369_v25 }
 0x4c7   : > { %11802 = vmatprep.mubr.msk.bf16.mxu1 %vm579_vm3, %v14371_v29 }
 0x4ce   : > { %11803 = vmatmul.mubr.msk.bf16.gmra.mrb[76].mxu1 %vm579_vm3, %v14377_v45 }
 0x4cf   : > { %11806 = vmatprep.mubr.msk.bf16.mxu1 %vm579_vm3, %v14379_v31 }
 0x4d6   : > { %11807 = vmatmul.mubr.msk.bf16.gmra.mrb[80].mxu1 %vm579_vm3, %v14385_v23 }
 0x4d7   : > { %11810 = vmatprep.mubr.msk.bf16.mxu1 %vm579_vm3, %v14387_v49 }
 0x4de   : > { %11811 = vmatmul.mubr.msk.bf16.gmra.mrb[84].mxu1 %vm579_vm3, %v14393_v61 }
 0x4df   : > { %11814 = vmatprep.mubr.msk.bf16.mxu1 %vm579_vm3, %v14395_v39 }
 0x4e6   : > { %11815 = vmatmul.mubr.msk.bf16.gmra.mrb[88].mxu1 %vm579_vm3, %v14401_v57 }
 0x4e7   : > { %11818 = vmatprep.mubr.msk.bf16.mxu1 %vm579_vm3, %v14616_v2 }
 0x4ee   : > { %11819 = vmatmul.mubr.msk.bf16.gmra.mrb[92].mxu1 %vm579_vm3, %v5965_v33 }
 0x4ef   : > { %11824 = vmatprep.mubr.msk.bf16.mxu1 %vm579_vm3, %v14480_v48  ;;  %v14776_v48 = vld [vmem:[%s15589_s5] ss:$0 sm:$0xff] }
 0x4f6   : > { %11825 = vmatmul.mubr.msk.bf16.vlgmr.msra.gmra.mrb[64].mxu1 %vm579_vm3, %v14490_v52 }
 0x4f7   : > { %11828 = vmatprep.mubr.msk.bf16.mxu1 %vm579_vm3, %v14492_v43 }
 0x4fe   : > { %11829 = vmatmul.mubr.msk.bf16.gmra.mrb[68].mxu1 %vm579_vm3, %v14498_v27 }
 0x4ff   : > { %11832 = vmatprep.mubr.msk.bf16.mxu1 %vm579_vm3, %v14500_v37 }
 0x506   : > { %11833 = vmatmul.mubr.msk.bf16.gmra.mrb[72].mxu1 %vm579_vm3, %v14506_v44  ;;  %v6957_v44 = vld [vmem:[%s15591_s7] sm:$0xf] }
 0x507   : > { %11836 = vmatprep.mubr.msk.bf16.mxu1 %vm579_vm3, %v14508_v51  ;;  %v6242_v51 = vld [vmem:[#allocation3 + $0x19a] sm:$0xff]  ;;  %13108 = vmatprep.subr.msk.bf16.mxu0 %vm3511_vm2, %v6957_v44 }
 0x50e   : > { %11837 = vmatmul.mubr.msk.bf16.gmra.mrb[76].mxu1 %vm579_vm3, %v14514_v38 }
 0x50f   : > { %11840 = vmatprep.mubr.msk.bf16.mxu1 %vm579_vm3, %v14516_v19  ;;  %v6243_v19 = vld [vmem:[#allocation3 + $0x1a2] sm:$0xff] }
 0x510   : > { %v6259_v37 = vpack.c.bf16 %v6243_v19, %v6242_v51 }
 0x516   : > { %11841 = vmatmul.mubr.msk.bf16.gmra.mrb[80].mxu1 %vm579_vm3, %v14522_v21  ;;  %v6959_v21 = vld [vmem:[#allocation3 + $0x9] sm:$0xff] }
 0x517   : > { %11844 = vmatprep.mubr.msk.bf16.mxu1 %vm579_vm3, %v14524_v18  ;;  %v6632_v18 = vld [vmem:[%s15596_s12] sm:$0xf] }
 0x518   : > { %13106 = vmatprep.subr.msk.bf16.mxu1 %vm3511_vm2, %v6632_v18 }
 0x51e   : > { %11845 = vmatmul.mubr.msk.bf16.gmra.mrb[84].mxu1 %vm579_vm3, %v14530_v20  ;;  %v6682_v20 = vsel %vm3511_vm2, %v6632_v18, 0  ;;  %v7269_v18 = vsel %vm3511_vm2, %v6957_v44, 0 }
 0x51f   : > { %11848 = vmatprep.mubr.msk.bf16.mxu1 %vm579_vm3, %v14532_v15  ;;  %11857 = vmatpush3.bf16.msra.mxu1 %v6682_v20  ;;  %v6958_v15 = vld [vmem:[#allocation3 + $0x1] sm:$0xff] }
 0x520   : > { %v6990_v38 = vpack.c.bf16 %v6959_v21, %v6958_v15 }
 0x522   : > { %11892 = vmatprep.mubr.msk.bf16.mxu0 %vm579_vm3, %v6990_v38 }
 0x526   : > { %11849 = vmatmul.mubr.msk.bf16.gmra.mrb[88].mxu1 %vm579_vm3, %v14538_v42 }
 0x527   : > { %11852 = vmatprep.mubr.msk.bf16.mxu1 %vm579_vm3, %v14655_v6 }
 0x52e   : > { %11853 = vmatmul.mubr.msk.bf16.gmra.mrb[92].mxu1 %vm579_vm3, %v6259_v37 }
 0x5c9   : > { %v11826_v27 = vpop.f32.mrb[64].mxu1 }
 0x5ca   : > { %v6515_v41 = vmul.f32 %v11826_v27, %v14776_v48  ;;  %v6347_v25 = vpop.f32.mrb[65].mxu1  ;;  %v14819_v27 = vld [vmem:[%s15591_s7 + $0x8] sm:$0xf] }
 0x5cb   : > { %v6513_v29 = vmul.f32 %v14776_v48, %v6347_v25  ;;  %v11827_v45 = vpop.f32.mrb[66].mxu1 }
 0x5cc   : > { %v6554_v31 = vadd.f32 %v14781_v1, %v6515_v41  ;;  %v6516_v23 = vmul.f32 %v11827_v45, %v14776_v48  ;;  %v6350_v49 = vpop.f32.mrb[67].mxu1 }
 0x5cd   : > { %v6552_v61 = vadd.f32 %v14781_v1, %v6513_v29  ;;  %v6514_v39 = vmul.f32 %v14776_v48, %v6350_v49 }
 0x5ce   : > { %v6586_v57 = vmax.f32 %v6554_v31, 0.0  ;;  %v6555_v35 = vadd.f32 %v14781_v1, %v6516_v23 }
 0x5cf   : > { %v6584_v55 = vmax.f32 %v6552_v61, 0.0  ;;  %v6553_v9 = vadd.f32 %v14781_v1, %v6514_v39 }
 0x5d0   : > { %6879 = vst.msk [vmem:[#allocation3 + $0x31] sm:$0xff] %vm579_vm3, %v6586_v57  ;;  %v6587_v34 = vmax.f32 %v6555_v35, 0.0 }
 0x5d1   : > { %6877 = vst.msk [vmem:[#allocation3 + $0x19] sm:$0xff] %vm579_vm3, %v6584_v55  ;;  %v6585_v58 = vmax.f32 %v6553_v9, 0.0  ;;  %v11830_v36 = vpop.f32.mrb[68].mxu1 }
 0x5d2   : > { %v6617_v56 = vpack.c.bf16 %v6587_v34, %v6586_v57  ;;  %6880 = vst.msk [vmem:[#allocation3 + $0x39] sm:$0xff] %vm579_vm3, %v6587_v34  ;;  %v6519_v54 = vmul.f32 %v11830_v36, %v14776_v48  ;;  %v6363_v52 = vpop.f32.mrb[69].mxu1 }
 0x5d3   : > { %v6616_v43 = vpack.c.bf16 %v6585_v58, %v6584_v55  ;;  %6878 = vst.msk [vmem:[#allocation3 + $0x21] sm:$0xff] %vm579_vm3, %v6585_v58  ;;  %v6517_v42 = vmul.f32 %v14776_v48, %v6363_v52  ;;  %v11831_v50 = vpop.f32.mrb[70].mxu1 }
 0x5d4   : > { %v6558_v24 = vadd.f32 %v14781_v1, %v6519_v54  ;;  %v6520_v46 = vmul.f32 %v11831_v50, %v14776_v48  ;;  %v6366_v2 = vpop.f32.mrb[71].mxu1 }
 0x5d5   : > { %v6556_v59 = vadd.f32 %v14781_v1, %v6517_v42  ;;  %v6518_v40 = vmul.f32 %v14776_v48, %v6366_v2  ;;  %11858 = vmatprep.mubr.msk.bf16.mxu1 %vm579_vm3, %v6616_v43 }
 0x5d6   : > { %v6590_v7 = vmax.f32 %v6558_v24, 0.0  ;;  %v6559_v22 = vadd.f32 %v14781_v1, %v6520_v46  ;;  %11859 = vmatmul.mubr.msk.bf16.vlgmr.msra.gmra.mrb[32].mxu1 %vm579_vm3, %v6617_v56 }
 0x5d7   : > { %v6588_v6 = vmax.f32 %v6556_v59, 0.0  ;;  %v6557_v62 = vadd.f32 %v14781_v1, %v6518_v40  ;;  %v6962_v38 = vld [vmem:[#allocation3 + $0x31] sm:$0xff] }
 0x5d8   : > { %6883 = vst.msk [vmem:[#allocation3 + $0x61] sm:$0xff] %vm579_vm3, %v6590_v7  ;;  %v6591_v0 = vmax.f32 %v6559_v22, 0.0  ;;  %v6960_v63 = vld [vmem:[#allocation3 + $0x19] sm:$0xff] }
 0x5d9   : > { %6881 = vst.msk [vmem:[#allocation3 + $0x49] sm:$0xff] %vm579_vm3, %v6588_v6  ;;  %v6589_v28 = vmax.f32 %v6557_v62, 0.0  ;;  %v11834_v60 = vpop.f32.mrb[72].mxu1  ;;  %v6963_v47 = vld [vmem:[#allocation3 + $0x39] sm:$0xff] }
 0x5da   : > { %v6619_v26 = vpack.c.bf16 %v6591_v0, %v6590_v7  ;;  %6884 = vst.msk [vmem:[#allocation3 + $0x69] sm:$0xff] %vm579_vm3, %v6591_v0  ;;  %v6523_v32 = vmul.f32 %v11834_v60, %v14776_v48  ;;  %v6379_v30 = vpop.f32.mrb[73].mxu1  ;;  %v6961_v53 = vld [vmem:[#allocation3 + $0x21] sm:$0xff]  ;;  %v14826_v44 = vpack.c.bf16 %v6963_v47, %v6962_v38 }
 0x5db   : > { %v6618_v33 = vpack.c.bf16 %v6589_v28, %v6588_v6  ;;  %6882 = vst.msk [vmem:[#allocation3 + $0x51] sm:$0xff] %vm579_vm3, %v6589_v28  ;;  %v6521_v51 = vmul.f32 %v14776_v48, %v6379_v30  ;;  %v11835_v19 = vpop.f32.mrb[74].mxu1  ;;  %v14811_v37 = vpack.c.bf16 %v6961_v53, %v6960_v63 }
 0x5dc   : > { %v6562_v20 = vadd.f32 %v14781_v1, %v6523_v32  ;;  %v6524_v15 = vmul.f32 %v11835_v19, %v14776_v48  ;;  %v6382_v21 = vpop.f32.mrb[75].mxu1 }
 0x5dd   : > { %v6560_v41 = vadd.f32 %v14781_v1, %v6521_v51  ;;  %v6522_v25 = vmul.f32 %v14776_v48, %v6382_v21  ;;  %11862 = vmatprep.mubr.msk.bf16.mxu1 %vm579_vm3, %v6618_v33  ;;  %11893 = vmatmul.mubr.msk.bf16.vlgmr.msra.gmra.mrb[32].mxu0 %vm579_vm3, %v14811_v37 }
 0x5de   : > { %v6594_v29 = vmax.f32 %v6562_v20, 0.0  ;;  %v6563_v45 = vadd.f32 %v14781_v1, %v6524_v15  ;;  %11925 = vmatpush3.bf16.msra.mxu0 %v7269_v18  ;;  %11863 = vmatmul.mubr.msk.bf16.gmra.mrb[36].mxu1 %vm579_vm3, %v6619_v26 }
 0x5df   : > { %v6592_v31 = vmax.f32 %v6560_v41, 0.0  ;;  %v6561_v23 = vadd.f32 %v14781_v1, %v6522_v25  ;;  %11896 = vmatprep.mubr.msk.bf16.mxu0 %vm579_vm3, %v14826_v44  ;;  %13109 = vmatprep.subr.msk.bf16.mxu0 %vm3511_vm2, %v14819_v27  ;;  %v6966_v43 = vld [vmem:[#allocation3 + $0x61] sm:$0xff] }
 0x5e0   : > { %6887 = vst.msk [vmem:[#allocation3 + $0x91] sm:$0xff] %vm579_vm3, %v6594_v29  ;;  %v6595_v49 = vmax.f32 %v6563_v45, 0.0  ;;  %v6964_v34 = vld [vmem:[#allocation3 + $0x49] sm:$0xff] }
 0x5e1   : > { %6885 = vst.msk [vmem:[#allocation3 + $0x79] sm:$0xff] %vm579_vm3, %v6592_v31  ;;  %v6593_v61 = vmax.f32 %v6561_v23, 0.0  ;;  %v11838_v39 = vpop.f32.mrb[76].mxu1  ;;  %v6967_v57 = vld [vmem:[#allocation3 + $0x69] sm:$0xff] }
 0x5e2   : > { %v6621_v35 = vpack.c.bf16 %v6595_v49, %v6594_v29  ;;  %6888 = vst.msk [vmem:[#allocation3 + $0x99] sm:$0xff] %vm579_vm3, %v6595_v49  ;;  %v6527_v55 = vmul.f32 %v11838_v39, %v14776_v48  ;;  %v6395_v9 = vpop.f32.mrb[77].mxu1  ;;  %v6965_v58 = vld [vmem:[#allocation3 + $0x51] sm:$0xff]  ;;  %v14845_v46 = vpack.c.bf16 %v6967_v57, %v6966_v43 }
 0x5e3   : > { %v6620_v36 = vpack.c.bf16 %v6593_v61, %v6592_v31  ;;  %6886 = vst.msk [vmem:[#allocation3 + $0x81] sm:$0xff] %vm579_vm3, %v6593_v61  ;;  %v6525_v56 = vmul.f32 %v14776_v48, %v6395_v9  ;;  %v11839_v54 = vpop.f32.mrb[78].mxu1  ;;  %v14841_v52 = vpack.c.bf16 %v6965_v58, %v6964_v34 }
 0x5e4   : > { %v6566_v42 = vadd.f32 %v14781_v1, %v6527_v55  ;;  %v6528_v50 = vmul.f32 %v11839_v54, %v14776_v48  ;;  %v6398_v24 = vpop.f32.mrb[79].mxu1 }
 0x5e5   : > { %v6564_v2 = vadd.f32 %v14781_v1, %v6525_v56  ;;  %v6526_v59 = vmul.f32 %v14776_v48, %v6398_v24  ;;  %11866 = vmatprep.mubr.msk.bf16.mxu1 %vm579_vm3, %v6620_v36  ;;  %11897 = vmatmul.mubr.msk.bf16.gmra.mrb[36].mxu0 %vm579_vm3, %v14841_v52 }
 0x5e6   : > { %v6598_v40 = vmax.f32 %v6566_v42, 0.0  ;;  %v6567_v7 = vadd.f32 %v14781_v1, %v6528_v50  ;;  %11867 = vmatmul.mubr.msk.bf16.gmra.mrb[40].mxu1 %vm579_vm3, %v6621_v35  ;;  %11900 = vmatprep.mubr.msk.bf16.mxu0 %vm579_vm3, %v14845_v46 }
 0x5e7   : > { %v6596_v22 = vmax.f32 %v6564_v2, 0.0  ;;  %v6565_v6 = vadd.f32 %v14781_v1, %v6526_v59  ;;  %v6970_v18 = vld [vmem:[#allocation3 + $0x91] sm:$0xff] }
 0x5e8   : > { %6891 = vst.msk [vmem:[#allocation3 + $0xc1] sm:$0xff] %vm579_vm3, %v6598_v40  ;;  %v6599_v62 = vmax.f32 %v6567_v7, 0.0  ;;  %v6968_v63 = vld [vmem:[#allocation3 + $0x79] sm:$0xff] }
 0x5e9   : > { %6889 = vst.msk [vmem:[#allocation3 + $0xa9] sm:$0xff] %vm579_vm3, %v6596_v22  ;;  %v6597_v0 = vmax.f32 %v6565_v6, 0.0  ;;  %v11842_v28 = vpop.f32.mrb[80].mxu1  ;;  %v6971_v60 = vld [vmem:[#allocation3 + $0x99] sm:$0xff] }
 0x5ea   : > { %v6623_v26 = vpack.c.bf16 %v6599_v62, %v6598_v40  ;;  %6892 = vst.msk [vmem:[#allocation3 + $0xc9] sm:$0xff] %vm579_vm3, %v6599_v62  ;;  %v6531_v32 = vmul.f32 %v11842_v28, %v14776_v48  ;;  %v6411_v30 = vpop.f32.mrb[81].mxu1  ;;  %v6969_v53 = vld [vmem:[#allocation3 + $0x81] sm:$0xff]  ;;  %v14867_v38 = vpack.c.bf16 %v6971_v60, %v6970_v18 }
 0x5eb   : > { %v6622_v47 = vpack.c.bf16 %v6597_v0, %v6596_v22  ;;  %6890 = vst.msk [vmem:[#allocation3 + $0xb1] sm:$0xff] %vm579_vm3, %v6597_v0  ;;  %v6529_v33 = vmul.f32 %v14776_v48, %v6411_v30  ;;  %v11843_v51 = vpop.f32.mrb[82].mxu1  ;;  %v14863_v19 = vpack.c.bf16 %v6969_v53, %v6968_v63 }
 0x5ec   : > { %v6570_v20 = vadd.f32 %v14781_v1, %v6531_v32  ;;  %v6532_v15 = vmul.f32 %v11843_v51, %v14776_v48  ;;  %v6414_v21 = vpop.f32.mrb[83].mxu1 }
 0x5ed   : > { %v6568_v41 = vadd.f32 %v14781_v1, %v6529_v33  ;;  %v6530_v25 = vmul.f32 %v14776_v48, %v6414_v21  ;;  %11870 = vmatprep.mubr.msk.bf16.mxu1 %vm579_vm3, %v6622_v47  ;;  %11901 = vmatmul.mubr.msk.bf16.gmra.mrb[40].mxu0 %vm579_vm3, %v14863_v19 }
 0x5ee   : > { %v6602_v29 = vmax.f32 %v6570_v20, 0.0  ;;  %v6571_v45 = vadd.f32 %v14781_v1, %v6532_v15  ;;  %11871 = vmatmul.mubr.msk.bf16.gmra.mrb[44].mxu1 %vm579_vm3, %v6623_v26  ;;  %11904 = vmatprep.mubr.msk.bf16.mxu0 %vm579_vm3, %v14867_v38 }
 0x5ef   : > { %v6600_v31 = vmax.f32 %v6568_v41, 0.0  ;;  %v6569_v23 = vadd.f32 %v14781_v1, %v6530_v25  ;;  %v6974_v42 = vld [vmem:[#allocation3 + $0xc1] sm:$0xff] }
 0x5f0   : > { %6895 = vst.msk [vmem:[#allocation3 + $0xf1] sm:$0xff] %vm579_vm3, %v6602_v29  ;;  %v6603_v49 = vmax.f32 %v6571_v45, 0.0  ;;  %v6972_v34 = vld [vmem:[#allocation3 + $0xa9] sm:$0xff] }
 0x5f1   : > { %6893 = vst.msk [vmem:[#allocation3 + $0xd9] sm:$0xff] %vm579_vm3, %v6600_v31  ;;  %v6601_v61 = vmax.f32 %v6569_v23, 0.0  ;;  %v11846_v39 = vpop.f32.mrb[84].mxu1  ;;  %v6975_v57 = vld [vmem:[#allocation3 + $0xc9] sm:$0xff] }
 0x5f2   : > { %v6625_v35 = vpack.c.bf16 %v6603_v49, %v6602_v29  ;;  %6896 = vst.msk [vmem:[#allocation3 + $0xf9] sm:$0xff] %vm579_vm3, %v6603_v49  ;;  %v6535_v55 = vmul.f32 %v11846_v39, %v14776_v48  ;;  %v6427_v9 = vpop.f32.mrb[85].mxu1  ;;  %v6973_v58 = vld [vmem:[#allocation3 + $0xb1] sm:$0xff]  ;;  %v14889_v59 = vpack.c.bf16 %v6975_v57, %v6974_v42 }
 0x5f3   : > { %v6624_v36 = vpack.c.bf16 %v6601_v61, %v6600_v31  ;;  %6894 = vst.msk [vmem:[#allocation3 + $0xe1] sm:$0xff] %vm579_vm3, %v6601_v61  ;;  %v6533_v56 = vmul.f32 %v14776_v48, %v6427_v9  ;;  %v11847_v54 = vpop.f32.mrb[86].mxu1  ;;  %v14885_v43 = vpack.c.bf16 %v6973_v58, %v6972_v34 }
 0x5f4   : > { %v6574_v50 = vadd.f32 %v14781_v1, %v6535_v55  ;;  %v6536_v24 = vmul.f32 %v11847_v54, %v14776_v48  ;;  %v6430_v2 = vpop.f32.mrb[87].mxu1 }
 0x5f5   : > { %v6572_v40 = vadd.f32 %v14781_v1, %v6533_v56  ;;  %v6534_v7 = vmul.f32 %v14776_v48, %v6430_v2  ;;  %11874 = vmatprep.mubr.msk.bf16.mxu1 %vm579_vm3, %v6624_v36  ;;  %11905 = vmatmul.mubr.msk.bf16.gmra.mrb[44].mxu0 %vm579_vm3, %v14885_v43 }
 0x5f6   : > { %v6606_v22 = vmax.f32 %v6574_v50, 0.0  ;;  %v6575_v6 = vadd.f32 %v14781_v1, %v6536_v24  ;;  %11875 = vmatmul.mubr.msk.bf16.gmra.mrb[48].mxu1 %vm579_vm3, %v6625_v35  ;;  %11908 = vmatprep.mubr.msk.bf16.mxu0 %vm579_vm3, %v14889_v59 }
 0x5f7   : > { %v6604_v62 = vmax.f32 %v6572_v40, 0.0  ;;  %v6573_v0 = vadd.f32 %v14781_v1, %v6534_v7  ;;  %v6978_v21 = vld [vmem:[#allocation3 + $0xf1] sm:$0xff] }
 0x5f8   : > { %6899 = vst.msk [vmem:[#allocation3 + $0x121] sm:$0xff] %vm579_vm3, %v6606_v22  ;;  %v6607_v28 = vmax.f32 %v6575_v6, 0.0  ;;  %v6976_v47 = vld [vmem:[#allocation3 + $0xd9] sm:$0xff] }
 0x5f9   : > { %6897 = vst.msk [vmem:[#allocation3 + $0x109] sm:$0xff] %vm579_vm3, %v6604_v62  ;;  %v6605_v60 = vmax.f32 %v6573_v0, 0.0  ;;  %v11850_v26 = vpop.f32.mrb[88].mxu1  ;;  %v6979_v32 = vld [vmem:[#allocation3 + $0xf9] sm:$0xff] }
 0x5fa   : > { %v6627_v30 = vpack.c.bf16 %v6607_v28, %v6606_v22  ;;  %6900 = vst.msk [vmem:[#allocation3 + $0x129] sm:$0xff] %vm579_vm3, %v6607_v28  ;;  %v6539_v63 = vmul.f32 %v11850_v26, %v14776_v48  ;;  %v6443_v53 = vpop.f32.mrb[89].mxu1  ;;  %v6977_v33 = vld [vmem:[#allocation3 + $0xe1] sm:$0xff]  ;;  %v14911_v45 = vpack.c.bf16 %v6979_v32, %v6978_v21 }
 0x5fb   : > { %v6626_v51 = vpack.c.bf16 %v6605_v60, %v6604_v62  ;;  %6898 = vst.msk [vmem:[#allocation3 + $0x111] sm:$0xff] %vm579_vm3, %v6605_v60  ;;  %v6537_v18 = vmul.f32 %v14776_v48, %v6443_v53  ;;  %v11851_v20 = vpop.f32.mrb[90].mxu1  ;;  %v14907_v15 = vpack.c.bf16 %v6977_v33, %v6976_v47 }
 0x5fc   : > { %v6578_v41 = vadd.f32 %v14781_v1, %v6539_v63  ;;  %v6540_v25 = vmul.f32 %v11851_v20, %v14776_v48  ;;  %v6446_v29 = vpop.f32.mrb[91].mxu1 }
 0x5fd   : > { %v6576_v31 = vadd.f32 %v14781_v1, %v6537_v18  ;;  %v6538_v23 = vmul.f32 %v14776_v48, %v6446_v29  ;;  %11878 = vmatprep.mubr.msk.bf16.mxu1 %vm579_vm3, %v6626_v51  ;;  %11909 = vmatmul.mubr.msk.bf16.gmra.mrb[48].mxu0 %vm579_vm3, %v14907_v15  ;;  %v6910_v29 = vld [vmem:[#allocation3 + $0x8] sm:$0xff] }
 0x5fe   : > { %v6610_v49 = vmax.f32 %v6578_v41, 0.0  ;;  %v6579_v61 = vadd.f32 %v14781_v1, %v6540_v25  ;;  %11879 = vmatmul.mubr.msk.bf16.gmra.mrb[52].mxu1 %vm579_vm3, %v6627_v30  ;;  %11912 = vmatprep.mubr.msk.bf16.mxu0 %vm579_vm3, %v14911_v45 }
 0x5ff   : > { %v6608_v39 = vmax.f32 %v6576_v31, 0.0  ;;  %v6577_v57 = vadd.f32 %v14781_v1, %v6538_v23  ;;  %v6982_v7 = vld [vmem:[#allocation3 + $0x121] sm:$0xff] }
 0x600   : > { %6903 = vst.msk [vmem:[#allocation3 + $0x151] sm:$0xff] %vm579_vm3, %v6610_v49  ;;  %v6611_v35 = vmax.f32 %v6579_v61, 0.0  ;;  %v6980_v54 = vld [vmem:[#allocation3 + $0x109] sm:$0xff] }
 0x601   : > { %6901 = vst.msk [vmem:[#allocation3 + $0x139] sm:$0xff] %vm579_vm3, %v6608_v39  ;;  %v6609_v55 = vmax.f32 %v6577_v57, 0.0  ;;  %v11854_v9 = vpop.f32.mrb[92].mxu1  ;;  %v6983_v34 = vld [vmem:[#allocation3 + $0x129] sm:$0xff]  ;;  %v6914_v57 = vld [vmem:[#allocation3 + $0x38] sm:$0xff] }
 0x602   : > { %v6629_v58 = vpack.c.bf16 %v6611_v35, %v6610_v49  ;;  %6904 = vst.msk [vmem:[#allocation3 + $0x159] sm:$0xff] %vm579_vm3, %v6611_v35  ;;  %v6543_v36 = vmul.f32 %v11854_v9, %v14776_v48  ;;  %v6459_v56 = vpop.f32.mrb[93].mxu1  ;;  %v6981_v42 = vld [vmem:[#allocation3 + $0x111] sm:$0xff]  ;;  %v14933_v0 = vpack.c.bf16 %v6983_v34, %v6982_v7  ;;  %v7531_v9 = vsel %vm3511_vm2, %v14819_v27, 0  ;;  %v6918_v27 = vld [vmem:[#allocation3 + $0x68] sm:$0xff] }
 0x603   : > { %v6628_v50 = vpack.c.bf16 %v6609_v55, %v6608_v39  ;;  %6902 = vst.msk [vmem:[#allocation3 + $0x141] sm:$0xff] %vm579_vm3, %v6609_v55  ;;  %v6541_v24 = vmul.f32 %v14776_v48, %v6459_v56  ;;  %v11855_v2 = vpop.f32.mrb[94].mxu1  ;;  %v14929_v40 = vpack.c.bf16 %v6981_v42, %v6980_v54  ;;  %v6912_v39 = vld [vmem:[#allocation3 + $0x20] sm:$0xff]  ;;  %v6911_v35 = vld [vmem:[#allocation3 + $0x18] sm:$0xff]  ;;  %v6913_v34 = vld [vmem:[#allocation3 + $0x30] sm:$0xff] }
 0x604   : > { %v6582_v22 = vadd.f32 %v14781_v1, %v6543_v36  ;;  %v6544_v6 = vmul.f32 %v11855_v2, %v14776_v48  ;;  %v6462_v62 = vpop.f32.mrb[95].mxu1  ;;  %v14964_v55 = vpack.c.bf16 %v6912_v39, %v6911_v35  ;;  %v14973_v36 = vld [vmem:[%s15591_s7 + $0xc] sm:$0xf]  ;;  %v6916_v56 = vld [vmem:[#allocation3 + $0x50] sm:$0xff]  ;;  %v6915_v54 = vld [vmem:[#allocation3 + $0x48] sm:$0xff] }
 0x605   : > { %v6580_v28 = vadd.f32 %v14781_v1, %v6541_v24  ;;  %v6542_v60 = vmul.f32 %v14776_v48, %v6462_v62  ;;  %11882 = vmatprep.mubr.msk.bf16.mxu1 %vm579_vm3, %v6628_v50  ;;  %11913 = vmatmul.mubr.msk.bf16.gmra.mrb[52].mxu0 %vm579_vm3, %v14929_v40  ;;  %v14981_v42 = vpack.c.bf16 %v6916_v56, %v6915_v54  ;;  %v6917_v50 = vld [vmem:[#allocation3 + $0x60] sm:$0xff]  ;;  %v6922_v7 = vld [vmem:[#allocation3 + $0x98] sm:$0xff]  ;;  %v6921_v62 = vld [vmem:[#allocation3 + $0x90] sm:$0xff] }
 0x606   : > { %v6614_v26 = vmax.f32 %v6582_v22, 0.0  ;;  %v6583_v32 = vadd.f32 %v14781_v1, %v6544_v6  ;;  %11883 = vmatmul.mubr.msk.bf16.gmra.mrb[56].mxu1 %vm579_vm3, %v6629_v58  ;;  %11916 = vmatprep.mubr.msk.bf16.mxu0 %vm579_vm3, %v14933_v0  ;;  %v14968_v58 = vpack.c.bf16 %v6914_v57, %v6913_v34  ;;  %v14983_v24 = vpack.c.bf16 %v6918_v27, %v6917_v50  ;;  %v6920_v2 = vld [vmem:[#allocation3 + $0x80] sm:$0xff]  ;;  %v6919_v22 = vld [vmem:[#allocation3 + $0x78] sm:$0xff]  ;;  %v7433_v54 = vld [vmem:[#allocation3 + $0xa] sm:$0xff] }
 0x607   : > { %v6612_v30 = vmax.f32 %v6580_v28, 0.0  ;;  %v6581_v63 = vadd.f32 %v14781_v1, %v6542_v60  ;;  %v6986_v41 = vld [vmem:[#allocation3 + $0x151] sm:$0xff]  ;;  %v6909_v1 = vld [vmem:[#allocation3] sm:$0xff]  ;;  %v14989_v6 = vpack.c.bf16 %v6920_v2, %v6919_v22  ;;  %v14991_v28 = vpack.c.bf16 %v6922_v7, %v6921_v62 }
 0x608   : > { %6907 = vst.msk [vmem:[#allocation3 + $0x181] sm:$0xff] %vm579_vm3, %v6614_v26  ;;  %v6615_v53 = vmax.f32 %v6583_v32, 0.0  ;;  %v6984_v51 = vld [vmem:[#allocation3 + $0x139] sm:$0xff]  ;;  %v6941_v49 = vpack.c.bf16 %v6910_v29, %v6909_v1  ;;  %v6924_v60 = vld [vmem:[#allocation3 + $0xb0] sm:$0xff]  ;;  %v6923_v32 = vld [vmem:[#allocation3 + $0xa8] sm:$0xff] }
 0x609   : > { %6905 = vst.msk [vmem:[#allocation3 + $0x169] sm:$0xff] %vm579_vm3, %v6612_v30  ;;  %v6613_v48 = vmax.f32 %v6581_v63, 0.0  ;;  %v6987_v47 = vld [vmem:[#allocation3 + $0x159] sm:$0xff]  ;;  %v6934_v1 = vld [vmem:[#allocation3 + $0x128] sm:$0xff]  ;;  %v6937_v34 = vld [vmem:[#allocation3 + $0x150] sm:$0xff] }
 0x60a   : > { %v6631_v33 = vpack.c.bf16 %v6615_v53, %v6614_v26  ;;  %6908 = vst.msk [vmem:[#allocation3 + $0x189] sm:$0xff] %vm579_vm3, %v6615_v53  ;;  %v6985_v18 = vld [vmem:[#allocation3 + $0x141] sm:$0xff]  ;;  %v14951_v25 = vpack.c.bf16 %v6987_v47, %v6986_v41  ;;  %v6930_v47 = vld [vmem:[#allocation3 + $0xf8] sm:$0xff]  ;;  %v6932_v41 = vld [vmem:[#allocation3 + $0x110] sm:$0xff] }
 0x60b   : > { %v6630_v20 = vpack.c.bf16 %v6613_v48, %v6612_v30  ;;  %6906 = vst.msk [vmem:[#allocation3 + $0x171] sm:$0xff] %vm579_vm3, %v6613_v48  ;;  %v14949_v21 = vpack.c.bf16 %v6985_v18, %v6984_v51  ;;  %v6926_v26 = vld [vmem:[#allocation3 + $0xc8] sm:$0xff]  ;;  %v14997_v30 = vpack.c.bf16 %v6924_v60, %v6923_v32  ;;  %v6925_v63 = vld [vmem:[#allocation3 + $0xc0] sm:$0xff]  ;;  %v6929_v18 = vld [vmem:[#allocation3 + $0xf0] sm:$0xff] }
 0x60c   : > { %v14999_v53 = vpack.c.bf16 %v6926_v26, %v6925_v63  ;;  %v6928_v48 = vld [vmem:[#allocation3 + $0xe0] sm:$0xff]  ;;  %v6931_v29 = vld [vmem:[#allocation3 + $0x108] sm:$0xff]  ;;  %v6938_v57 = vld [vmem:[#allocation3 + $0x158] sm:$0xff] }
 0x60d   : > { %11886 = vmatprep.mubr.msk.bf16.mxu1 %vm579_vm3, %v6630_v20  ;;  %11917 = vmatmul.mubr.msk.bf16.gmra.mrb[56].mxu0 %vm579_vm3, %v14949_v21  ;;  %v15007_v20 = vpack.c.bf16 %v6930_v47, %v6929_v18  ;;  %v6936_v39 = vld [vmem:[#allocation3 + $0x140] sm:$0xff]  ;;  %v6935_v35 = vld [vmem:[#allocation3 + $0x138] sm:$0xff]  ;;  %v15023_v56 = vpack.c.bf16 %v6938_v57, %v6937_v34  ;;  %v7438_v18 = vld [vmem:[#allocation3 + $0x4a] sm:$0xff] }
 0x60e   : > { %11887 = vmatmul.mubr.msk.bf16.gmra.mrb[60].mxu1 %vm579_vm3, %v6631_v33  ;;  %11920 = vmatprep.mubr.msk.bf16.mxu0 %vm579_vm3, %v14951_v25  ;;  %v6927_v33 = vld [vmem:[#allocation3 + $0xd8] sm:$0xff]  ;;  %v7432_v27 = vld [vmem:[#allocation3 + $0x2] sm:$0xff] }
 0x60f   : > { %v15005_v51 = vpack.c.bf16 %v6928_v48, %v6927_v33  ;;  %v7464_v7 = vpack.c.bf16 %v7433_v54, %v7432_v27  ;;  %v7434_v62 = vld [vmem:[#allocation3 + $0x1a] sm:$0xff]  ;;  %v7435_v60 = vld [vmem:[#allocation3 + $0x22] sm:$0xff]  ;;  %v7436_v26 = vld [vmem:[#allocation3 + $0x32] sm:$0xff]  ;;  %v7825_v48 = vsel %vm3511_vm2, %v14973_v36, 0 }
 0x610   : > { %v6988_v31 = vld [vmem:[#allocation3 + $0x169] sm:$0xff]  ;;  %v7437_v32 = vld [vmem:[#allocation3 + $0x3a] sm:$0xff]  ;;  %v15034_v63 = vpack.c.bf16 %v7435_v60, %v7434_v62 }
 0x611   : > { %v6939_v2 = vld [vmem:[#allocation3 + $0x168] sm:$0xff]  ;;  %v15038_v47 = vpack.c.bf16 %v7437_v32, %v7436_v26  ;;  %v10540_v33 = vld [vmem:[%s15591_s7 + $0x10] sm:$0xf] }
 0x612   : > { %v6989_v23 = vld [vmem:[#allocation3 + $0x171] sm:$0xff]  ;;  %v7443_v57 = vld [vmem:[#allocation3 + $0x82] sm:$0xff]  ;;  %v7445_v34 = vld [vmem:[#allocation3 + $0x9a] sm:$0xff] }
 0x613   : > { %v14959_v61 = vpack.c.bf16 %v6989_v23, %v6988_v31  ;;  %v15013_v31 = vpack.c.bf16 %v6932_v41, %v6931_v29  ;;  %v6933_v23 = vld [vmem:[#allocation3 + $0x120] sm:$0xff]  ;;  %v6940_v50 = vld [vmem:[#allocation3 + $0x170] sm:$0xff] }
 0x614   : > { %v15029_v22 = vpack.c.bf16 %v6940_v50, %v6939_v2  ;;  %v7439_v41 = vld [vmem:[#allocation3 + $0x52] sm:$0xff]  ;;  %v7441_v29 = vld [vmem:[#allocation3 + $0x6a] sm:$0xff]  ;;  %v7450_v32 = vld [vmem:[#allocation3 + $0xda] sm:$0xff] }
 0x615   : > { %11921 = vmatmul.mubr.msk.bf16.gmra.mrb[60].mxu0 %vm579_vm3, %v14959_v61  ;;  %v7446_v50 = vld [vmem:[#allocation3 + $0xaa] sm:$0xff]  ;;  %v7447_v2 = vld [vmem:[#allocation3 + $0xb2] sm:$0xff] }
 0x616   : > { %11926 = vmatprep.mubr.msk.bf16.mxu0 %vm579_vm3, %v6941_v49  ;;  %v15015_v49 = vpack.c.bf16 %v6934_v1, %v6933_v23  ;;  %v7440_v1 = vld [vmem:[#allocation3 + $0x62] sm:$0xff]  ;;  %v7449_v62 = vld [vmem:[#allocation3 + $0xca] sm:$0xff]  ;;  %v15064_v60 = vpack.c.bf16 %v7447_v2, %v7446_v50 }
 0x617   : > { %v15050_v23 = vpack.c.bf16 %v7441_v29, %v7440_v1 }
 0x61d   : > { %11927 = vmatmul.mubr.msk.bf16.vlgmr.msra.gmra.mrb[32].mxu0 %vm579_vm3, %v14964_v55 }
 0x61e   : > { %11959 = vmatpush3.bf16.msra.mxu0 %v7531_v9  ;;  %11930 = vmatprep.mubr.msk.bf16.mxu0 %vm579_vm3, %v14968_v58  ;;  %v15021_v9 = vpack.c.bf16 %v6936_v39, %v6935_v35  ;;  %v7442_v39 = vld [vmem:[#allocation3 + $0x7a] sm:$0xff]  ;;  %v7444_v35 = vld [vmem:[#allocation3 + $0x92] sm:$0xff] }
 0x61f   : > { %13110 = vmatprep.subr.msk.bf16.mxu0 %vm3511_vm2, %v14973_v36  ;;  %v15048_v36 = vpack.c.bf16 %v7439_v41, %v7438_v18  ;;  %v15056_v27 = vpack.c.bf16 %v7443_v57, %v7442_v39  ;;  %v15058_v54 = vpack.c.bf16 %v7445_v34, %v7444_v35  ;;  %v7452_v18 = vld [vmem:[#allocation3 + $0xf2] sm:$0xff]  ;;  %v7453_v41 = vld [vmem:[#allocation3 + $0xfa] sm:$0xff]  ;;  %v7454_v39 = vld [vmem:[#allocation3 + $0x10a] sm:$0xff] }
 0x620   : > { %v15074_v29 = vpack.c.bf16 %v7453_v41, %v7452_v18  ;;  %v7455_v57 = vld [vmem:[#allocation3 + $0x112] sm:$0xff]  ;;  %v7456_v35 = vld [vmem:[#allocation3 + $0x122] sm:$0xff]  ;;  %v7457_v34 = vld [vmem:[#allocation3 + $0x12a] sm:$0xff] }
 0x621   : > { %v15080_v50 = vpack.c.bf16 %v7455_v57, %v7454_v39  ;;  %v15082_v2 = vpack.c.bf16 %v7457_v34, %v7456_v35  ;;  %v7462_v39 = vld [vmem:[#allocation3 + $0x16a] sm:$0xff]  ;;  %v7463_v57 = vld [vmem:[#allocation3 + $0x172] sm:$0xff]  ;;  %v8119_v34 = vsel %vm3511_vm2, %v10540_v33, 0 }
 0x622   : > { %v15096_v35 = vpack.c.bf16 %v7463_v57, %v7462_v39  ;;  %v10608_v39 = vld [vmem:[%s15591_s7 + $0x20] sm:$0xf] }
 0x625   : > { %11931 = vmatmul.mubr.msk.bf16.gmra.mrb[36].mxu0 %vm579_vm3, %v14981_v42 }
 0x626   : > { %11934 = vmatprep.mubr.msk.bf16.mxu0 %vm579_vm3, %v14983_v24 }
 0x62d   : > { %11935 = vmatmul.mubr.msk.bf16.gmra.mrb[40].mxu0 %vm579_vm3, %v14989_v6 }
 0x62e   : > { %11938 = vmatprep.mubr.msk.bf16.mxu0 %vm579_vm3, %v14991_v28 }
 0x635   : > { %11939 = vmatmul.mubr.msk.bf16.gmra.mrb[44].mxu0 %vm579_vm3, %v14997_v30 }
 0x636   : > { %11942 = vmatprep.mubr.msk.bf16.mxu0 %vm579_vm3, %v14999_v53 }
 0x63d   : > { %11943 = vmatmul.mubr.msk.bf16.gmra.mrb[48].mxu0 %vm579_vm3, %v15005_v51 }
 0x63e   : > { %11946 = vmatprep.mubr.msk.bf16.mxu0 %vm579_vm3, %v15007_v20 }
 0x645   : > { %11947 = vmatmul.mubr.msk.bf16.gmra.mrb[52].mxu0 %vm579_vm3, %v15013_v31 }
 0x646   : > { %11950 = vmatprep.mubr.msk.bf16.mxu0 %vm579_vm3, %v15015_v49 }
 0x64d   : > { %11951 = vmatmul.mubr.msk.bf16.gmra.mrb[56].mxu0 %vm579_vm3, %v15021_v9 }
 0x64e   : > { %11954 = vmatprep.mubr.msk.bf16.mxu0 %vm579_vm3, %v15023_v56 }
 0x655   : > { %11955 = vmatmul.mubr.msk.bf16.gmra.mrb[60].mxu0 %vm579_vm3, %v15029_v22 }
 0x656   : > { %11960 = vmatprep.mubr.msk.bf16.mxu0 %vm579_vm3, %v7464_v7  ;;  %v7448_v7 = vld [vmem:[#allocation3 + $0xc2] sm:$0xff] }
 0x657   : > { %v15066_v26 = vpack.c.bf16 %v7449_v62, %v7448_v7  ;;  %v7458_v7 = vld [vmem:[#allocation3 + $0x13a] sm:$0xff]  ;;  %v7459_v62 = vld [vmem:[#allocation3 + $0x142] sm:$0xff] }
 0x658   : > { %v15088_v18 = vpack.c.bf16 %v7459_v62, %v7458_v7  ;;  %v10557_v7 = vld [vmem:[%s15591_s7 + $0x14] sm:$0xf] }
 0x65d   : > { %11961 = vmatmul.mubr.msk.bf16.vlgmr.msra.gmra.mrb[32].mxu0 %vm579_vm3, %v15034_v63 }
 0x65e   : > { %11993 = vmatpush3.bf16.msra.mxu0 %v7825_v48  ;;  %11964 = vmatprep.mubr.msk.bf16.mxu0 %vm579_vm3, %v15038_v47  ;;  %v7451_v48 = vld [vmem:[#allocation3 + $0xe2] sm:$0xff] }
 0x65f   : > { %13111 = vmatprep.subr.msk.bf16.mxu0 %vm3511_vm2, %v10540_v33  ;;  %v15072_v1 = vpack.c.bf16 %v7451_v48, %v7450_v32  ;;  %v7460_v32 = vld [vmem:[#allocation3 + $0x152] sm:$0xff]  ;;  %v7461_v48 = vld [vmem:[#allocation3 + $0x15a] sm:$0xff] }
 0x660   : > { %v15090_v41 = vpack.c.bf16 %v7461_v48, %v7460_v32  ;;  %v7756_v33 = vld [vmem:[#allocation3 + $0x180] sm:$0xff]  ;;  %v8413_v32 = vsel %vm3511_vm2, %v10557_v7, 0  ;;  %v10574_v48 = vld [vmem:[%s15591_s7 + $0x18] sm:$0xf] }
 0x665   : > { %11965 = vmatmul.mubr.msk.bf16.gmra.mrb[36].mxu0 %vm579_vm3, %v15048_v36 }
 0x666   : > { %11968 = vmatprep.mubr.msk.bf16.mxu0 %vm579_vm3, %v15050_v23 }
 0x66d   : > { %11969 = vmatmul.mubr.msk.bf16.gmra.mrb[40].mxu0 %vm579_vm3, %v15056_v27 }
 0x66e   : > { %11972 = vmatprep.mubr.msk.bf16.mxu0 %vm579_vm3, %v15058_v54 }
 0x675   : > { %11973 = vmatmul.mubr.msk.bf16.gmra.mrb[44].mxu0 %vm579_vm3, %v15064_v60 }
 0x676   : > { %11976 = vmatprep.mubr.msk.bf16.mxu0 %vm579_vm3, %v15066_v26 }
 0x67d   : > { %11977 = vmatmul.mubr.msk.bf16.gmra.mrb[48].mxu0 %vm579_vm3, %v15072_v1 }
 0x67e   : > { %11980 = vmatprep.mubr.msk.bf16.mxu0 %vm579_vm3, %v15074_v29 }
 0x685   : > { %11981 = vmatmul.mubr.msk.bf16.gmra.mrb[52].mxu0 %vm579_vm3, %v15080_v50 }
 0x686   : > { %11984 = vmatprep.mubr.msk.bf16.mxu0 %vm579_vm3, %v15082_v2 }
 0x68d   : > { %11985 = vmatmul.mubr.msk.bf16.gmra.mrb[56].mxu0 %vm579_vm3, %v15088_v18 }
 0x68e   : > { %11988 = vmatprep.mubr.msk.bf16.mxu0 %vm579_vm3, %v15090_v41 }
 0x695   : > { %11989 = vmatmul.mubr.msk.bf16.gmra.mrb[60].mxu0 %vm579_vm3, %v15096_v35 }
 0x696   : > { %11994 = vmatprep.mubr.msk.bf16.mxu0 %vm579_vm3, %v14964_v55  ;;  %v7757_v55 = vld [vmem:[#allocation3 + $0x188] sm:$0xff] }
 0x697   : > { %v15135_v62 = vpack.c.bf16 %v7757_v55, %v7756_v33  ;;  %v8908_v55 = vld [vmem:[#allocation3 + $0x79] sm:$0xff] }
 0x69d   : > { %11995 = vmatmul.mubr.msk.bf16.vlgmr.msra.gmra.mrb[32].mxu0 %vm579_vm3, %v14968_v58 }
 0x69e   : > { %12027 = vmatpush3.bf16.msra.mxu0 %v8119_v34  ;;  %11998 = vmatprep.mubr.msk.bf16.mxu0 %vm579_vm3, %v14981_v42  ;;  %v8909_v34 = vld [vmem:[#allocation3 + $0x81] sm:$0xff] }
 0x69f   : > { %13112 = vmatprep.subr.msk.bf16.mxu0 %vm3511_vm2, %v10557_v7  ;;  %v8911_v7 = vld [vmem:[#allocation3 + $0x99] sm:$0xff]  ;;  %v8937_v33 = vpack.c.bf16 %v8909_v34, %v8908_v55 }
 0x6a5   : > { %11999 = vmatmul.mubr.msk.bf16.gmra.mrb[36].mxu0 %vm579_vm3, %v14983_v24 }
 0x6a6   : > { %12002 = vmatprep.mubr.msk.bf16.mxu0 %vm579_vm3, %v14989_v6 }
 0x6ad   : > { %12003 = vmatmul.mubr.msk.bf16.gmra.mrb[40].mxu0 %vm579_vm3, %v14991_v28 }
 0x6ae   : > { %12006 = vmatprep.mubr.msk.bf16.mxu0 %vm579_vm3, %v14997_v30 }
 0x6b5   : > { %12007 = vmatmul.mubr.msk.bf16.gmra.mrb[44].mxu0 %vm579_vm3, %v14999_v53 }
 0x6b6   : > { %12010 = vmatprep.mubr.msk.bf16.mxu0 %vm579_vm3, %v15005_v51 }
 0x6bd   : > { %12011 = vmatmul.mubr.msk.bf16.gmra.mrb[48].mxu0 %vm579_vm3, %v15007_v20 }
 0x6be   : > { %12014 = vmatprep.mubr.msk.bf16.mxu0 %vm579_vm3, %v15013_v31 }
 0x6c5   : > { %12015 = vmatmul.mubr.msk.bf16.gmra.mrb[52].mxu0 %vm579_vm3, %v15015_v49 }
 0x6c6   : > { %12018 = vmatprep.mubr.msk.bf16.mxu0 %vm579_vm3, %v15021_v9 }
 0x6cd   : > { %12019 = vmatmul.mubr.msk.bf16.gmra.mrb[56].mxu0 %vm579_vm3, %v15023_v56 }
 0x6ce   : > { %12022 = vmatprep.mubr.msk.bf16.mxu0 %vm579_vm3, %v15029_v22 }
 0x6d5   : > { %12023 = vmatmul.mubr.msk.bf16.gmra.mrb[60].mxu0 %vm579_vm3, %v15135_v62 }
 0x6d6   : > { %12028 = vmatprep.mubr.msk.bf16.mxu0 %vm579_vm3, %v14811_v37  ;;  %v8051_v37 = vld [vmem:[#allocation3 + $0x189] sm:$0xff] }
 0x6dd   : > { %12029 = vmatmul.mubr.msk.bf16.vlgmr.msra.gmra.mrb[32].mxu0 %vm579_vm3, %v14826_v44  ;;  %v8050_v44 = vld [vmem:[#allocation3 + $0x181] sm:$0xff] }
 0x6de   : > { %12061 = vmatpush3.bf16.msra.mxu0 %v8413_v32  ;;  %12032 = vmatprep.mubr.msk.bf16.mxu0 %vm579_vm3, %v14841_v52  ;;  %v15174_v52 = vpack.c.bf16 %v8051_v37, %v8050_v44  ;;  %v8915_v37 = vld [vmem:[#allocation3 + $0xc9] sm:$0xff] }
 0x6df   : > { %13113 = vmatprep.subr.msk.bf16.mxu0 %vm3511_vm2, %v10574_v48  ;;  %v8912_v44 = vld [vmem:[#allocation3 + $0xa9] sm:$0xff] }
 0x6e5   : > { %12033 = vmatmul.mubr.msk.bf16.gmra.mrb[36].mxu0 %vm579_vm3, %v14845_v46  ;;  %v8707_v46 = vsel %vm3511_vm2, %v10574_v48, 0  ;;  %v8913_v48 = vld [vmem:[#allocation3 + $0xb1] sm:$0xff] }
 0x6e6   : > { %12036 = vmatprep.mubr.msk.bf16.mxu0 %vm579_vm3, %v14863_v19  ;;  %v10591_v19 = vld [vmem:[%s15591_s7 + $0x1c] sm:$0xf] }
 0x6ed   : > { %12037 = vmatmul.mubr.msk.bf16.gmra.mrb[40].mxu0 %vm579_vm3, %v14867_v38  ;;  %v8344_v38 = vld [vmem:[#allocation3 + $0x182] sm:$0xff] }
 0x6ee   : > { %12040 = vmatprep.mubr.msk.bf16.mxu0 %vm579_vm3, %v14885_v43  ;;  %v8345_v43 = vld [vmem:[#allocation3 + $0x18a] sm:$0xff] }
 0x6f5   : > { %12041 = vmatmul.mubr.msk.bf16.gmra.mrb[44].mxu0 %vm579_vm3, %v14889_v59  ;;  %v15213_v59 = vpack.c.bf16 %v8345_v43, %v8344_v38 }
 0x6f6   : > { %12044 = vmatprep.mubr.msk.bf16.mxu0 %vm579_vm3, %v14907_v15 }
 0x6fd   : > { %12045 = vmatmul.mubr.msk.bf16.gmra.mrb[48].mxu0 %vm579_vm3, %v14911_v45 }
 0x6fe   : > { %12048 = vmatprep.mubr.msk.bf16.mxu0 %vm579_vm3, %v14929_v40 }
 0x705   : > { %12049 = vmatmul.mubr.msk.bf16.gmra.mrb[52].mxu0 %vm579_vm3, %v14933_v0 }
 0x706   : > { %12052 = vmatprep.mubr.msk.bf16.mxu0 %vm579_vm3, %v14949_v21 }
 0x70d   : > { %12053 = vmatmul.mubr.msk.bf16.gmra.mrb[56].mxu0 %vm579_vm3, %v14951_v25 }
 0x70e   : > { %12056 = vmatprep.mubr.msk.bf16.mxu0 %vm579_vm3, %v14959_v61 }
 0x715   : > { %12057 = vmatmul.mubr.msk.bf16.gmra.mrb[60].mxu0 %vm579_vm3, %v15174_v52 }
 0x716   : > { %12062 = vmatprep.mubr.msk.bf16.mxu0 %vm579_vm3, %v15034_v63  ;;  %v9001_v63 = vsel %vm3511_vm2, %v10591_v19, 0 }
 0x71d   : > { %12063 = vmatmul.mubr.msk.bf16.vlgmr.msra.gmra.mrb[32].mxu0 %vm579_vm3, %v15038_v47 }
 0x71e   : > { %12095 = vmatpush3.bf16.msra.mxu0 %v8707_v46  ;;  %12066 = vmatprep.mubr.msk.bf16.mxu0 %vm579_vm3, %v15048_v36  ;;  %v8939_v46 = vpack.c.bf16 %v8913_v48, %v8912_v44 }
 0x71f   : > { %13114 = vmatprep.subr.msk.bf16.mxu0 %vm3511_vm2, %v10591_v19  ;;  %v8914_v19 = vld [vmem:[#allocation3 + $0xc1] sm:$0xff] }
 0x720   : > { %v8940_v38 = vpack.c.bf16 %v8915_v37, %v8914_v19 }
 0x725   : > { %12067 = vmatmul.mubr.msk.bf16.gmra.mrb[36].mxu0 %vm579_vm3, %v15050_v23 }
 0x726   : > { %12070 = vmatprep.mubr.msk.bf16.mxu0 %vm579_vm3, %v15056_v27 }
 0x72d   : > { %12071 = vmatmul.mubr.msk.bf16.gmra.mrb[40].mxu0 %vm579_vm3, %v15058_v54 }
 0x72e   : > { %12074 = vmatprep.mubr.msk.bf16.mxu0 %vm579_vm3, %v15064_v60 }
 0x735   : > { %12075 = vmatmul.mubr.msk.bf16.gmra.mrb[44].mxu0 %vm579_vm3, %v15066_v26 }
 0x736   : > { %12078 = vmatprep.mubr.msk.bf16.mxu0 %vm579_vm3, %v15072_v1 }
 0x73d   : > { %12079 = vmatmul.mubr.msk.bf16.gmra.mrb[48].mxu0 %vm579_vm3, %v15074_v29 }
 0x73e   : > { %12082 = vmatprep.mubr.msk.bf16.mxu0 %vm579_vm3, %v15080_v50 }
 0x745   : > { %12083 = vmatmul.mubr.msk.bf16.gmra.mrb[52].mxu0 %vm579_vm3, %v15082_v2 }
 0x746   : > { %12086 = vmatprep.mubr.msk.bf16.mxu0 %vm579_vm3, %v15088_v18 }
 0x74d   : > { %12087 = vmatmul.mubr.msk.bf16.gmra.mrb[56].mxu0 %vm579_vm3, %v15090_v41 }
 0x74e   : > { %12090 = vmatprep.mubr.msk.bf16.mxu0 %vm579_vm3, %v15096_v35 }
 0x755   : > { %12091 = vmatmul.mubr.msk.bf16.gmra.mrb[60].mxu0 %vm579_vm3, %v15213_v59 }
 0x756   : > { %12096 = vmatprep.mubr.msk.bf16.mxu0 %vm579_vm3, %v14968_v58  ;;  %v8638_v58 = vld [vmem:[#allocation3 + $0x198] sm:$0xff] }
 0x75d   : > { %12097 = vmatmul.mubr.msk.bf16.vlgmr.msra.gmra.mrb[32].mxu0 %vm579_vm3, %v14981_v42  ;;  %v8639_v42 = vld [vmem:[#allocation3 + $0x1a0] sm:$0xff] }
 0x75e   : > { %12129 = vmatpush3.bf16.msra.mxu0 %v9001_v63  ;;  %12100 = vmatprep.mubr.msk.bf16.mxu0 %vm579_vm3, %v14983_v24  ;;  %v8655_v24 = vpack.c.bf16 %v8639_v42, %v8638_v58 }
 0x75f   : > { %13115 = vmatprep.subr.msk.bf16.mxu0 %vm3511_vm2, %v10608_v39 }
 0x765   : > { %12101 = vmatmul.mubr.msk.bf16.gmra.mrb[36].mxu0 %vm579_vm3, %v14989_v6  ;;  %v8903_v6 = vld [vmem:[#allocation3 + $0x39] sm:$0xff] }
 0x766   : > { %12104 = vmatprep.mubr.msk.bf16.mxu0 %vm579_vm3, %v14991_v28  ;;  %v8902_v28 = vld [vmem:[#allocation3 + $0x31] sm:$0xff] }
 0x76d   : > { %12105 = vmatmul.mubr.msk.bf16.gmra.mrb[40].mxu0 %vm579_vm3, %v14997_v30  ;;  %v8934_v30 = vpack.c.bf16 %v8903_v6, %v8902_v28 }
 0x76e   : > { %12108 = vmatprep.mubr.msk.bf16.mxu0 %vm579_vm3, %v14999_v53  ;;  %v9616_v53 = vld [vmem:[%s15597_s13] sm:$0xf] }
 0x76f   : > { %13116 = vmatprep.subr.msk.bf16.mxu1 %vm3511_vm2, %v9616_v53 }
 0x775   : > { %12109 = vmatmul.mubr.msk.bf16.gmra.mrb[44].mxu0 %vm579_vm3, %v15005_v51  ;;  %v9666_v51 = vsel %vm3511_vm2, %v9616_v53, 0 }
 0x776   : > { %12112 = vmatprep.mubr.msk.bf16.mxu0 %vm579_vm3, %v15007_v20  ;;  %12197 = vmatpush3.bf16.msra.mxu1 %v9666_v51  ;;  %v8905_v20 = vld [vmem:[#allocation3 + $0x51] sm:$0xff] }
 0x77d   : > { %12113 = vmatmul.mubr.msk.bf16.gmra.mrb[48].mxu0 %vm579_vm3, %v15013_v31  ;;  %v8907_v31 = vld [vmem:[#allocation3 + $0x69] sm:$0xff] }
 0x77e   : > { %12116 = vmatprep.mubr.msk.bf16.mxu0 %vm579_vm3, %v15015_v49  ;;  %v8904_v49 = vld [vmem:[#allocation3 + $0x49] sm:$0xff] }
 0x785   : > { %12117 = vmatmul.mubr.msk.bf16.gmra.mrb[52].mxu0 %vm579_vm3, %v15021_v9  ;;  %v8935_v9 = vpack.c.bf16 %v8905_v20, %v8904_v49 }
 0x786   : > { %12120 = vmatprep.mubr.msk.bf16.mxu0 %vm579_vm3, %v15023_v56  ;;  %v9295_v56 = vsel %vm3511_vm2, %v10608_v39, 0 }
 0x78d   : > { %12121 = vmatmul.mubr.msk.bf16.gmra.mrb[56].mxu0 %vm579_vm3, %v15029_v22  ;;  %v8906_v22 = vld [vmem:[#allocation3 + $0x61] sm:$0xff] }
 0x78e   : > { %12124 = vmatprep.mubr.msk.bf16.mxu0 %vm579_vm3, %v15135_v62  ;;  %v8936_v57 = vpack.c.bf16 %v8907_v31, %v8906_v22  ;;  %v8910_v62 = vld [vmem:[#allocation3 + $0x91] sm:$0xff] }
 0x78f   : > { %v8938_v32 = vpack.c.bf16 %v8911_v7, %v8910_v62 }
 0x795   : > { %12125 = vmatmul.mubr.msk.bf16.gmra.mrb[60].mxu0 %vm579_vm3, %v8655_v24 }
 0x796   : > { %12130 = vmatprep.mubr.msk.bf16.mxu0 %vm579_vm3, %v8934_v30 }
 0x79d   : > { %12131 = vmatmul.mubr.msk.bf16.vlgmr.msra.gmra.mrb[32].mxu0 %vm579_vm3, %v8935_v9 }
 0x79e   : > { %12163 = vmatpush3.bf16.msra.mxu0 %v9295_v56  ;;  %12134 = vmatprep.mubr.msk.bf16.mxu0 %vm579_vm3, %v8936_v57 }
 0x7a5   : > { %12135 = vmatmul.mubr.msk.bf16.gmra.mrb[36].mxu0 %vm579_vm3, %v8937_v33 }
 0x7a6   : > { %12138 = vmatprep.mubr.msk.bf16.mxu0 %vm579_vm3, %v8938_v32 }
 0x7ad   : > { %12139 = vmatmul.mubr.msk.bf16.gmra.mrb[40].mxu0 %vm579_vm3, %v8939_v46 }
 0x7ae   : > { %12142 = vmatprep.mubr.msk.bf16.mxu0 %vm579_vm3, %v8940_v38 }
 0x7b5   : > { %12143 = vmatmul.mubr.msk.bf16.gmra.mrb[44].mxu0 %vm579_vm3, %v14907_v15  ;;  %v8932_v15 = vld [vmem:[#allocation3 + $0x199] sm:$0xff] }
 0x7b6   : > { %12146 = vmatprep.mubr.msk.bf16.mxu0 %vm579_vm3, %v14911_v45  ;;  %v8933_v45 = vld [vmem:[#allocation3 + $0x1a1] sm:$0xff] }
 0x7b7   : > { %v8949_v43 = vpack.c.bf16 %v8933_v45, %v8932_v15 }
 0x7bd   : > { %12147 = vmatmul.mubr.msk.bf16.gmra.mrb[48].mxu0 %vm579_vm3, %v14929_v40  ;;  %v9226_v40 = vld [vmem:[#allocation3 + $0x19a] sm:$0xff] }
 0x7be   : > { %12150 = vmatprep.mubr.msk.bf16.mxu0 %vm579_vm3, %v14933_v0  ;;  %v9227_v0 = vld [vmem:[#allocation3 + $0x1a2] sm:$0xff] }
 0x7c5   : > { %12151 = vmatmul.mubr.msk.bf16.gmra.mrb[52].mxu0 %vm579_vm3, %v14949_v21  ;;  %v9243_v21 = vpack.c.bf16 %v9227_v0, %v9226_v40 }
 0x7c6   : > { %12154 = vmatprep.mubr.msk.bf16.mxu0 %vm579_vm3, %v14951_v25  ;;  %v15317_v25 = vld [vmem:[%s15592_s8] ss:$0 sm:$0xff] }
 0x7cd   : > { %12155 = vmatmul.mubr.msk.bf16.gmra.mrb[56].mxu0 %vm579_vm3, %v14959_v61 }
 0x7ce   : > { %12158 = vmatprep.mubr.msk.bf16.mxu0 %vm579_vm3, %v15174_v52 }
 0x7d5   : > { %12159 = vmatmul.mubr.msk.bf16.gmra.mrb[60].mxu0 %vm579_vm3, %v8949_v43 }
 0x7d6   : > { %12164 = vmatprep.mubr.msk.bf16.mxu0 %vm579_vm3, %v15038_v47  ;;  %v15322_v47 = vld [vmem:[%s15593_s9] ss:$0 sm:$0xff] }
 0x7dd   : > { %12165 = vmatmul.mubr.msk.bf16.vlgmr.msra.gmra.mrb[32].mxu0 %vm579_vm3, %v15048_v36 }
 0x7de   : > { %12168 = vmatprep.mubr.msk.bf16.mxu0 %vm579_vm3, %v15050_v23 }
 0x7e5   : > { %12169 = vmatmul.mubr.msk.bf16.gmra.mrb[36].mxu0 %vm579_vm3, %v15056_v27 }
 0x7e6   : > { %12172 = vmatprep.mubr.msk.bf16.mxu0 %vm579_vm3, %v15058_v54 }
 0x7ed   : > { %12173 = vmatmul.mubr.msk.bf16.gmra.mrb[40].mxu0 %vm579_vm3, %v15064_v60 }
 0x7ee   : > { %12176 = vmatprep.mubr.msk.bf16.mxu0 %vm579_vm3, %v15066_v26 }
 0x7f5   : > { %12177 = vmatmul.mubr.msk.bf16.gmra.mrb[44].mxu0 %vm579_vm3, %v15072_v1 }
 0x7f6   : > { %12180 = vmatprep.mubr.msk.bf16.mxu0 %vm579_vm3, %v15074_v29 }
 0x7fd   : > { %12181 = vmatmul.mubr.msk.bf16.gmra.mrb[48].mxu0 %vm579_vm3, %v15080_v50 }
 0x7fe   : > { %12184 = vmatprep.mubr.msk.bf16.mxu0 %vm579_vm3, %v15082_v2 }
 0x805   : > { %12185 = vmatmul.mubr.msk.bf16.gmra.mrb[52].mxu0 %vm579_vm3, %v15088_v18 }
 0x806   : > { %12188 = vmatprep.mubr.msk.bf16.mxu0 %vm579_vm3, %v15090_v41 }
 0x80d   : > { %12189 = vmatmul.mubr.msk.bf16.gmra.mrb[56].mxu0 %vm579_vm3, %v15096_v35 }
 0x80e   : > { %12192 = vmatprep.mubr.msk.bf16.mxu0 %vm579_vm3, %v15213_v59 }
 0x815   : > { %12193 = vmatmul.mubr.msk.bf16.gmra.mrb[60].mxu0 %vm579_vm3, %v9243_v21 }
 0x8b0   : > { %v12166_v61 = vpop.f32.mrb[32].mxu0 }
 0x8b1   : > { %v9499_v36 = vmul.f32 %v12166_v61, %v15317_v25  ;;  %v9331_v23 = vpop.f32.mrb[33].mxu0 }
 0x8b2   : > { %v9497_v27 = vmul.f32 %v15317_v25, %v9331_v23  ;;  %v12167_v54 = vpop.f32.mrb[34].mxu0 }
 0x8b3   : > { %v9538_v60 = vadd.f32 %v15322_v47, %v9499_v36  ;;  %v9500_v26 = vmul.f32 %v12167_v54, %v15317_v25  ;;  %v9334_v1 = vpop.f32.mrb[35].mxu0 }
 0x8b4   : > { %v9536_v29 = vadd.f32 %v15322_v47, %v9497_v27  ;;  %v9498_v50 = vmul.f32 %v15317_v25, %v9334_v1 }
 0x8b5   : > { %v9539_v2 = vadd.f32 %v15322_v47, %v9500_v26  ;;  %v9570_v41 = vmax.f32 %v9538_v60, 0.0 }
 0x8b6   : > { %v9537_v18 = vadd.f32 %v15322_v47, %v9498_v50  ;;  %v9568_v52 = vmax.f32 %v9536_v29, 0.0 }
 0x8b7   : > { %v9571_v35 = vmax.f32 %v9539_v2, 0.0 }
 0x8b8   : > { %v9569_v59 = vmax.f32 %v9537_v18, 0.0  ;;  %v12170_v63 = vpop.f32.mrb[36].mxu0 }
 0x8b9   : > { %v9601_v39 = vpack.c.bf16 %v9571_v35, %v9570_v41  ;;  %v9503_v58 = vmul.f32 %v12170_v63, %v15317_v25  ;;  %v9347_v42 = vpop.f32.mrb[37].mxu0 }
 0x8ba   : > { %v9600_v24 = vpack.c.bf16 %v9569_v59, %v9568_v52  ;;  %v9501_v6 = vmul.f32 %v15317_v25, %v9347_v42  ;;  %v12171_v28 = vpop.f32.mrb[38].mxu0 }
 0x8bb   : > { %v9542_v30 = vadd.f32 %v15322_v47, %v9503_v58  ;;  %v9504_v53 = vmul.f32 %v12171_v28, %v15317_v25  ;;  %v9350_v51 = vpop.f32.mrb[39].mxu0 }
 0x8bc   : > { %v9540_v20 = vadd.f32 %v15322_v47, %v9501_v6  ;;  %v9502_v31 = vmul.f32 %v15317_v25, %v9350_v51  ;;  %12198 = vmatprep.mubr.msk.bf16.mxu1 %vm579_vm3, %v9600_v24 }
 0x8bd   : > { %v9543_v49 = vadd.f32 %v15322_v47, %v9504_v53  ;;  %12199 = vmatmul.mubr.msk.bf16.vlgmr.msra.gmra.mrb[32].mxu1 %vm579_vm3, %v9601_v39  ;;  %v9574_v56 = vmax.f32 %v9542_v30, 0.0 }
 0x8be   : > { %v9541_v9 = vadd.f32 %v15322_v47, %v9502_v31  ;;  %v9572_v57 = vmax.f32 %v9540_v20, 0.0 }
 0x8bf   : > { %v9575_v22 = vmax.f32 %v9543_v49, 0.0 }
 0x8c0   : > { %v9573_v34 = vmax.f32 %v9541_v9, 0.0  ;;  %v12174_v7 = vpop.f32.mrb[40].mxu0 }
 0x8c1   : > { %v9603_v55 = vpack.c.bf16 %v9575_v22, %v9574_v56  ;;  %v9507_v33 = vmul.f32 %v12174_v7, %v15317_v25  ;;  %v9363_v62 = vpop.f32.mrb[41].mxu0 }
 0x8c2   : > { %v9602_v32 = vpack.c.bf16 %v9573_v34, %v9572_v57  ;;  %v9505_v48 = vmul.f32 %v15317_v25, %v9363_v62  ;;  %v12175_v37 = vpop.f32.mrb[42].mxu0 }
 0x8c3   : > { %v9546_v44 = vadd.f32 %v15322_v47, %v9507_v33  ;;  %v9508_v46 = vmul.f32 %v12175_v37, %v15317_v25  ;;  %v9366_v19 = vpop.f32.mrb[43].mxu0 }
 0x8c4   : > { %v9544_v38 = vadd.f32 %v15322_v47, %v9505_v48  ;;  %v9506_v15 = vmul.f32 %v15317_v25, %v9366_v19  ;;  %12202 = vmatprep.mubr.msk.bf16.mxu1 %vm579_vm3, %v9602_v32 }
 0x8c5   : > { %v9547_v45 = vadd.f32 %v15322_v47, %v9508_v46  ;;  %12203 = vmatmul.mubr.msk.bf16.gmra.mrb[36].mxu1 %vm579_vm3, %v9603_v55  ;;  %v9578_v40 = vmax.f32 %v9546_v44, 0.0 }
 0x8c6   : > { %v9545_v43 = vadd.f32 %v15322_v47, %v9506_v15  ;;  %v9576_v21 = vmax.f32 %v9544_v38, 0.0 }
 0x8c7   : > { %v9579_v0 = vmax.f32 %v9547_v45, 0.0 }
 0x8c8   : > { %v9577_v61 = vmax.f32 %v9545_v43, 0.0  ;;  %v12178_v36 = vpop.f32.mrb[44].mxu0 }
 0x8c9   : > { %v9605_v23 = vpack.c.bf16 %v9579_v0, %v9578_v40  ;;  %v9511_v27 = vmul.f32 %v12178_v36, %v15317_v25  ;;  %v9379_v54 = vpop.f32.mrb[45].mxu0 }
 0x8ca   : > { %v9604_v60 = vpack.c.bf16 %v9577_v61, %v9576_v21  ;;  %v9509_v26 = vmul.f32 %v15317_v25, %v9379_v54  ;;  %v12179_v1 = vpop.f32.mrb[46].mxu0 }
 0x8cb   : > { %v9550_v29 = vadd.f32 %v15322_v47, %v9511_v27  ;;  %v9512_v50 = vmul.f32 %v12179_v1, %v15317_v25  ;;  %v9382_v2 = vpop.f32.mrb[47].mxu0 }
 0x8cc   : > { %v9548_v18 = vadd.f32 %v15322_v47, %v9509_v26  ;;  %v9510_v41 = vmul.f32 %v15317_v25, %v9382_v2  ;;  %12206 = vmatprep.mubr.msk.bf16.mxu1 %vm579_vm3, %v9604_v60 }
 0x8cd   : > { %v9551_v35 = vadd.f32 %v15322_v47, %v9512_v50  ;;  %12207 = vmatmul.mubr.msk.bf16.gmra.mrb[40].mxu1 %vm579_vm3, %v9605_v23  ;;  %v9582_v59 = vmax.f32 %v9550_v29, 0.0 }
 0x8ce   : > { %v9549_v52 = vadd.f32 %v15322_v47, %v9510_v41  ;;  %v9580_v39 = vmax.f32 %v9548_v18, 0.0 }
 0x8cf   : > { %v9583_v63 = vmax.f32 %v9551_v35, 0.0 }
 0x8d0   : > { %v9581_v58 = vmax.f32 %v9549_v52, 0.0  ;;  %v12182_v42 = vpop.f32.mrb[48].mxu0 }
 0x8d1   : > { %v9607_v24 = vpack.c.bf16 %v9583_v63, %v9582_v59  ;;  %v9515_v6 = vmul.f32 %v12182_v42, %v15317_v25  ;;  %v9395_v28 = vpop.f32.mrb[49].mxu0 }
 0x8d2   : > { %v9606_v30 = vpack.c.bf16 %v9581_v58, %v9580_v39  ;;  %v9513_v53 = vmul.f32 %v15317_v25, %v9395_v28  ;;  %v12183_v51 = vpop.f32.mrb[50].mxu0 }
 0x8d3   : > { %v9554_v20 = vadd.f32 %v15322_v47, %v9515_v6  ;;  %v9516_v31 = vmul.f32 %v12183_v51, %v15317_v25  ;;  %v9398_v49 = vpop.f32.mrb[51].mxu0 }
 0x8d4   : > { %v9552_v9 = vadd.f32 %v15322_v47, %v9513_v53  ;;  %v9514_v56 = vmul.f32 %v15317_v25, %v9398_v49  ;;  %12210 = vmatprep.mubr.msk.bf16.mxu1 %vm579_vm3, %v9606_v30 }
 0x8d5   : > { %v9555_v22 = vadd.f32 %v15322_v47, %v9516_v31  ;;  %12211 = vmatmul.mubr.msk.bf16.gmra.mrb[44].mxu1 %vm579_vm3, %v9607_v24  ;;  %v9586_v34 = vmax.f32 %v9554_v20, 0.0 }
 0x8d6   : > { %v9553_v57 = vadd.f32 %v15322_v47, %v9514_v56  ;;  %v9584_v55 = vmax.f32 %v9552_v9, 0.0 }
 0x8d7   : > { %v9587_v7 = vmax.f32 %v9555_v22, 0.0 }
 0x8d8   : > { %v9585_v33 = vmax.f32 %v9553_v57, 0.0  ;;  %v12186_v62 = vpop.f32.mrb[52].mxu0 }
 0x8d9   : > { %v9609_v32 = vpack.c.bf16 %v9587_v7, %v9586_v34  ;;  %v9519_v48 = vmul.f32 %v12186_v62, %v15317_v25  ;;  %v9411_v37 = vpop.f32.mrb[53].mxu0 }
 0x8da   : > { %v9608_v44 = vpack.c.bf16 %v9585_v33, %v9584_v55  ;;  %v9517_v46 = vmul.f32 %v15317_v25, %v9411_v37  ;;  %v12187_v19 = vpop.f32.mrb[54].mxu0 }
 0x8db   : > { %v9558_v38 = vadd.f32 %v15322_v47, %v9519_v48  ;;  %v9520_v15 = vmul.f32 %v12187_v19, %v15317_v25  ;;  %v9414_v45 = vpop.f32.mrb[55].mxu0 }
 0x8dc   : > { %v9556_v43 = vadd.f32 %v15322_v47, %v9517_v46  ;;  %v9518_v40 = vmul.f32 %v15317_v25, %v9414_v45  ;;  %12214 = vmatprep.mubr.msk.bf16.mxu1 %vm579_vm3, %v9608_v44 }
 0x8dd   : > { %v9559_v0 = vadd.f32 %v15322_v47, %v9520_v15  ;;  %12215 = vmatmul.mubr.msk.bf16.gmra.mrb[48].mxu1 %vm579_vm3, %v9609_v32  ;;  %v9590_v61 = vmax.f32 %v9558_v38, 0.0 }
 0x8de   : > { %v9557_v21 = vadd.f32 %v15322_v47, %v9518_v40  ;;  %v9588_v23 = vmax.f32 %v9556_v43, 0.0 }
 0x8df   : > { %v9591_v36 = vmax.f32 %v9559_v0, 0.0 }
 0x8e0   : > { %v9589_v27 = vmax.f32 %v9557_v21, 0.0  ;;  %v12190_v54 = vpop.f32.mrb[56].mxu0 }
 0x8e1   : > { %v9611_v60 = vpack.c.bf16 %v9591_v36, %v9590_v61  ;;  %v9523_v26 = vmul.f32 %v12190_v54, %v15317_v25  ;;  %v9427_v1 = vpop.f32.mrb[57].mxu0 }
 0x8e2   : > { %v9610_v29 = vpack.c.bf16 %v9589_v27, %v9588_v23  ;;  %v9521_v50 = vmul.f32 %v15317_v25, %v9427_v1  ;;  %v12191_v2 = vpop.f32.mrb[58].mxu0 }
 0x8e3   : > { %v9562_v18 = vadd.f32 %v15322_v47, %v9523_v26  ;;  %v9524_v41 = vmul.f32 %v12191_v2, %v15317_v25  ;;  %v9430_v35 = vpop.f32.mrb[59].mxu0 }
 0x8e4   : > { %v9560_v52 = vadd.f32 %v15322_v47, %v9521_v50  ;;  %v9522_v59 = vmul.f32 %v15317_v25, %v9430_v35  ;;  %12218 = vmatprep.mubr.msk.bf16.mxu1 %vm579_vm3, %v9610_v29 }
 0x8e5   : > { %v9563_v63 = vadd.f32 %v15322_v47, %v9524_v41  ;;  %12219 = vmatmul.mubr.msk.bf16.gmra.mrb[52].mxu1 %vm579_vm3, %v9611_v60  ;;  %v9594_v58 = vmax.f32 %v9562_v18, 0.0 }
 0x8e6   : > { %v9561_v39 = vadd.f32 %v15322_v47, %v9522_v59  ;;  %v9592_v24 = vmax.f32 %v9560_v52, 0.0 }
 0x8e7   : > { %v9595_v42 = vmax.f32 %v9563_v63, 0.0 }
 0x8e8   : > { %v9593_v6 = vmax.f32 %v9561_v39, 0.0  ;;  %v12194_v28 = vpop.f32.mrb[60].mxu0 }
 0x8e9   : > { %v9613_v30 = vpack.c.bf16 %v9595_v42, %v9594_v58  ;;  %v9527_v53 = vmul.f32 %v12194_v28, %v15317_v25  ;;  %v9443_v51 = vpop.f32.mrb[61].mxu0 }
 0x8ea   : > { %v9612_v20 = vpack.c.bf16 %v9593_v6, %v9592_v24  ;;  %v9525_v31 = vmul.f32 %v15317_v25, %v9443_v51  ;;  %v12195_v49 = vpop.f32.mrb[62].mxu0 }
 0x8eb   : > { %v9566_v9 = vadd.f32 %v15322_v47, %v9527_v53  ;;  %v9528_v56 = vmul.f32 %v12195_v49, %v15317_v25  ;;  %v9446_v22 = vpop.f32.mrb[63].mxu0 }
 0x8ec   : > { %v9564_v57 = vadd.f32 %v15322_v47, %v9525_v31  ;;  %v9526_v34 = vmul.f32 %v15317_v25, %v9446_v22  ;;  %12222 = vmatprep.mubr.msk.bf16.mxu1 %vm579_vm3, %v9612_v20  ;;  %v15407_v25 = vld [vmem:[%s15598_s14] ss:$0 sm:$0xff] }
 0x8ed   : > { %v9567_v7 = vadd.f32 %v15322_v47, %v9528_v56  ;;  %12223 = vmatmul.mubr.msk.bf16.gmra.mrb[56].mxu1 %vm579_vm3, %v9613_v30  ;;  %v9598_v33 = vmax.f32 %v9566_v9, 0.0 }
 0x8ee   : > { %v9565_v55 = vadd.f32 %v15322_v47, %v9526_v34  ;;  %v9596_v32 = vmax.f32 %v9564_v57, 0.0  ;;  %v15412_v47 = vld [vmem:[%s15599_s15] ss:$0 sm:$0xff] }
 0x8ef   : > { %v9599_v62 = vmax.f32 %v9567_v7, 0.0 }
 0x8f0   : > { %v9597_v48 = vmax.f32 %v9565_v55, 0.0 }
 0x8f1   : > { %v9615_v37 = vpack.c.bf16 %v9599_v62, %v9598_v33 }
 0x8f2   : > { %v9614_v44 = vpack.c.bf16 %v9597_v48, %v9596_v32 }
 0x8f4   : > { %12226 = vmatprep.mubr.msk.bf16.mxu1 %vm579_vm3, %v9614_v44 }
 0x8f5   : > { %12227 = vmatmul.mubr.msk.bf16.gmra.mrb[60].mxu1 %vm579_vm3, %v9615_v37 }
 0x990   : > { %v12200_v46 = vpop.f32.mrb[32].mxu1 }
 0x991   : > { %v9870_v19 = vmul.f32 %v12200_v46, %v15407_v25  ;;  %v9702_v38 = vpop.f32.mrb[33].mxu1 }
 0x992   : > { %v9868_v15 = vmul.f32 %v15407_v25, %v9702_v38  ;;  %v12201_v45 = vpop.f32.mrb[34].mxu1 }
 0x993   : > { %v9909_v43 = vadd.f32 %v15412_v47, %v9870_v19  ;;  %v9871_v40 = vmul.f32 %v12201_v45, %v15407_v25  ;;  %v9705_v0 = vpop.f32.mrb[35].mxu1 }
 0x994   : > { %v9907_v21 = vadd.f32 %v15412_v47, %v9868_v15  ;;  %v9869_v61 = vmul.f32 %v15407_v25, %v9705_v0  ;;  %v15680_v15 = vld [vmem:[#allocation4_spill] sm:$0xff] }
 0x995   : > { %v9941_v36 = vmax.f32 %v9909_v43, 0.0  ;;  %v9910_v23 = vadd.f32 %v15412_v47, %v9871_v40 }
 0x996   : > { %v9939_v27 = vmax.f32 %v9907_v21, 0.0  ;;  %v9908_v54 = vadd.f32 %v15412_v47, %v9869_v61 }
 0x997   : > { %v9973_v60 = vadd.f32 %v9941_v36, %v13380_v5  ;;  %v9942_v26 = vmax.f32 %v9910_v23, 0.0 }
 0x998   : > { %v9971_v1 = vadd.f32 %v9939_v27, %v13374_v3  ;;  %v9940_v29 = vmax.f32 %v9908_v54, 0.0  ;;  %v12204_v50 = vpop.f32.mrb[36].mxu1  ;;  %v15681_v54 = vld [vmem:[#allocation7_spill] sm:$0xff] }
 0x999   : > { %10005 = vst.msk [vmem:[%s15426_s23 + $0x10] sm:$0xff] %vm523_vm0, %v9973_v60  ;;  %v9974_v2 = vadd.f32 %v9942_v26, %v13387_v8  ;;  %v9874_v18 = vmul.f32 %v12204_v50, %v15407_v25  ;;  %v9718_v41 = vpop.f32.mrb[37].mxu1 }
 0x99a   : > { %10003 = vst.msk [vmem:[%s15426_s23] sm:$0xff] %vm523_vm0, %v9971_v1  ;;  %v9972_v35 = vadd.f32 %v9940_v29, %v13377_v4  ;;  %v9872_v52 = vmul.f32 %v15407_v25, %v9718_v41  ;;  %v12205_v5 = vpop.f32.mrb[38].mxu1  ;;  %v15682_v1 = vld [vmem:[#allocation5_spill] sm:$0xff] }
 0x99b   : > { %10006 = vst.msk [vmem:[%s15426_s23 + $0x18] sm:$0xff] %vm523_vm0, %v9974_v2  ;;  %v9913_v3 = vadd.f32 %v15412_v47, %v9874_v18  ;;  %v9875_v59 = vmul.f32 %v12205_v5, %v15407_v25  ;;  %v9721_v63 = vpop.f32.mrb[39].mxu1  ;;  %v15683_v18 = vld [vmem:[#allocation8_spill] sm:$0xff]  ;;  %v15684_v5 = vld [vmem:[#allocation6_spill] sm:$0xff] }
 0x99c   : > { %10004 = vst.msk [vmem:[%s15426_s23 + $0x8] sm:$0xff] %vm523_vm0, %v9972_v35  ;;  %v9911_v8 = vadd.f32 %v15412_v47, %v9872_v52  ;;  %v9873_v39 = vmul.f32 %v15407_v25, %v9721_v63 }
 0x99d   : > { %v9945_v58 = vmax.f32 %v9913_v3, 0.0  ;;  %v9914_v4 = vadd.f32 %v15412_v47, %v9875_v59 }
 0x99e   : > { %v9943_v42 = vmax.f32 %v9911_v8, 0.0  ;;  %v9912_v24 = vadd.f32 %v15412_v47, %v9873_v39 }
 0x99f   : > { %v9977_v6 = vadd.f32 %v9945_v58, %v13400_v12  ;;  %v9946_v28 = vmax.f32 %v9914_v4, 0.0 }
 0x9a0   : > { %v9975_v30 = vadd.f32 %v9943_v42, %v13394_v10  ;;  %v9944_v53 = vmax.f32 %v9912_v24, 0.0  ;;  %v12208_v51 = vpop.f32.mrb[40].mxu1 }
 0x9a1   : > { %10009 = vst.msk [vmem:[%s15426_s23 + $0x30] sm:$0xff] %vm523_vm0, %v9977_v6  ;;  %v9978_v20 = vadd.f32 %v9946_v28, %v13407_v13  ;;  %v9878_v31 = vmul.f32 %v12208_v51, %v15407_v25  ;;  %v9734_v49 = vpop.f32.mrb[41].mxu1 }
 0x9a2   : > { %10007 = vst.msk [vmem:[%s15426_s23 + $0x20] sm:$0xff] %vm523_vm0, %v9975_v30  ;;  %v9976_v9 = vadd.f32 %v9944_v53, %v13397_v11  ;;  %v9876_v56 = vmul.f32 %v15407_v25, %v9734_v49  ;;  %v12209_v12 = vpop.f32.mrb[42].mxu1  ;;  %v15685_v53 = vld [vmem:[#allocation11_spill] sm:$0xff] }
 0x9a3   : > { %10010 = vst.msk [vmem:[%s15426_s23 + $0x38] sm:$0xff] %vm523_vm0, %v9978_v20  ;;  %v9917_v10 = vadd.f32 %v15412_v47, %v9878_v31  ;;  %v9879_v22 = vmul.f32 %v12209_v12, %v15407_v25  ;;  %v9737_v57 = vpop.f32.mrb[43].mxu1  ;;  %v15686_v31 = vld [vmem:[#allocation9_spill] sm:$0xff]  ;;  %v15687_v12 = vld [vmem:[#allocation12_spill] sm:$0xff] }
 0x9a4   : > { %10008 = vst.msk [vmem:[%s15426_s23 + $0x28] sm:$0xff] %vm523_vm0, %v9976_v9  ;;  %v9915_v13 = vadd.f32 %v15412_v47, %v9876_v56  ;;  %v9877_v34 = vmul.f32 %v15407_v25, %v9737_v57 }
 0x9a5   : > { %v9949_v7 = vmax.f32 %v9917_v10, 0.0  ;;  %v9918_v11 = vadd.f32 %v15412_v47, %v9879_v22 }
 0x9a6   : > { %v9947_v55 = vmax.f32 %v9915_v13, 0.0  ;;  %v9916_v33 = vadd.f32 %v15412_v47, %v9877_v34  ;;  %v15688_v13 = vld [vmem:[#allocation10_spill] sm:$0xff] }
 0x9a7   : > { %v9981_v62 = vadd.f32 %v9949_v7, %v13425_v16  ;;  %v9950_v32 = vmax.f32 %v9918_v11, 0.0 }
 0x9a8   : > { %v9979_v48 = vadd.f32 %v9947_v55, %v13412_v14  ;;  %v9948_v37 = vmax.f32 %v9916_v33, 0.0  ;;  %v12212_v44 = vpop.f32.mrb[44].mxu1 }
 0x9a9   : > { %10013 = vst.msk [vmem:[%s15426_s23 + $0x50] sm:$0xff] %vm523_vm0, %v9981_v62  ;;  %v9982_v46 = vadd.f32 %v9950_v32, %v13428_v17  ;;  %v9882_v19 = vmul.f32 %v12212_v44, %v15407_v25  ;;  %v9750_v38 = vpop.f32.mrb[45].mxu1 }
 0x9aa   : > { %10011 = vst.msk [vmem:[%s15426_s23 + $0x40] sm:$0xff] %vm523_vm0, %v9979_v48  ;;  %v9980_v45 = vadd.f32 %v9948_v37, %v15680_v15  ;;  %v9880_v43 = vmul.f32 %v15407_v25, %v9750_v38  ;;  %v12213_v16 = vpop.f32.mrb[46].mxu1  ;;  %v15689_v38 = vld [vmem:[#allocation15_spill] sm:$0xff] }
 0x9ab   : > { %10014 = vst.msk [vmem:[%s15426_s23 + $0x58] sm:$0xff] %vm523_vm0, %v9982_v46  ;;  %v9921_v14 = vadd.f32 %v15412_v47, %v9882_v19  ;;  %v9883_v40 = vmul.f32 %v12213_v16, %v15407_v25  ;;  %v9753_v0 = vpop.f32.mrb[47].mxu1 }
 0x9ac   : > { %10012 = vst.msk [vmem:[%s15426_s23 + $0x48] sm:$0xff] %vm523_vm0, %v9980_v45  ;;  %v9919_v17 = vadd.f32 %v15412_v47, %v9880_v43  ;;  %v9881_v21 = vmul.f32 %v15407_v25, %v9753_v0  ;;  %v15690_v43 = vld [vmem:[#allocation13_spill] sm:$0xff]  ;;  %v15691_v0 = vld [vmem:[#allocation16_spill] sm:$0xff] }
 0x9ad   : > { %v9953_v61 = vmax.f32 %v9921_v14, 0.0  ;;  %v9922_v36 = vadd.f32 %v15412_v47, %v9883_v40 }
 0x9ae   : > { %v9951_v23 = vmax.f32 %v9919_v17, 0.0  ;;  %v9920_v27 = vadd.f32 %v15412_v47, %v9881_v21 }
 0x9af   : > { %v9985_v60 = vadd.f32 %v9953_v61, %v15681_v54  ;;  %v9954_v26 = vmax.f32 %v9922_v36, 0.0  ;;  %v15692_v36 = vld [vmem:[#allocation14_spill] sm:$0xff] }
 0x9b0   : > { %v9983_v29 = vadd.f32 %v9951_v23, %v15682_v1  ;;  %v9952_v50 = vmax.f32 %v9920_v27, 0.0  ;;  %v12216_v2 = vpop.f32.mrb[48].mxu1 }
 0x9b1   : > { %10017 = vst.msk [vmem:[%s15426_s23 + $0x70] sm:$0xff] %vm523_vm0, %v9985_v60  ;;  %v9986_v41 = vadd.f32 %v9954_v26, %v15683_v18  ;;  %v9886_v35 = vmul.f32 %v12216_v2, %v15407_v25  ;;  %v9766_v52 = vpop.f32.mrb[49].mxu1 }
 0x9b2   : > { %10015 = vst.msk [vmem:[%s15426_s23 + $0x60] sm:$0xff] %vm523_vm0, %v9983_v29  ;;  %v9984_v3 = vadd.f32 %v9952_v50, %v15684_v5  ;;  %v9884_v59 = vmul.f32 %v15407_v25, %v9766_v52  ;;  %v12217_v63 = vpop.f32.mrb[50].mxu1  ;;  %v15693_v52 = vld [vmem:[#allocation19_spill] sm:$0xff] }
 0x9b3   : > { %10018 = vst.msk [vmem:[%s15426_s23 + $0x78] sm:$0xff] %vm523_vm0, %v9986_v41  ;;  %v9925_v8 = vadd.f32 %v15412_v47, %v9886_v35  ;;  %v9887_v39 = vmul.f32 %v12217_v63, %v15407_v25  ;;  %v9769_v58 = vpop.f32.mrb[51].mxu1 }
 0x9b4   : > { %10016 = vst.msk [vmem:[%s15426_s23 + $0x68] sm:$0xff] %vm523_vm0, %v9984_v3  ;;  %v9923_v4 = vadd.f32 %v15412_v47, %v9884_v59  ;;  %v9885_v42 = vmul.f32 %v15407_v25, %v9769_v58  ;;  %v15694_v59 = vld [vmem:[#allocation17_spill] sm:$0xff]  ;;  %v15695_v58 = vld [vmem:[#allocation20_spill] sm:$0xff] }
 0x9b5   : > { %v9957_v24 = vmax.f32 %v9925_v8, 0.0  ;;  %v9926_v6 = vadd.f32 %v15412_v47, %v9887_v39 }
 0x9b6   : > { %v9955_v28 = vmax.f32 %v9923_v4, 0.0  ;;  %v9924_v30 = vadd.f32 %v15412_v47, %v9885_v42 }
 0x9b7   : > { %v9989_v51 = vadd.f32 %v9957_v24, %v15685_v53  ;;  %v9958_v20 = vmax.f32 %v9926_v6, 0.0  ;;  %v15696_v6 = vld [vmem:[#allocation18_spill] sm:$0xff] }
 0x9b8   : > { %v9987_v49 = vadd.f32 %v9955_v28, %v15686_v31  ;;  %v9956_v9 = vmax.f32 %v9924_v30, 0.0  ;;  %v12220_v56 = vpop.f32.mrb[52].mxu1 }
 0x9b9   : > { %10021 = vst.msk [vmem:[%s15426_s23 + $0x90] sm:$0xff] %vm523_vm0, %v9989_v51  ;;  %v9990_v10 = vadd.f32 %v9958_v20, %v15687_v12  ;;  %v9890_v22 = vmul.f32 %v12220_v56, %v15407_v25  ;;  %v9782_v57 = vpop.f32.mrb[53].mxu1 }
 0x9ba   : > { %10019 = vst.msk [vmem:[%s15426_s23 + $0x80] sm:$0xff] %vm523_vm0, %v9987_v49  ;;  %v9988_v34 = vadd.f32 %v9956_v9, %v15688_v13  ;;  %v9888_v7 = vmul.f32 %v15407_v25, %v9782_v57  ;;  %v12221_v11 = vpop.f32.mrb[54].mxu1  ;;  %v15697_v57 = vld [vmem:[#allocation23_spill] sm:$0xff] }
 0x9bb   : > { %10022 = vst.msk [vmem:[%s15426_s23 + $0x98] sm:$0xff] %vm523_vm0, %v9990_v10  ;;  %v9929_v55 = vadd.f32 %v15412_v47, %v9890_v22  ;;  %v9891_v33 = vmul.f32 %v12221_v11, %v15407_v25  ;;  %v9785_v62 = vpop.f32.mrb[55].mxu1 }
 0x9bc   : > { %10020 = vst.msk [vmem:[%s15426_s23 + $0x88] sm:$0xff] %vm523_vm0, %v9988_v34  ;;  %v9927_v32 = vadd.f32 %v15412_v47, %v9888_v7  ;;  %v9889_v48 = vmul.f32 %v15407_v25, %v9785_v62  ;;  %v15698_v7 = vld [vmem:[#allocation21_spill] sm:$0xff] }
 0x9bd   : > { %v9961_v37 = vmax.f32 %v9929_v55, 0.0  ;;  %v9930_v44 = vadd.f32 %v15412_v47, %v9891_v33  ;;  %v15699_v33 = vld [vmem:[#allocation24_spill] sm:$0xff] }
 0x9be   : > { %v9959_v46 = vmax.f32 %v9927_v32, 0.0  ;;  %v9928_v19 = vadd.f32 %v15412_v47, %v9889_v48  ;;  %v15700_v32 = vld [vmem:[#allocation22_spill] sm:$0xff] }
 0x9bf   : > { %v9993_v15 = vadd.f32 %v9961_v37, %v15689_v38  ;;  %v9962_v45 = vmax.f32 %v9930_v44, 0.0 }
 0x9c0   : > { %v9991_v16 = vadd.f32 %v9959_v46, %v15690_v43  ;;  %v9960_v14 = vmax.f32 %v9928_v19, 0.0  ;;  %v12224_v40 = vpop.f32.mrb[56].mxu1 }
 0x9c1   : > { %10025 = vst.msk [vmem:[%s15426_s23 + $0xb0] sm:$0xff] %vm523_vm0, %v9993_v15  ;;  %v9994_v17 = vadd.f32 %v9962_v45, %v15691_v0  ;;  %v9894_v21 = vmul.f32 %v12224_v40, %v15407_v25  ;;  %v9798_v61 = vpop.f32.mrb[57].mxu1 }
 0x9c2   : > { %10023 = vst.msk [vmem:[%s15426_s23 + $0xa0] sm:$0xff] %vm523_vm0, %v9991_v16  ;;  %v9992_v23 = vadd.f32 %v9960_v14, %v15692_v36  ;;  %v9892_v27 = vmul.f32 %v15407_v25, %v9798_v61  ;;  %v12225_v54 = vpop.f32.mrb[58].mxu1 }
 0x9c3   : > { %10026 = vst.msk [vmem:[%s15426_s23 + $0xb8] sm:$0xff] %vm523_vm0, %v9994_v17  ;;  %v9933_v60 = vadd.f32 %v15412_v47, %v9894_v21  ;;  %v9895_v26 = vmul.f32 %v12225_v54, %v15407_v25  ;;  %v9801_v1 = vpop.f32.mrb[59].mxu1 }
 0x9c4   : > { %10024 = vst.msk [vmem:[%s15426_s23 + $0xa8] sm:$0xff] %vm523_vm0, %v9992_v23  ;;  %v9931_v29 = vadd.f32 %v15412_v47, %v9892_v27  ;;  %v9893_v50 = vmul.f32 %v15407_v25, %v9801_v1 }
 0x9c5   : > { %v9965_v2 = vmax.f32 %v9933_v60, 0.0  ;;  %v9934_v18 = vadd.f32 %v15412_v47, %v9895_v26 }
 0x9c6   : > { %v9963_v41 = vmax.f32 %v9931_v29, 0.0  ;;  %v9932_v35 = vadd.f32 %v15412_v47, %v9893_v50 }
 0x9c7   : > { %v9997_v5 = vadd.f32 %v9965_v2, %v15693_v52  ;;  %v9966_v3 = vmax.f32 %v9934_v18, 0.0 }
 0x9c8   : > { %v9995_v63 = vadd.f32 %v9963_v41, %v15694_v59  ;;  %v9964_v8 = vmax.f32 %v9932_v35, 0.0  ;;  %v12228_v39 = vpop.f32.mrb[60].mxu1 }
 0x9c9   : > { %10029 = vst.msk [vmem:[%s15426_s23 + $0xd0] sm:$0xff] %vm523_vm0, %v9997_v5  ;;  %v9998_v4 = vadd.f32 %v9966_v3, %v15695_v58  ;;  %v9898_v42 = vmul.f32 %v12228_v39, %v15407_v25  ;;  %v9814_v24 = vpop.f32.mrb[61].mxu1 }
 0x9ca   : > { %10027 = vst.msk [vmem:[%s15426_s23 + $0xc0] sm:$0xff] %vm523_vm0, %v9995_v63  ;;  %v9996_v28 = vadd.f32 %v9964_v8, %v15696_v6  ;;  %v9896_v30 = vmul.f32 %v15407_v25, %v9814_v24  ;;  %v12229_v53 = vpop.f32.mrb[62].mxu1 }
 0x9cb   : > { %10030 = vst.msk [vmem:[%s15426_s23 + $0xd8] sm:$0xff] %vm523_vm0, %v9998_v4  ;;  %v9937_v51 = vadd.f32 %v15412_v47, %v9898_v42  ;;  %v9899_v20 = vmul.f32 %v12229_v53, %v15407_v25  ;;  %v9817_v31 = vpop.f32.mrb[63].mxu1 }
 0x9cc   : > { %10028 = vst.msk [vmem:[%s15426_s23 + $0xc8] sm:$0xff] %vm523_vm0, %v9996_v28  ;;  %v9935_v49 = vadd.f32 %v15412_v47, %v9896_v30  ;;  %v9897_v9 = vmul.f32 %v15407_v25, %v9817_v31 }
 0x9cd   : > { %v9969_v56 = vmax.f32 %v9937_v51, 0.0  ;;  %v9938_v12 = vadd.f32 %v15412_v47, %v9899_v20 }
 0x9ce   : > { %v9967_v10 = vmax.f32 %v9935_v49, 0.0  ;;  %v9936_v22 = vadd.f32 %v15412_v47, %v9897_v9 }
 0x9cf   : > { %v10001_v13 = vadd.f32 %v9969_v56, %v15697_v57  ;;  %v9970_v34 = vmax.f32 %v9938_v12, 0.0 }
 0x9d0   : > { %v9999_v11 = vadd.f32 %v9967_v10, %v15698_v7  ;;  %v9968_v55 = vmax.f32 %v9936_v22, 0.0 }
 0x9d1   : > { %10033 = vst.msk [vmem:[%s15426_s23 + $0xf0] sm:$0xff] %vm523_vm0, %v10001_v13  ;;  %v10002_v62 = vadd.f32 %v9970_v34, %v15699_v33 }
 0x9d2   : > { %10031 = vst.msk [vmem:[%s15426_s23 + $0xe0] sm:$0xff] %vm523_vm0, %v9999_v11  ;;  %v10000_v25 = vadd.f32 %v9968_v55, %v15700_v32 }
 0x9d3   : > { %10034 = vst.msk [vmem:[%s15426_s23 + $0xf8] sm:$0xff] %vm523_vm0, %v10002_v62 }
 0x9d4   : > { %10032 = vst.msk [vmem:[%s15426_s23 + $0xe8] sm:$0xff] %vm523_vm0, %v10000_v25 }
 0x9d5 PF: > { %s26_s21 = sadd.s32 1, %s13142_s21  }
 0x9d6   : > { %p23_p4 = scmp.ge.s32.totalorder %s26_s21, 4  }
 0x9d8   :  { %25 = sbr.rel (!%p23_p4) target bundleno = 2 (0x2), region = 142 }

</bundles_post_ra>
